<compile_context>
chip_gen: v7x
topology: tpu7x:2x2x1
jax: 0.10.0
libtpu: 0.0.40
codegen_flags: <defaults>
</compile_context>

<pallas_src>
import functools

import jax
import jax.numpy as jnp
from jax import lax
from jax.experimental import pallas as pl
from jax.experimental.pallas import tpu as pltpu


_PAD = 8  # left pad of the activation scratch (keeps the interior store sublane-aligned)


def _cparams(sem):
    return pltpu.CompilerParams(
        dimension_semantics=sem,
        vmem_limit_bytes=32 * 1024 * 1024,
    )


# ----------------------------- Pallas kernels ------------------------------

def _deconv_kernel(x_ref, w_ref, b_ref, o_ref, *, hu, wu, co):
    """ConvTranspose2d(k=2, s=2) for one image.

    One (Hu*Wu, Cin) @ (Cin, 4*Co) matmul; the stride-2 pixel shuffle costs
    nothing: output row 2h+i is written from the parity-i column block, and
    the (Wu, 2*Co) minor layout flattens (row-major) to exactly (2*Wu, Co).
    """
    cin = x_ref.shape[-1]
    x = x_ref[0].reshape(hu * wu, cin)                                 # (P, Cin)
    y = jnp.dot(x, w_ref[...], preferred_element_type=jnp.float32) + b_ref[...]
    c2 = 2 * co
    for i in range(2):                                                 # row parity
        yi = y[:, i * c2:(i + 1) * c2].reshape(hu, wu, c2)
        for h in range(hu):
            o_ref[0, 2 * h + i] = yi[h]


def _fill_halo(scr, H, W):
    """Zero only the halo strips of the padded scratch (interior is rewritten)."""
    wp = scr.shape[1]
    c = scr.shape[2]
    scr[0:1] = jnp.zeros((1, wp, c), jnp.float32)
    scr[H + 1:H + 2] = jnp.zeros((1, wp, c), jnp.float32)
    scr[:, _PAD - 1:_PAD] = jnp.zeros((H + 2, 1, c), jnp.float32)
    scr[:, _PAD + W:_PAD + W + 1] = jnp.zeros((H + 2, 1, c), jnp.float32)


def _im2col_dot(scr, xcol, w_ref, b_ref, H, W):
    """Build the (H*W, 9*C) im2col operand and do ONE MXU dot -> (Co, H*W)."""
    c = scr.shape[-1]
    for k in range(9):
        kh, kw = divmod(k, 3)
        win = scr[kh:kh + H, _PAD - 1 + kw:_PAD - 1 + kw + W, :]
        xcol[:, k * c:(k + 1) * c] = win.reshape(H * W, c)
    acc = lax.dot_general(w_ref[...], xcol[...],
                          (((1,), (1,)), ((), ())),
                          preferred_element_type=jnp.float32)          # (Co, H*W)
    return jnp.maximum(acc + b_ref[...], 0.0)                          # bias + ReLU


def _conv1_kernel(down_ref, up_ref, w_ref, b_ref,
                  y_ref, s_ref, q_ref, xcat, xcol, *, H, W, dh, dw, cs):
    """Fused: center-crop + channel-concat + pad + conv3x3 + bias + ReLU + BN partials."""
    _fill_halo(xcat, H, W)
    # crop + concat written straight into the padded VMEM scratch
    xcat[1:1 + H, _PAD:_PAD + W, :cs] = down_ref[0, dh:dh + H, dw:dw + W, :]
    xcat[1:1 + H, _PAD:_PAD + W, cs:] = up_ref[0]
    acc = _im2col_dot(xcat, xcol, w_ref, b_ref, H, W)                  # (Co, H*W)
    y_ref[0] = acc                                                     # lane-dense store
    s_ref[0] = jnp.sum(acc, axis=1, keepdims=True)
    q_ref[0] = jnp.sum(acc * acc, axis=1, keepdims=True)


def _conv2_kernel(y1_ref, sc_ref, sh_ref, w_ref, b_ref,
                  y2_ref, s_ref, q_ref, xp, xcol, *, H, W):
    """Fused: BN1 apply + pad + conv3x3 + bias + ReLU + BN partials."""
    c1 = xp.shape[-1]
    h1 = y1_ref[0] * sc_ref[...] + sh_ref[...]                         # (C1, H*W)
    h1_hwc = jnp.transpose(h1, (1, 0)).reshape(H, W, c1)               # -> NHWC tile
    _fill_halo(xp, H, W)
    xp[1:1 + H, _PAD:_PAD + W, :] = h1_hwc
    acc = _im2col_dot(xp, xcol, w_ref, b_ref, H, W)                    # (Co2, H*W)
    y2_ref[0] = acc
    s_ref[0] = jnp.sum(acc, axis=1, keepdims=True)
    q_ref[0] = jnp.sum(acc * acc, axis=1, keepdims=True)


def _affine_kernel(x_ref, s_ref, t_ref, o_ref):
    o_ref[...] = x_ref[...] * s_ref[...] + t_ref[...]


# ------------------------------ Kernel wrappers -----------------------------

def deconv2x2_stride2(up_nhwc, w_dec, b_dec, co_up):
    n, hu, wu, cin = up_nhwc.shape
    h = 2 * hu
    kernel = functools.partial(_deconv_kernel, hu=hu, wu=wu, co=co_up)
    raw = pl.pallas_call(
        kernel,
        out_shape=jax.ShapeDtypeStruct((n, h, wu, 2 * co_up), jnp.float32),
        grid=(n,),
        in_specs=[
            pl.BlockSpec((1, hu, wu, cin), lambda i: (i, 0, 0, 0)),
            pl.BlockSpec((cin, 4 * co_up), lambda i: (0, 0)),
            pl.BlockSpec((1, 4 * co_up), lambda i: (0, 0)),
        ],
        out_specs=pl.BlockSpec((1, h, wu, 2 * co_up), lambda i: (i, 0, 0, 0)),
        compiler_params=_cparams(("parallel",)),
    )(up_nhwc, w_dec, b_dec)
    # free row-major reinterpretation: (N, H, Wu, 2*Co) == (N, H, 2*Wu, Co)
    return raw.reshape(n, h, 2 * wu, co_up)


def conv1_fused(down_nhwc, up_out, w1, b1, dh, dw):
    n, hd, wd, cs = down_nhwc.shape
    _, H, W, cu = up_out.shape
    co = w1.shape[0]
    ct = cs + cu
    kernel = functools.partial(_conv1_kernel, H=H, W=W, dh=dh, dw=dw, cs=cs)
    return pl.pallas_call(
        kernel,
        out_shape=(jax.ShapeDtypeStruct((n, co, H * W), jnp.float32),
                   jax.ShapeDtypeStruct((n, co, 1), jnp.float32),
                   jax.ShapeDtypeStruct((n, co, 1), jnp.float32)),
        grid=(n,),
        in_specs=[
            pl.BlockSpec((1, hd, wd, cs), lambda i: (i, 0, 0, 0)),
            pl.BlockSpec((1, H, W, cu), lambda i: (i, 0, 0, 0)),
            pl.BlockSpec((co, 9 * ct), lambda i: (0, 0)),
            pl.BlockSpec((co, 1), lambda i: (0, 0)),
        ],
        out_specs=(
            pl.BlockSpec((1, co, H * W), lambda i: (i, 0, 0)),
            pl.BlockSpec((1, co, 1), lambda i: (i, 0, 0)),
            pl.BlockSpec((1, co, 1), lambda i: (i, 0, 0)),
        ),
        scratch_shapes=[
            pltpu.VMEM((H + 2, _PAD + W + 1, ct), jnp.float32),   # padded activation
            pltpu.VMEM((H * W, 9 * ct), jnp.float32),             # im2col operand
        ],
        compiler_params=_cparams(("parallel",)),
    )(down_nhwc, up_out, w1, b1)


def conv2_fused(y1, sc1, sh1, w2, b2, H, W):
    n, c1, hw = y1.shape
    co = w2.shape[0]
    kernel = functools.partial(_conv2_kernel, H=H, W=W)
    return pl.pallas_call(
        kernel,
        out_shape=(jax.ShapeDtypeStruct((n, co, hw), jnp.float32),
                   jax.ShapeDtypeStruct((n, co, 1), jnp.float32),
                   jax.ShapeDtypeStruct((n, co, 1), jnp.float32)),
        grid=(n,),
        in_specs=[
            pl.BlockSpec((1, c1, hw), lambda i: (i, 0, 0)),
            pl.BlockSpec((c1, 1), lambda i: (0, 0)),
            pl.BlockSpec((c1, 1), lambda i: (0, 0)),
            pl.BlockSpec((co, 9 * c1), lambda i: (0, 0)),
            pl.BlockSpec((co, 1), lambda i: (0, 0)),
        ],
        out_specs=(
            pl.BlockSpec((1, co, hw), lambda i: (i, 0, 0)),
            pl.BlockSpec((1, co, 1), lambda i: (i, 0, 0)),
            pl.BlockSpec((1, co, 1), lambda i: (i, 0, 0)),
        ),
        scratch_shapes=[
            pltpu.VMEM((H + 2, _PAD + W + 1, c1), jnp.float32),
            pltpu.VMEM((H * W, 9 * c1), jnp.float32),
        ],
        compiler_params=_cparams(("parallel",)),
    )(y1, sc1, sh1, w2, b2)


def bn_apply(y, scale, shift):
    """Per-channel affine on the channel-major (N*C, H*W) view (lane-dense)."""
    n, c, hw = y.shape
    rows = n * c
    x2 = y.reshape(rows, hw)
    s2 = jnp.tile(scale, n).reshape(rows, 1)
    t2 = jnp.tile(shift, n).reshape(rows, 1)
    br = rows if rows <= 1024 else 1024
    out = pl.pallas_call(
        _affine_kernel,
        out_shape=jax.ShapeDtypeStruct((rows, hw), jnp.float32),
        grid=(pl.cdiv(rows, br),),
        in_specs=[
            pl.BlockSpec((br, hw), lambda i: (i, 0)),
            pl.BlockSpec((br, 1), lambda i: (i, 0)),
            pl.BlockSpec((br, 1), lambda i: (i, 0)),
        ],
        out_specs=pl.BlockSpec((br, hw), lambda i: (i, 0)),
        compiler_params=_cparams(("parallel",)),
    )(x2, s2, t2)
    return out.reshape(n, c, hw)


# --------------------------------- Glue -------------------------------------

def _bn_scale_shift(ssum, ssq, gamma, beta, count, eps):
    # Cross-image BatchNorm reduction from per-image (sum, sum-of-squares).
    # NOTE: E[x^2]-E[x]^2 in f32; fine at these scales (see review concern).
    mean = jnp.sum(ssum, axis=(0, 2)) / count
    var = jnp.sum(ssq, axis=(0, 2)) / count - mean * mean      # biased variance
    scale = gamma * lax.rsqrt(var + eps)
    shift = beta - mean * scale
    return scale, shift


def _conv_w_flat(w_oihw):
    """(Co, Ci, 3, 3) -> (Co, 9*Ci), K ordered (kh, kw, ci) to match im2col."""
    co = w_oihw.shape[0]
    return jnp.transpose(w_oihw, (0, 2, 3, 1)).reshape(co, -1)


def up_layer_forward(up_x_nchw, down_x_nchw, p, eps=1e-5):
    n, cin, hu, wu = up_x_nchw.shape
    co_up = p["up_w"].shape[1]
    H, W = 2 * hu, 2 * wu

    # NHWC views of the (small) inputs.
    # TODO(synk): consume up_x / down_x natively in NCHW inside the kernels to
    # drop these two input transposes as well.
    up_nhwc = jnp.transpose(up_x_nchw, (0, 2, 3, 1))
    down_nhwc = jnp.transpose(down_x_nchw, (0, 2, 3, 1))

    # --- ConvTranspose2d(kernel=2, stride=2), pixel shuffle folded into layout
    w_dec = jnp.transpose(p["up_w"], (0, 2, 3, 1)).reshape(cin, 4 * co_up)
    b_dec = jnp.tile(p["up_b"], 4).reshape(1, 4 * co_up)
    up_out = deconv2x2_stride2(up_nhwc, w_dec, b_dec, co_up)    # (N, H, W, Co_up)

    dh = (down_x_nchw.shape[2] - H) // 2
    dw = (down_x_nchw.shape[3] - W) // 2
    count = float(n * H * W)

    # --- block 1: crop+concat+pad+conv+ReLU fused, BN partials accumulated ---
    co1 = p["c1_w"].shape[0]
    w1 = _conv_w_flat(p["c1_w"])
    y1, s1, q1 = conv1_fused(down_nhwc, up_out, w1,
                             p["c1_b"].reshape(co1, 1), dh, dw)
    sc1, sh1 = _bn_scale_shift(s1, q1, p["bn1_g"], p["bn1_b"], count, eps)

    # --- block 2: BN1-apply + pad + conv + ReLU fused, BN partials ------------
    co2 = p["c2_w"].shape[0]
    w2 = _conv_w_flat(p["c2_w"])
    y2, s2, q2 = conv2_fused(y1, sc1.reshape(co1, 1), sh1.reshape(co1, 1),
                             w2, p["c2_b"].reshape(co2, 1), H, W)
    sc2, sh2 = _bn_scale_shift(s2, q2, p["bn2_g"], p["bn2_b"], count, eps)

    # --- final BatchNorm apply; output is already channel-major (NCHW) --------
    out = bn_apply(y2, sc2, sh2)                                # (N, Co2, H*W)
    return out.reshape(n, co2, H, W)


# ----------------------- Pure-JAX (lax) reference ---------------------------

def reference(up_x, down_x, p, eps=1e-5):
    dn = ("NCHW", "OIHW", "NCHW")
    # ConvTranspose2d(k=2,s=2,p=0) == lhs-dilated conv with flipped/swapped weight
    w_fwd = jnp.flip(jnp.transpose(p["up_w"], (1, 0, 2, 3)), axis=(2, 3))
    up = jax.lax.conv_general_dilated(
        up_x, w_fwd, (1, 1), [(1, 1), (1, 1)], lhs_dilation=(2, 2),
        dimension_numbers=dn) + p["up_b"][None, :, None, None]

    h_up, w_up = up.shape[2], up.shape[3]
    dh = int((down_x.shape[2] - h_up) / 2)
    dw = int((down_x.shape[3] - w_up) / 2)
    crop = down_x[:, :, dh:dh + h_up, dw:dw + w_up]
    x = jnp.concatenate([crop, up], axis=1)

    def conv_relu_bn_ref(x, w, b, g, bt):
        y = jax.lax.conv_general_dilated(
            x, w, (1, 1), [(1, 1), (1, 1)], dimension_numbers=dn)
        y = jnp.maximum(y + b[None, :, None, None], 0.0)
        mean = jnp.mean(y, axis=(0, 2, 3), keepdims=True)
        var = jnp.mean(jnp.square(y - mean), axis=(0, 2, 3), keepdims=True)
        y = (y - mean) * jax.lax.rsqrt(var + eps)
        return y * g[None, :, None, None] + bt[None, :, None, None]

    x = conv_relu_bn_ref(x, p["c1_w"], p["c1_b"], p["bn1_g"], p["bn1_b"])
    x = conv_relu_bn_ref(x, p["c2_w"], p["c2_b"], p["bn2_g"], p["bn2_b"])
    return x


# --------------------------------- Main -------------------------------------

if __name__ == "__main__":
    in_c, out_c = 8, 4          # UpLayer(in_channels=8, out_channels=4)
    N, Hu, Wu = 2, 8, 8         # up_x spatial (deconv doubles to 16x16)
    Hd, Wd = 20, 20             # down_x spatial (exercises the center crop)

    key = jax.random.PRNGKey(0)
    ks = jax.random.split(key, 12)
    p = {
        "up_w": 0.1 * jax.random.normal(ks[0], (in_c, out_c, 2, 2), jnp.float32),
        "up_b": 0.1 * jax.random.normal(ks[1], (out_c,), jnp.float32),
        "c1_w": 0.1 * jax.random.normal(ks[2], (out_c, in_c, 3, 3), jnp.float32),
        "c1_b": 0.1 * jax.random.normal(ks[3], (out_c,), jnp.float32),
        "bn1_g": 1.0 + 0.1 * jax.random.normal(ks[4], (out_c,), jnp.float32),
        "bn1_b": 0.1 * jax.random.normal(ks[5], (out_c,), jnp.float32),
        "c2_w": 0.1 * jax.random.normal(ks[6], (out_c, out_c, 3, 3), jnp.float32),
        "c2_b": 0.1 * jax.random.normal(ks[7], (out_c,), jnp.float32),
        "bn2_g": 1.0 + 0.1 * jax.random.normal(ks[8], (out_c,), jnp.float32),
        "bn2_b": 0.1 * jax.random.normal(ks[9], (out_c,), jnp.float32),
    }

    up_x = jax.random.normal(ks[10], (N, in_c, Hu, Wu), jnp.float32)            # NCHW
    down_x = jax.random.normal(ks[11], (N, in_c - out_c, Hd, Wd), jnp.float32)  # NCHW

    out = jax.jit(up_layer_forward)(up_x, down_x, p)
    out = jax.block_until_ready(out)

    ref = jax.block_until_ready(reference(up_x, down_x, p))
    assert out.shape == (N, out_c, 2 * Hu, 2 * Wu), out.shape
    # all-f32 pipeline (review correctness note) => tight tolerance
    assert jnp.allclose(out, ref, atol=1e-3, rtol=1e-3), float(
        jnp.max(jnp.abs(out - ref)))

    print("KERNEL_OK")
</pallas_src>

<mosaic_0001>
module attributes {stable_mosaic.version = 11 : i64} {
  func.func @_deconv_kernel(%arg0: i32, %arg1: memref<1x8x8x8xf32, #tpu.memory_space<vmem>>, %arg2: memref<8x16xf32, #tpu.memory_space<vmem>>, %arg3: memref<1x16xf32, #tpu.memory_space<vmem>>, %arg4: memref<1x16x8x8xf32, #tpu.memory_space<vmem>>) attributes {dimension_semantics = [#tpu.dimension_semantics<parallel>], iteration_bounds = array<i64: 2>, scalar_prefetch = 0 : i64, scratch_operands = 0 : i64, tpu.core_type = #tpu.core_type<tc>, window_params = [{transform_indices = @transform_0, window_bounds = array<i64: 1, 8, 8, 8>}, {pipeline_mode = #tpu.pipeline_mode<synchronous>, transform_indices = @transform_1, window_bounds = array<i64: 8, 16>}, {pipeline_mode = #tpu.pipeline_mode<synchronous>, transform_indices = @transform_2, window_bounds = array<i64: 1, 16>}, {transform_indices = @transform_3, window_bounds = array<i64: 1, 16, 8, 8>}]} {
    %c0 = arith.constant 0 : index
    %c0_0 = arith.constant 0 : index
    %c0_1 = arith.constant 0 : index
    %c0_2 = arith.constant 0 : index
    %0 = vector.load %arg1[%c0, %c0_0, %c0_1, %c0_2] : memref<1x8x8x8xf32, #tpu.memory_space<vmem>>, vector<1x8x8x8xf32>
    %1 = vector.shape_cast %0 : vector<1x8x8x8xf32> to vector<8x8x8xf32>
    %2 = vector.shape_cast %1 : vector<8x8x8xf32> to vector<64x8xf32>
    %c0_3 = arith.constant 0 : index
    %c0_4 = arith.constant 0 : index
    %3 = vector.load %arg2[%c0_3, %c0_4] : memref<8x16xf32, #tpu.memory_space<vmem>>, vector<8x16xf32>
    %cst = arith.constant dense<0.000000e+00> : vector<64x16xf32>
    %4 = tpu.matmul %2, %3, %cst {dimension_numbers = #tpu.dot_dimension_numbers<[1], [0], [0], [1], [0, 0, 1, 1], [], []>} : vector<64x8xf32>, vector<8x16xf32>, vector<64x16xf32> -> vector<64x16xf32>
    %c0_5 = arith.constant 0 : index
    %c0_6 = arith.constant 0 : index
    %5 = vector.load %arg3[%c0_5, %c0_6] : memref<1x16xf32, #tpu.memory_space<vmem>>, vector<1x16xf32>
    %6 = vector.broadcast %5 : vector<1x16xf32> to vector<64x16xf32>
    %7 = arith.addf %4, %6 : vector<64x16xf32>
    %8 = vector.extract_strided_slice %7 {offsets = [0, 0], sizes = [64, 8], strides = [1, 1]} : vector<64x16xf32> to vector<64x8xf32>
    %9 = vector.shape_cast %8 : vector<64x8xf32> to vector<8x8x8xf32>
    %10 = vector.extract_strided_slice %9 {offsets = [0, 0, 0], sizes = [1, 8, 8], strides = [1, 1, 1]} : vector<8x8x8xf32> to vector<1x8x8xf32>
    %11 = vector.shape_cast %10 : vector<1x8x8xf32> to vector<8x8xf32>
    %c0_7 = arith.constant 0 : index
    %c0_8 = arith.constant 0 : index
    %c0_9 = arith.constant 0 : index
    %c0_10 = arith.constant 0 : index
    %12 = vector.load %arg4[%c0_7, %c0_8, %c0_9, %c0_10] : memref<1x16x8x8xf32, #tpu.memory_space<vmem>>, vector<1x1x8x8xf32>
    %13 = vector.shape_cast %12 : vector<1x1x8x8xf32> to vector<8x8xf32>
    %14 = vector.shape_cast %11 : vector<8x8xf32> to vector<1x1x8x8xf32>
    tpu.vector_store %arg4[%c0_7, %c0_8, %c0_9, %c0_10], %14 {strides = array<i32>} : memref<1x16x8x8xf32, #tpu.memory_space<vmem>>, vector<1x1x8x8xf32>,
    %15 = vector.extract_strided_slice %9 {offsets = [1, 0, 0], sizes = [1, 8, 8], strides = [1, 1, 1]} : vector<8x8x8xf32> to vector<1x8x8xf32>
    %16 = vector.shape_cast %15 : vector<1x8x8xf32> to vector<8x8xf32>
    %c0_11 = arith.constant 0 : index
    %c2 = arith.constant 2 : index
    %c0_12 = arith.constant 0 : index
    %c0_13 = arith.constant 0 : index
    %17 = vector.load %arg4[%c0_11, %c2, %c0_12, %c0_13] : memref<1x16x8x8xf32, #tpu.memory_space<vmem>>, vector<1x1x8x8xf32>
    %18 = vector.shape_cast %17 : vector<1x1x8x8xf32> to vector<8x8xf32>
    %19 = vector.shape_cast %16 : vector<8x8xf32> to vector<1x1x8x8xf32>
    tpu.vector_store %arg4[%c0_11, %c2, %c0_12, %c0_13], %19 {strides = array<i32>} : memref<1x16x8x8xf32, #tpu.memory_space<vmem>>, vector<1x1x8x8xf32>,
    %20 = vector.extract_strided_slice %9 {offsets = [2, 0, 0], sizes = [1, 8, 8], strides = [1, 1, 1]} : vector<8x8x8xf32> to vector<1x8x8xf32>
    %21 = vector.shape_cast %20 : vector<1x8x8xf32> to vector<8x8xf32>
    %c0_14 = arith.constant 0 : index
    %c4 = arith.constant 4 : index
    %c0_15 = arith.constant 0 : index
    %c0_16 = arith.constant 0 : index
    %22 = vector.load %arg4[%c0_14, %c4, %c0_15, %c0_16] : memref<1x16x8x8xf32, #tpu.memory_space<vmem>>, vector<1x1x8x8xf32>
    %23 = vector.shape_cast %22 : vector<1x1x8x8xf32> to vector<8x8xf32>
    %24 = vector.shape_cast %21 : vector<8x8xf32> to vector<1x1x8x8xf32>
    tpu.vector_store %arg4[%c0_14, %c4, %c0_15, %c0_16], %24 {strides = array<i32>} : memref<1x16x8x8xf32, #tpu.memory_space<vmem>>, vector<1x1x8x8xf32>,
    %25 = vector.extract_strided_slice %9 {offsets = [3, 0, 0], sizes = [1, 8, 8], strides = [1, 1, 1]} : vector<8x8x8xf32> to vector<1x8x8xf32>
    %26 = vector.shape_cast %25 : vector<1x8x8xf32> to vector<8x8xf32>
    %c0_17 = arith.constant 0 : index
    %c6 = arith.constant 6 : index
    %c0_18 = arith.constant 0 : index
    %c0_19 = arith.constant 0 : index
    %27 = vector.load %arg4[%c0_17, %c6, %c0_18, %c0_19] : memref<1x16x8x8xf32, #tpu.memory_space<vmem>>, vector<1x1x8x8xf32>
    %28 = vector.shape_cast %27 : vector<1x1x8x8xf32> to vector<8x8xf32>
    %29 = vector.shape_cast %26 : vector<8x8xf32> to vector<1x1x8x8xf32>
    tpu.vector_store %arg4[%c0_17, %c6, %c0_18, %c0_19], %29 {strides = array<i32>} : memref<1x16x8x8xf32, #tpu.memory_space<vmem>>, vector<1x1x8x8xf32>,
    %30 = vector.extract_strided_slice %9 {offsets = [4, 0, 0], sizes = [1, 8, 8], strides = [1, 1, 1]} : vector<8x8x8xf32> to vector<1x8x8xf32>
    %31 = vector.shape_cast %30 : vector<1x8x8xf32> to vector<8x8xf32>
    %c0_20 = arith.constant 0 : index
    %c8 = arith.constant 8 : index
    %c0_21 = arith.constant 0 : index
    %c0_22 = arith.constant 0 : index
    %32 = vector.load %arg4[%c0_20, %c8, %c0_21, %c0_22] : memref<1x16x8x8xf32, #tpu.memory_space<vmem>>, vector<1x1x8x8xf32>
    %33 = vector.shape_cast %32 : vector<1x1x8x8xf32> to vector<8x8xf32>
    %34 = vector.shape_cast %31 : vector<8x8xf32> to vector<1x1x8x8xf32>
    tpu.vector_store %arg4[%c0_20, %c8, %c0_21, %c0_22], %34 {strides = array<i32>} : memref<1x16x8x8xf32, #tpu.memory_space<vmem>>, vector<1x1x8x8xf32>,
    %35 = vector.extract_strided_slice %9 {offsets = [5, 0, 0], sizes = [1, 8, 8], strides = [1, 1, 1]} : vector<8x8x8xf32> to vector<1x8x8xf32>
    %36 = vector.shape_cast %35 : vector<1x8x8xf32> to vector<8x8xf32>
    %c0_23 = arith.constant 0 : index
    %c10 = arith.constant 10 : index
    %c0_24 = arith.constant 0 : index
    %c0_25 = arith.constant 0 : index
    %37 = vector.load %arg4[%c0_23, %c10, %c0_24, %c0_25] : memref<1x16x8x8xf32, #tpu.memory_space<vmem>>, vector<1x1x8x8xf32>
    %38 = vector.shape_cast %37 : vector<1x1x8x8xf32> to vector<8x8xf32>
    %39 = vector.shape_cast %36 : vector<8x8xf32> to vector<1x1x8x8xf32>
    tpu.vector_store %arg4[%c0_23, %c10, %c0_24, %c0_25], %39 {strides = array<i32>} : memref<1x16x8x8xf32, #tpu.memory_space<vmem>>, vector<1x1x8x8xf32>,
    %40 = vector.extract_strided_slice %9 {offsets = [6, 0, 0], sizes = [1, 8, 8], strides = [1, 1, 1]} : vector<8x8x8xf32> to vector<1x8x8xf32>
    %41 = vector.shape_cast %40 : vector<1x8x8xf32> to vector<8x8xf32>
    %c0_26 = arith.constant 0 : index
    %c12 = arith.constant 12 : index
    %c0_27 = arith.constant 0 : index
    %c0_28 = arith.constant 0 : index
    %42 = vector.load %arg4[%c0_26, %c12, %c0_27, %c0_28] : memref<1x16x8x8xf32, #tpu.memory_space<vmem>>, vector<1x1x8x8xf32>
    %43 = vector.shape_cast %42 : vector<1x1x8x8xf32> to vector<8x8xf32>
    %44 = vector.shape_cast %41 : vector<8x8xf32> to vector<1x1x8x8xf32>
    tpu.vector_store %arg4[%c0_26, %c12, %c0_27, %c0_28], %44 {strides = array<i32>} : memref<1x16x8x8xf32, #tpu.memory_space<vmem>>, vector<1x1x8x8xf32>,
    %45 = vector.extract_strided_slice %9 {offsets = [7, 0, 0], sizes = [1, 8, 8], strides = [1, 1, 1]} : vector<8x8x8xf32> to vector<1x8x8xf32>
    %46 = vector.shape_cast %45 : vector<1x8x8xf32> to vector<8x8xf32>
    %c0_29 = arith.constant 0 : index
    %c14 = arith.constant 14 : index
    %c0_30 = arith.constant 0 : index
    %c0_31 = arith.constant 0 : index
    %47 = vector.load %arg4[%c0_29, %c14, %c0_30, %c0_31] : memref<1x16x8x8xf32, #tpu.memory_space<vmem>>, vector<1x1x8x8xf32>
    %48 = vector.shape_cast %47 : vector<1x1x8x8xf32> to vector<8x8xf32>
    %49 = vector.shape_cast %46 : vector<8x8xf32> to vector<1x1x8x8xf32>
    tpu.vector_store %arg4[%c0_29, %c14, %c0_30, %c0_31], %49 {strides = array<i32>} : memref<1x16x8x8xf32, #tpu.memory_space<vmem>>, vector<1x1x8x8xf32>,
    %50 = vector.extract_strided_slice %7 {offsets = [0, 8], sizes = [64, 8], strides = [1, 1]} : vector<64x16xf32> to vector<64x8xf32>
    %51 = vector.shape_cast %50 : vector<64x8xf32> to vector<8x8x8xf32>
    %52 = vector.extract_strided_slice %51 {offsets = [0, 0, 0], sizes = [1, 8, 8], strides = [1, 1, 1]} : vector<8x8x8xf32> to vector<1x8x8xf32>
    %53 = vector.shape_cast %52 : vector<1x8x8xf32> to vector<8x8xf32>
    %c0_32 = arith.constant 0 : index
    %c1 = arith.constant 1 : index
    %c0_33 = arith.constant 0 : index
    %c0_34 = arith.constant 0 : index
    %54 = vector.load %arg4[%c0_32, %c1, %c0_33, %c0_34] : memref<1x16x8x8xf32, #tpu.memory_space<vmem>>, vector<1x1x8x8xf32>
    %55 = vector.shape_cast %54 : vector<1x1x8x8xf32> to vector<8x8xf32>
    %56 = vector.shape_cast %53 : vector<8x8xf32> to vector<1x1x8x8xf32>
    tpu.vector_store %arg4[%c0_32, %c1, %c0_33, %c0_34], %56 {strides = array<i32>} : memref<1x16x8x8xf32, #tpu.memory_space<vmem>>, vector<1x1x8x8xf32>,
    %57 = vector.extract_strided_slice %51 {offsets = [1, 0, 0], sizes = [1, 8, 8], strides = [1, 1, 1]} : vector<8x8x8xf32> to vector<1x8x8xf32>
    %58 = vector.shape_cast %57 : vector<1x8x8xf32> to vector<8x8xf32>
    %c0_35 = arith.constant 0 : index
    %c3 = arith.constant 3 : index
    %c0_36 = arith.constant 0 : index
    %c0_37 = arith.constant 0 : index
    %59 = vector.load %arg4[%c0_35, %c3, %c0_36, %c0_37] : memref<1x16x8x8xf32, #tpu.memory_space<vmem>>, vector<1x1x8x8xf32>
    %60 = vector.shape_cast %59 : vector<1x1x8x8xf32> to vector<8x8xf32>
    %61 = vector.shape_cast %58 : vector<8x8xf32> to vector<1x1x8x8xf32>
    tpu.vector_store %arg4[%c0_35, %c3, %c0_36, %c0_37], %61 {strides = array<i32>} : memref<1x16x8x8xf32, #tpu.memory_space<vmem>>, vector<1x1x8x8xf32>,
    %62 = vector.extract_strided_slice %51 {offsets = [2, 0, 0], sizes = [1, 8, 8], strides = [1, 1, 1]} : vector<8x8x8xf32> to vector<1x8x8xf32>
    %63 = vector.shape_cast %62 : vector<1x8x8xf32> to vector<8x8xf32>
    %c0_38 = arith.constant 0 : index
    %c5 = arith.constant 5 : index
    %c0_39 = arith.constant 0 : index
    %c0_40 = arith.constant 0 : index
    %64 = vector.load %arg4[%c0_38, %c5, %c0_39, %c0_40] : memref<1x16x8x8xf32, #tpu.memory_space<vmem>>, vector<1x1x8x8xf32>
    %65 = vector.shape_cast %64 : vector<1x1x8x8xf32> to vector<8x8xf32>
    %66 = vector.shape_cast %63 : vector<8x8xf32> to vector<1x1x8x8xf32>
    tpu.vector_store %arg4[%c0_38, %c5, %c0_39, %c0_40], %66 {strides = array<i32>} : memref<1x16x8x8xf32, #tpu.memory_space<vmem>>, vector<1x1x8x8xf32>,
    %67 = vector.extract_strided_slice %51 {offsets = [3, 0, 0], sizes = [1, 8, 8], strides = [1, 1, 1]} : vector<8x8x8xf32> to vector<1x8x8xf32>
    %68 = vector.shape_cast %67 : vector<1x8x8xf32> to vector<8x8xf32>
    %c0_41 = arith.constant 0 : index
    %c7 = arith.constant 7 : index
    %c0_42 = arith.constant 0 : index
    %c0_43 = arith.constant 0 : index
    %69 = vector.load %arg4[%c0_41, %c7, %c0_42, %c0_43] : memref<1x16x8x8xf32, #tpu.memory_space<vmem>>, vector<1x1x8x8xf32>
    %70 = vector.shape_cast %69 : vector<1x1x8x8xf32> to vector<8x8xf32>
    %71 = vector.shape_cast %68 : vector<8x8xf32> to vector<1x1x8x8xf32>
    tpu.vector_store %arg4[%c0_41, %c7, %c0_42, %c0_43], %71 {strides = array<i32>} : memref<1x16x8x8xf32, #tpu.memory_space<vmem>>, vector<1x1x8x8xf32>,
    %72 = vector.extract_strided_slice %51 {offsets = [4, 0, 0], sizes = [1, 8, 8], strides = [1, 1, 1]} : vector<8x8x8xf32> to vector<1x8x8xf32>
    %73 = vector.shape_cast %72 : vector<1x8x8xf32> to vector<8x8xf32>
    %c0_44 = arith.constant 0 : index
    %c9 = arith.constant 9 : index
    %c0_45 = arith.constant 0 : index
    %c0_46 = arith.constant 0 : index
    %74 = vector.load %arg4[%c0_44, %c9, %c0_45, %c0_46] : memref<1x16x8x8xf32, #tpu.memory_space<vmem>>, vector<1x1x8x8xf32>
    %75 = vector.shape_cast %74 : vector<1x1x8x8xf32> to vector<8x8xf32>
    %76 = vector.shape_cast %73 : vector<8x8xf32> to vector<1x1x8x8xf32>
    tpu.vector_store %arg4[%c0_44, %c9, %c0_45, %c0_46], %76 {strides = array<i32>} : memref<1x16x8x8xf32, #tpu.memory_space<vmem>>, vector<1x1x8x8xf32>,
    %77 = vector.extract_strided_slice %51 {offsets = [5, 0, 0], sizes = [1, 8, 8], strides = [1, 1, 1]} : vector<8x8x8xf32> to vector<1x8x8xf32>
    %78 = vector.shape_cast %77 : vector<1x8x8xf32> to vector<8x8xf32>
    %c0_47 = arith.constant 0 : index
    %c11 = arith.constant 11 : index
    %c0_48 = arith.constant 0 : index
    %c0_49 = arith.constant 0 : index
    %79 = vector.load %arg4[%c0_47, %c11, %c0_48, %c0_49] : memref<1x16x8x8xf32, #tpu.memory_space<vmem>>, vector<1x1x8x8xf32>
    %80 = vector.shape_cast %79 : vector<1x1x8x8xf32> to vector<8x8xf32>
    %81 = vector.shape_cast %78 : vector<8x8xf32> to vector<1x1x8x8xf32>
    tpu.vector_store %arg4[%c0_47, %c11, %c0_48, %c0_49], %81 {strides = array<i32>} : memref<1x16x8x8xf32, #tpu.memory_space<vmem>>, vector<1x1x8x8xf32>,
    %82 = vector.extract_strided_slice %51 {offsets = [6, 0, 0], sizes = [1, 8, 8], strides = [1, 1, 1]} : vector<8x8x8xf32> to vector<1x8x8xf32>
    %83 = vector.shape_cast %82 : vector<1x8x8xf32> to vector<8x8xf32>
    %c0_50 = arith.constant 0 : index
    %c13 = arith.constant 13 : index
    %c0_51 = arith.constant 0 : index
    %c0_52 = arith.constant 0 : index
    %84 = vector.load %arg4[%c0_50, %c13, %c0_51, %c0_52] : memref<1x16x8x8xf32, #tpu.memory_space<vmem>>, vector<1x1x8x8xf32>
    %85 = vector.shape_cast %84 : vector<1x1x8x8xf32> to vector<8x8xf32>
    %86 = vector.shape_cast %83 : vector<8x8xf32> to vector<1x1x8x8xf32>
    tpu.vector_store %arg4[%c0_50, %c13, %c0_51, %c0_52], %86 {strides = array<i32>} : memref<1x16x8x8xf32, #tpu.memory_space<vmem>>, vector<1x1x8x8xf32>,
    %87 = vector.extract_strided_slice %51 {offsets = [7, 0, 0], sizes = [1, 8, 8], strides = [1, 1, 1]} : vector<8x8x8xf32> to vector<1x8x8xf32>
    %88 = vector.shape_cast %87 : vector<1x8x8xf32> to vector<8x8xf32>
    %c0_53 = arith.constant 0 : index
    %c15 = arith.constant 15 : index
    %c0_54 = arith.constant 0 : index
    %c0_55 = arith.constant 0 : index
    %89 = vector.load %arg4[%c0_53, %c15, %c0_54, %c0_55] : memref<1x16x8x8xf32, #tpu.memory_space<vmem>>, vector<1x1x8x8xf32>
    %90 = vector.shape_cast %89 : vector<1x1x8x8xf32> to vector<8x8xf32>
    %91 = vector.shape_cast %88 : vector<8x8xf32> to vector<1x1x8x8xf32>
    tpu.vector_store %arg4[%c0_53, %c15, %c0_54, %c0_55], %91 {strides = array<i32>} : memref<1x16x8x8xf32, #tpu.memory_space<vmem>>, vector<1x1x8x8xf32>,
    return
  }
  func.func @transform_0(%arg0: i32) -> (i32, i32, i32, i32) {
    %c0_i32 = arith.constant 0 : i32
    %c0_i32_0 = arith.constant 0 : i32
    %c0_i32_1 = arith.constant 0 : i32
    %c0_i32_2 = arith.constant 0 : i32
    return %arg0, %c0_i32, %c0_i32_0, %c0_i32_1 : i32, i32, i32, i32
  }
  func.func @transform_1(%arg0: i32) -> (i32, i32) {
    %c0_i32 = arith.constant 0 : i32
    %c0_i32_0 = arith.constant 0 : i32
    %c0_i32_1 = arith.constant 0 : i32
    return %c0_i32, %c0_i32_0 : i32, i32
  }
  func.func @transform_2(%arg0: i32) -> (i32, i32) {
    %c0_i32 = arith.constant 0 : i32
    %c0_i32_0 = arith.constant 0 : i32
    %c0_i32_1 = arith.constant 0 : i32
    return %c0_i32, %c0_i32_0 : i32, i32
  }
  func.func @transform_3(%arg0: i32) -> (i32, i32, i32, i32) {
    %c0_i32 = arith.constant 0 : i32
    %c0_i32_0 = arith.constant 0 : i32
    %c0_i32_1 = arith.constant 0 : i32
    %c0_i32_2 = arith.constant 0 : i32
    return %arg0, %c0_i32, %c0_i32_0, %c0_i32_1 : i32, i32, i32, i32
  }
}

module attributes {stable_mosaic.version = 11 : i64} {
  func.func @_conv1_kernel(%arg0: i32, %arg1: memref<1x20x20x4xf32, #tpu.memory_space<vmem>>, %arg2: memref<1x16x16x4xf32, #tpu.memory_space<vmem>>, %arg3: memref<4x72xf32, #tpu.memory_space<vmem>>, %arg4: memref<4x1xf32, #tpu.memory_space<vmem>>, %arg5: memref<1x4x256xf32, #tpu.memory_space<vmem>>, %arg6: memref<1x4x1xf32, #tpu.memory_space<vmem>>, %arg7: memref<1x4x1xf32, #tpu.memory_space<vmem>>, %arg8: memref<18x25x8xf32, #tpu.memory_space<vmem>>, %arg9: memref<256x72xf32, #tpu.memory_space<vmem>>) attributes {dimension_semantics = [#tpu.dimension_semantics<parallel>], iteration_bounds = array<i64: 2>, scalar_prefetch = 0 : i64, scratch_operands = 2 : i64, tpu.core_type = #tpu.core_type<tc>, window_params = [{transform_indices = @transform_0, window_bounds = array<i64: 1, 20, 20, 4>}, {transform_indices = @transform_1, window_bounds = array<i64: 1, 16, 16, 4>}, {pipeline_mode = #tpu.pipeline_mode<synchronous>, transform_indices = @transform_2, window_bounds = array<i64: 4, 72>}, {pipeline_mode = #tpu.pipeline_mode<synchronous>, transform_indices = @transform_3, window_bounds = array<i64: 4, 1>}, {transform_indices = @transform_4, window_bounds = array<i64: 1, 4, 256>}, {transform_indices = @transform_5, window_bounds = array<i64: 1, 4, 1>}, {transform_indices = @transform_6, window_bounds = array<i64: 1, 4, 1>}]} {
    %cst = arith.constant 0.000000e+00 : f32
    %0 = vector.broadcast %cst : f32 to vector<1x25x8xf32>
    %c0 = arith.constant 0 : index
    %c0_0 = arith.constant 0 : index
    %c0_1 = arith.constant 0 : index
    %1 = vector.load %arg8[%c0, %c0_0, %c0_1] : memref<18x25x8xf32, #tpu.memory_space<vmem>>, vector<1x25x8xf32>
    tpu.vector_store %arg8[%c0, %c0_0, %c0_1], %0 {strides = array<i32>} : memref<18x25x8xf32, #tpu.memory_space<vmem>>, vector<1x25x8xf32>,
    %cst_2 = arith.constant 0.000000e+00 : f32
    %2 = vector.broadcast %cst_2 : f32 to vector<1x25x8xf32>
    %c17 = arith.constant 17 : index
    %c0_3 = arith.constant 0 : index
    %c0_4 = arith.constant 0 : index
    %3 = vector.load %arg8[%c17, %c0_3, %c0_4] : memref<18x25x8xf32, #tpu.memory_space<vmem>>, vector<1x25x8xf32>
    tpu.vector_store %arg8[%c17, %c0_3, %c0_4], %2 {strides = array<i32>} : memref<18x25x8xf32, #tpu.memory_space<vmem>>, vector<1x25x8xf32>,
    %cst_5 = arith.constant 0.000000e+00 : f32
    %4 = vector.broadcast %cst_5 : f32 to vector<18x1x8xf32>
    %c0_6 = arith.constant 0 : index
    %c7 = arith.constant 7 : index
    %c0_7 = arith.constant 0 : index
    %5 = vector.load %arg8[%c0_6, %c7, %c0_7] : memref<18x25x8xf32, #tpu.memory_space<vmem>>, vector<18x1x8xf32>
    tpu.vector_store %arg8[%c0_6, %c7, %c0_7], %4 {strides = array<i32>} : memref<18x25x8xf32, #tpu.memory_space<vmem>>, vector<18x1x8xf32>,
    %cst_8 = arith.constant 0.000000e+00 : f32
    %6 = vector.broadcast %cst_8 : f32 to vector<18x1x8xf32>
    %c0_9 = arith.constant 0 : index
    %c24 = arith.constant 24 : index
    %c0_10 = arith.constant 0 : index
    %7 = vector.load %arg8[%c0_9, %c24, %c0_10] : memref<18x25x8xf32, #tpu.memory_space<vmem>>, vector<18x1x8xf32>
    tpu.vector_store %arg8[%c0_9, %c24, %c0_10], %6 {strides = array<i32>} : memref<18x25x8xf32, #tpu.memory_space<vmem>>, vector<18x1x8xf32>,
    %c0_11 = arith.constant 0 : index
    %c2 = arith.constant 2 : index
    %c2_12 = arith.constant 2 : index
    %c0_13 = arith.constant 0 : index
    %8 = vector.load %arg1[%c0_11, %c2, %c2_12, %c0_13] : memref<1x20x20x4xf32, #tpu.memory_space<vmem>>, vector<1x16x16x4xf32>
    %9 = vector.shape_cast %8 : vector<1x16x16x4xf32> to vector<16x16x4xf32>
    %c1 = arith.constant 1 : index
    %c8 = arith.constant 8 : index
    %c0_14 = arith.constant 0 : index
    %10 = vector.load %arg8[%c1, %c8, %c0_14] : memref<18x25x8xf32, #tpu.memory_space<vmem>>, vector<16x16x4xf32>
    tpu.vector_store %arg8[%c1, %c8, %c0_14], %9 {strides = array<i32>} : memref<18x25x8xf32, #tpu.memory_space<vmem>>, vector<16x16x4xf32>,
    %c0_15 = arith.constant 0 : index
    %c0_16 = arith.constant 0 : index
    %c0_17 = arith.constant 0 : index
    %c0_18 = arith.constant 0 : index
    %11 = vector.load %arg2[%c0_15, %c0_16, %c0_17, %c0_18] : memref<1x16x16x4xf32, #tpu.memory_space<vmem>>, vector<1x16x16x4xf32>
    %12 = vector.shape_cast %11 : vector<1x16x16x4xf32> to vector<16x16x4xf32>
    %c1_19 = arith.constant 1 : index
    %c8_20 = arith.constant 8 : index
    %c4 = arith.constant 4 : index
    %13 = vector.load %arg8[%c1_19, %c8_20, %c4] : memref<18x25x8xf32, #tpu.memory_space<vmem>>, vector<16x16x4xf32>
    tpu.vector_store %arg8[%c1_19, %c8_20, %c4], %12 {strides = array<i32>} : memref<18x25x8xf32, #tpu.memory_space<vmem>>, vector<16x16x4xf32>,
    %c0_21 = arith.constant 0 : index
    %c7_22 = arith.constant 7 : index
    %c0_23 = arith.constant 0 : index
    %14 = vector.load %arg8[%c0_21, %c7_22, %c0_23] : memref<18x25x8xf32, #tpu.memory_space<vmem>>, vector<16x16x8xf32>
    %15 = vector.shape_cast %14 : vector<16x16x8xf32> to vector<256x8xf32>
    %c0_24 = arith.constant 0 : index
    %c0_25 = arith.constant 0 : index
    %16 = vector.load %arg9[%c0_24, %c0_25] : memref<256x72xf32, #tpu.memory_space<vmem>>, vector<256x8xf32>
    tpu.vector_store %arg9[%c0_24, %c0_25], %15 {strides = array<i32>} : memref<256x72xf32, #tpu.memory_space<vmem>>, vector<256x8xf32>,
    %c0_26 = arith.constant 0 : index
    %c8_27 = arith.constant 8 : index
    %c0_28 = arith.constant 0 : index
    %17 = vector.load %arg8[%c0_26, %c8_27, %c0_28] : memref<18x25x8xf32, #tpu.memory_space<vmem>>, vector<16x16x8xf32>
    %18 = vector.shape_cast %17 : vector<16x16x8xf32> to vector<256x8xf32>
    %c0_29 = arith.constant 0 : index
    %c8_30 = arith.constant 8 : index
    %19 = vector.load %arg9[%c0_29, %c8_30] : memref<256x72xf32, #tpu.memory_space<vmem>>, vector<256x8xf32>
    tpu.vector_store %arg9[%c0_29, %c8_30], %18 {strides = array<i32>} : memref<256x72xf32, #tpu.memory_space<vmem>>, vector<256x8xf32>,
    %c0_31 = arith.constant 0 : index
    %c9 = arith.constant 9 : index
    %c0_32 = arith.constant 0 : index
    %20 = vector.load %arg8[%c0_31, %c9, %c0_32] : memref<18x25x8xf32, #tpu.memory_space<vmem>>, vector<16x16x8xf32>
    %21 = vector.shape_cast %20 : vector<16x16x8xf32> to vector<256x8xf32>
    %c0_33 = arith.constant 0 : index
    %c16 = arith.constant 16 : index
    %22 = vector.load %arg9[%c0_33, %c16] : memref<256x72xf32, #tpu.memory_space<vmem>>, vector<256x8xf32>
    tpu.vector_store %arg9[%c0_33, %c16], %21 {strides = array<i32>} : memref<256x72xf32, #tpu.memory_space<vmem>>, vector<256x8xf32>,
    %c1_34 = arith.constant 1 : index
    %c7_35 = arith.constant 7 : index
    %c0_36 = arith.constant 0 : index
    %23 = vector.load %arg8[%c1_34, %c7_35, %c0_36] : memref<18x25x8xf32, #tpu.memory_space<vmem>>, vector<16x16x8xf32>
    %24 = vector.shape_cast %23 : vector<16x16x8xf32> to vector<256x8xf32>
    %c0_37 = arith.constant 0 : index
    %c24_38 = arith.constant 24 : index
    %25 = vector.load %arg9[%c0_37, %c24_38] : memref<256x72xf32, #tpu.memory_space<vmem>>, vector<256x8xf32>
    tpu.vector_store %arg9[%c0_37, %c24_38], %24 {strides = array<i32>} : memref<256x72xf32, #tpu.memory_space<vmem>>, vector<256x8xf32>,
    %c1_39 = arith.constant 1 : index
    %c8_40 = arith.constant 8 : index
    %c0_41 = arith.constant 0 : index
    %26 = vector.load %arg8[%c1_39, %c8_40, %c0_41] : memref<18x25x8xf32, #tpu.memory_space<vmem>>, vector<16x16x8xf32>
    %27 = vector.shape_cast %26 : vector<16x16x8xf32> to vector<256x8xf32>
    %c0_42 = arith.constant 0 : index
    %c32 = arith.constant 32 : index
    %28 = vector.load %arg9[%c0_42, %c32] : memref<256x72xf32, #tpu.memory_space<vmem>>, vector<256x8xf32>
    tpu.vector_store %arg9[%c0_42, %c32], %27 {strides = array<i32>} : memref<256x72xf32, #tpu.memory_space<vmem>>, vector<256x8xf32>,
    %c1_43 = arith.constant 1 : index
    %c9_44 = arith.constant 9 : index
    %c0_45 = arith.constant 0 : index
    %29 = vector.load %arg8[%c1_43, %c9_44, %c0_45] : memref<18x25x8xf32, #tpu.memory_space<vmem>>, vector<16x16x8xf32>
    %30 = vector.shape_cast %29 : vector<16x16x8xf32> to vector<256x8xf32>
    %c0_46 = arith.constant 0 : index
    %c40 = arith.constant 40 : index
    %31 = vector.load %arg9[%c0_46, %c40] : memref<256x72xf32, #tpu.memory_space<vmem>>, vector<256x8xf32>
    tpu.vector_store %arg9[%c0_46, %c40], %30 {strides = array<i32>} : memref<256x72xf32, #tpu.memory_space<vmem>>, vector<256x8xf32>,
    %c2_47 = arith.constant 2 : index
    %c7_48 = arith.constant 7 : index
    %c0_49 = arith.constant 0 : index
    %32 = vector.load %arg8[%c2_47, %c7_48, %c0_49] : memref<18x25x8xf32, #tpu.memory_space<vmem>>, vector<16x16x8xf32>
    %33 = vector.shape_cast %32 : vector<16x16x8xf32> to vector<256x8xf32>
    %c0_50 = arith.constant 0 : index
    %c48 = arith.constant 48 : index
    %34 = vector.load %arg9[%c0_50, %c48] : memref<256x72xf32, #tpu.memory_space<vmem>>, vector<256x8xf32>
    tpu.vector_store %arg9[%c0_50, %c48], %33 {strides = array<i32>} : memref<256x72xf32, #tpu.memory_space<vmem>>, vector<256x8xf32>,
    %c2_51 = arith.constant 2 : index
    %c8_52 = arith.constant 8 : index
    %c0_53 = arith.constant 0 : index
    %35 = vector.load %arg8[%c2_51, %c8_52, %c0_53] : memref<18x25x8xf32, #tpu.memory_space<vmem>>, vector<16x16x8xf32>
    %36 = vector.shape_cast %35 : vector<16x16x8xf32> to vector<256x8xf32>
    %c0_54 = arith.constant 0 : index
    %c56 = arith.constant 56 : index
    %37 = vector.load %arg9[%c0_54, %c56] : memref<256x72xf32, #tpu.memory_space<vmem>>, vector<256x8xf32>
    tpu.vector_store %arg9[%c0_54, %c56], %36 {strides = array<i32>} : memref<256x72xf32, #tpu.memory_space<vmem>>, vector<256x8xf32>,
    %c2_55 = arith.constant 2 : index
    %c9_56 = arith.constant 9 : index
    %c0_57 = arith.constant 0 : index
    %38 = vector.load %arg8[%c2_55, %c9_56, %c0_57] : memref<18x25x8xf32, #tpu.memory_space<vmem>>, vector<16x16x8xf32>
    %39 = vector.shape_cast %38 : vector<16x16x8xf32> to vector<256x8xf32>
    %c0_58 = arith.constant 0 : index
    %c64 = arith.constant 64 : index
    %40 = vector.load %arg9[%c0_58, %c64] : memref<256x72xf32, #tpu.memory_space<vmem>>, vector<256x8xf32>
    tpu.vector_store %arg9[%c0_58, %c64], %39 {strides = array<i32>} : memref<256x72xf32, #tpu.memory_space<vmem>>, vector<256x8xf32>,
    %c0_59 = arith.constant 0 : index
    %c0_60 = arith.constant 0 : index
    %41 = vector.load %arg3[%c0_59, %c0_60] : memref<4x72xf32, #tpu.memory_space<vmem>>, vector<4x72xf32>
    %c0_61 = arith.constant 0 : index
    %c0_62 = arith.constant 0 : index
    %42 = vector.load %arg9[%c0_61, %c0_62] : memref<256x72xf32, #tpu.memory_space<vmem>>, vector<256x72xf32>
    %cst_63 = arith.constant dense<0.000000e+00> : vector<4x256xf32>
    %43 = tpu.matmul %41, %42, %cst_63 {dimension_numbers = #tpu.dot_dimension_numbers<[1], [1], [0], [0], [0, 0, 1, 0], [], []>} : vector<4x72xf32>, vector<256x72xf32>, vector<4x256xf32> -> vector<4x256xf32>
    %c0_64 = arith.constant 0 : index
    %c0_65 = arith.constant 0 : index
    %44 = vector.load %arg4[%c0_64, %c0_65] : memref<4x1xf32, #tpu.memory_space<vmem>>, vector<4x1xf32>
    %45 = vector.broadcast %44 : vector<4x1xf32> to vector<4x256xf32>
    %46 = arith.addf %43, %45 : vector<4x256xf32>
    %cst_66 = arith.constant 0.000000e+00 : f32
    %47 = vector.broadcast %cst_66 : f32 to vector<4x256xf32>
    %48 = arith.maximumf %46, %47 : vector<4x256xf32>
    %c0_67 = arith.constant 0 : index
    %c0_68 = arith.constant 0 : index
    %c0_69 = arith.constant 0 : index
    %49 = vector.load %arg5[%c0_67, %c0_68, %c0_69] : memref<1x4x256xf32, #tpu.memory_space<vmem>>, vector<1x4x256xf32>
    %50 = vector.shape_cast %49 : vector<1x4x256xf32> to vector<4x256xf32>
    %51 = vector.shape_cast %48 : vector<4x256xf32> to vector<1x4x256xf32>
    tpu.vector_store %arg5[%c0_67, %c0_68, %c0_69], %51 {strides = array<i32>} : memref<1x4x256xf32, #tpu.memory_space<vmem>>, vector<1x4x256xf32>,
    %cst_70 = arith.constant dense<0.000000e+00> : vector<4xf32>
    %52 = vector.multi_reduction <add>, %48, %cst_70 [1] : vector<4x256xf32> to vector<4xf32>
    %53 = vector.shape_cast %52 : vector<4xf32> to vector<4x1xf32>
    %c0_71 = arith.constant 0 : index
    %c0_72 = arith.constant 0 : index
    %c0_73 = arith.constant 0 : index
    %54 = vector.load %arg6[%c0_71, %c0_72, %c0_73] : memref<1x4x1xf32, #tpu.memory_space<vmem>>, vector<1x4x1xf32>
    %55 = vector.shape_cast %54 : vector<1x4x1xf32> to vector<4x1xf32>
    %56 = vector.shape_cast %53 : vector<4x1xf32> to vector<1x4x1xf32>
    tpu.vector_store %arg6[%c0_71, %c0_72, %c0_73], %56 {strides = array<i32>} : memref<1x4x1xf32, #tpu.memory_space<vmem>>, vector<1x4x1xf32>,
    %57 = arith.mulf %48, %48 : vector<4x256xf32>
    %cst_74 = arith.constant dense<0.000000e+00> : vector<4xf32>
    %58 = vector.multi_reduction <add>, %57, %cst_74 [1] : vector<4x256xf32> to vector<4xf32>
    %59 = vector.shape_cast %58 : vector<4xf32> to vector<4x1xf32>
    %c0_75 = arith.constant 0 : index
    %c0_76 = arith.constant 0 : index
    %c0_77 = arith.constant 0 : index
    %60 = vector.load %arg7[%c0_75, %c0_76, %c0_77] : memref<1x4x1xf32, #tpu.memory_space<vmem>>, vector<1x4x1xf32>
    %61 = vector.shape_cast %60 : vector<1x4x1xf32> to vector<4x1xf32>
    %62 = vector.shape_cast %59 : vector<4x1xf32> to vector<1x4x1xf32>
    tpu.vector_store %arg7[%c0_75, %c0_76, %c0_77], %62 {strides = array<i32>} : memref<1x4x1xf32, #tpu.memory_space<vmem>>, vector<1x4x1xf32>,
    return
  }
  func.func @transform_0(%arg0: i32) -> (i32, i32, i32, i32) {
    %c0_i32 = arith.constant 0 : i32
    %c0_i32_0 = arith.constant 0 : i32
    %c0_i32_1 = arith.constant 0 : i32
    %c0_i32_2 = arith.constant 0 : i32
    return %arg0, %c0_i32, %c0_i32_0, %c0_i32_1 : i32, i32, i32, i32
  }
  func.func @transform_1(%arg0: i32) -> (i32, i32, i32, i32) {
    %c0_i32 = arith.constant 0 : i32
    %c0_i32_0 = arith.constant 0 : i32
    %c0_i32_1 = arith.constant 0 : i32
    %c0_i32_2 = arith.constant 0 : i32
    return %arg0, %c0_i32, %c0_i32_0, %c0_i32_1 : i32, i32, i32, i32
  }
  func.func @transform_2(%arg0: i32) -> (i32, i32) {
    %c0_i32 = arith.constant 0 : i32
    %c0_i32_0 = arith.constant 0 : i32
    %c0_i32_1 = arith.constant 0 : i32
    return %c0_i32, %c0_i32_0 : i32, i32
  }
  func.func @transform_3(%arg0: i32) -> (i32, i32) {
    %c0_i32 = arith.constant 0 : i32
    %c0_i32_0 = arith.constant 0 : i32
    %c0_i32_1 = arith.constant 0 : i32
    return %c0_i32, %c0_i32_0 : i32, i32
  }
  func.func @transform_4(%arg0: i32) -> (i32, i32, i32) {
    %c0_i32 = arith.constant 0 : i32
    %c0_i32_0 = arith.constant 0 : i32
    %c0_i32_1 = arith.constant 0 : i32
    return %arg0, %c0_i32, %c0_i32_0 : i32, i32, i32
  }
  func.func @transform_5(%arg0: i32) -> (i32, i32, i32) {
    %c0_i32 = arith.constant 0 : i32
    %c0_i32_0 = arith.constant 0 : i32
    %c0_i32_1 = arith.constant 0 : i32
    return %arg0, %c0_i32, %c0_i32_0 : i32, i32, i32
  }
  func.func @transform_6(%arg0: i32) -> (i32, i32, i32) {
    %c0_i32 = arith.constant 0 : i32
    %c0_i32_0 = arith.constant 0 : i32
    %c0_i32_1 = arith.constant 0 : i32
    return %arg0, %c0_i32, %c0_i32_0 : i32, i32, i32
  }
}

module attributes {stable_mosaic.version = 11 : i64} {
  func.func @_conv2_kernel(%arg0: i32, %arg1: memref<1x4x256xf32, #tpu.memory_space<vmem>>, %arg2: memref<4x1xf32, #tpu.memory_space<vmem>>, %arg3: memref<4x1xf32, #tpu.memory_space<vmem>>, %arg4: memref<4x36xf32, #tpu.memory_space<vmem>>, %arg5: memref<4x1xf32, #tpu.memory_space<vmem>>, %arg6: memref<1x4x256xf32, #tpu.memory_space<vmem>>, %arg7: memref<1x4x1xf32, #tpu.memory_space<vmem>>, %arg8: memref<1x4x1xf32, #tpu.memory_space<vmem>>, %arg9: memref<18x25x4xf32, #tpu.memory_space<vmem>>, %arg10: memref<256x36xf32, #tpu.memory_space<vmem>>) attributes {dimension_semantics = [#tpu.dimension_semantics<parallel>], iteration_bounds = array<i64: 2>, scalar_prefetch = 0 : i64, scratch_operands = 2 : i64, tpu.core_type = #tpu.core_type<tc>, window_params = [{transform_indices = @transform_0, window_bounds = array<i64: 1, 4, 256>}, {pipeline_mode = #tpu.pipeline_mode<synchronous>, transform_indices = @transform_1, window_bounds = array<i64: 4, 1>}, {pipeline_mode = #tpu.pipeline_mode<synchronous>, transform_indices = @transform_2, window_bounds = array<i64: 4, 1>}, {pipeline_mode = #tpu.pipeline_mode<synchronous>, transform_indices = @transform_3, window_bounds = array<i64: 4, 36>}, {pipeline_mode = #tpu.pipeline_mode<synchronous>, transform_indices = @transform_4, window_bounds = array<i64: 4, 1>}, {transform_indices = @transform_5, window_bounds = array<i64: 1, 4, 256>}, {transform_indices = @transform_6, window_bounds = array<i64: 1, 4, 1>}, {transform_indices = @transform_7, window_bounds = array<i64: 1, 4, 1>}]} {
    %c0 = arith.constant 0 : index
    %c0_0 = arith.constant 0 : index
    %c0_1 = arith.constant 0 : index
    %0 = vector.load %arg1[%c0, %c0_0, %c0_1] : memref<1x4x256xf32, #tpu.memory_space<vmem>>, vector<1x4x256xf32>
    %1 = vector.shape_cast %0 : vector<1x4x256xf32> to vector<4x256xf32>
    %c0_2 = arith.constant 0 : index
    %c0_3 = arith.constant 0 : index
    %2 = vector.load %arg2[%c0_2, %c0_3] : memref<4x1xf32, #tpu.memory_space<vmem>>, vector<4x1xf32>
    %3 = vector.broadcast %2 : vector<4x1xf32> to vector<4x256xf32>
    %4 = arith.mulf %1, %3 : vector<4x256xf32>
    %c0_4 = arith.constant 0 : index
    %c0_5 = arith.constant 0 : index
    %5 = vector.load %arg3[%c0_4, %c0_5] : memref<4x1xf32, #tpu.memory_space<vmem>>, vector<4x1xf32>
    %6 = vector.broadcast %5 : vector<4x1xf32> to vector<4x256xf32>
    %7 = arith.addf %4, %6 : vector<4x256xf32>
    %8 = tpu.transpose %7, [1, 0] : vector<4x256xf32> -> vector<256x4xf32>
    %9 = vector.shape_cast %8 : vector<256x4xf32> to vector<16x16x4xf32>
    %cst = arith.constant 0.000000e+00 : f32
    %10 = vector.broadcast %cst : f32 to vector<1x25x4xf32>
    %c0_6 = arith.constant 0 : index
    %c0_7 = arith.constant 0 : index
    %c0_8 = arith.constant 0 : index
    %11 = vector.load %arg9[%c0_6, %c0_7, %c0_8] : memref<18x25x4xf32, #tpu.memory_space<vmem>>, vector<1x25x4xf32>
    tpu.vector_store %arg9[%c0_6, %c0_7, %c0_8], %10 {strides = array<i32>} : memref<18x25x4xf32, #tpu.memory_space<vmem>>, vector<1x25x4xf32>,
    %cst_9 = arith.constant 0.000000e+00 : f32
    %12 = vector.broadcast %cst_9 : f32 to vector<1x25x4xf32>
    %c17 = arith.constant 17 : index
    %c0_10 = arith.constant 0 : index
    %c0_11 = arith.constant 0 : index
    %13 = vector.load %arg9[%c17, %c0_10, %c0_11] : memref<18x25x4xf32, #tpu.memory_space<vmem>>, vector<1x25x4xf32>
    tpu.vector_store %arg9[%c17, %c0_10, %c0_11], %12 {strides = array<i32>} : memref<18x25x4xf32, #tpu.memory_space<vmem>>, vector<1x25x4xf32>,
    %cst_12 = arith.constant 0.000000e+00 : f32
    %14 = vector.broadcast %cst_12 : f32 to vector<18x1x4xf32>
    %c0_13 = arith.constant 0 : index
    %c7 = arith.constant 7 : index
    %c0_14 = arith.constant 0 : index
    %15 = vector.load %arg9[%c0_13, %c7, %c0_14] : memref<18x25x4xf32, #tpu.memory_space<vmem>>, vector<18x1x4xf32>
    tpu.vector_store %arg9[%c0_13, %c7, %c0_14], %14 {strides = array<i32>} : memref<18x25x4xf32, #tpu.memory_space<vmem>>, vector<18x1x4xf32>,
    %cst_15 = arith.constant 0.000000e+00 : f32
    %16 = vector.broadcast %cst_15 : f32 to vector<18x1x4xf32>
    %c0_16 = arith.constant 0 : index
    %c24 = arith.constant 24 : index
    %c0_17 = arith.constant 0 : index
    %17 = vector.load %arg9[%c0_16, %c24, %c0_17] : memref<18x25x4xf32, #tpu.memory_space<vmem>>, vector<18x1x4xf32>
    tpu.vector_store %arg9[%c0_16, %c24, %c0_17], %16 {strides = array<i32>} : memref<18x25x4xf32, #tpu.memory_space<vmem>>, vector<18x1x4xf32>,
    %c1 = arith.constant 1 : index
    %c8 = arith.constant 8 : index
    %c0_18 = arith.constant 0 : index
    %18 = vector.load %arg9[%c1, %c8, %c0_18] : memref<18x25x4xf32, #tpu.memory_space<vmem>>, vector<16x16x4xf32>
    tpu.vector_store %arg9[%c1, %c8, %c0_18], %9 {strides = array<i32>} : memref<18x25x4xf32, #tpu.memory_space<vmem>>, vector<16x16x4xf32>,
    %c0_19 = arith.constant 0 : index
    %c7_20 = arith.constant 7 : index
    %c0_21 = arith.constant 0 : index
    %19 = vector.load %arg9[%c0_19, %c7_20, %c0_21] : memref<18x25x4xf32, #tpu.memory_space<vmem>>, vector<16x16x4xf32>
    %20 = vector.shape_cast %19 : vector<16x16x4xf32> to vector<256x4xf32>
    %c0_22 = arith.constant 0 : index
    %c0_23 = arith.constant 0 : index
    %21 = vector.load %arg10[%c0_22, %c0_23] : memref<256x36xf32, #tpu.memory_space<vmem>>, vector<256x4xf32>
    tpu.vector_store %arg10[%c0_22, %c0_23], %20 {strides = array<i32>} : memref<256x36xf32, #tpu.memory_space<vmem>>, vector<256x4xf32>,
    %c0_24 = arith.constant 0 : index
    %c8_25 = arith.constant 8 : index
    %c0_26 = arith.constant 0 : index
    %22 = vector.load %arg9[%c0_24, %c8_25, %c0_26] : memref<18x25x4xf32, #tpu.memory_space<vmem>>, vector<16x16x4xf32>
    %23 = vector.shape_cast %22 : vector<16x16x4xf32> to vector<256x4xf32>
    %c0_27 = arith.constant 0 : index
    %c4 = arith.constant 4 : index
    %24 = vector.load %arg10[%c0_27, %c4] : memref<256x36xf32, #tpu.memory_space<vmem>>, vector<256x4xf32>
    tpu.vector_store %arg10[%c0_27, %c4], %23 {strides = array<i32>} : memref<256x36xf32, #tpu.memory_space<vmem>>, vector<256x4xf32>,
    %c0_28 = arith.constant 0 : index
    %c9 = arith.constant 9 : index
    %c0_29 = arith.constant 0 : index
    %25 = vector.load %arg9[%c0_28, %c9, %c0_29] : memref<18x25x4xf32, #tpu.memory_space<vmem>>, vector<16x16x4xf32>
    %26 = vector.shape_cast %25 : vector<16x16x4xf32> to vector<256x4xf32>
    %c0_30 = arith.constant 0 : index
    %c8_31 = arith.constant 8 : index
    %27 = vector.load %arg10[%c0_30, %c8_31] : memref<256x36xf32, #tpu.memory_space<vmem>>, vector<256x4xf32>
    tpu.vector_store %arg10[%c0_30, %c8_31], %26 {strides = array<i32>} : memref<256x36xf32, #tpu.memory_space<vmem>>, vector<256x4xf32>,
    %c1_32 = arith.constant 1 : index
    %c7_33 = arith.constant 7 : index
    %c0_34 = arith.constant 0 : index
    %28 = vector.load %arg9[%c1_32, %c7_33, %c0_34] : memref<18x25x4xf32, #tpu.memory_space<vmem>>, vector<16x16x4xf32>
    %29 = vector.shape_cast %28 : vector<16x16x4xf32> to vector<256x4xf32>
    %c0_35 = arith.constant 0 : index
    %c12 = arith.constant 12 : index
    %30 = vector.load %arg10[%c0_35, %c12] : memref<256x36xf32, #tpu.memory_space<vmem>>, vector<256x4xf32>
    tpu.vector_store %arg10[%c0_35, %c12], %29 {strides = array<i32>} : memref<256x36xf32, #tpu.memory_space<vmem>>, vector<256x4xf32>,
    %c1_36 = arith.constant 1 : index
    %c8_37 = arith.constant 8 : index
    %c0_38 = arith.constant 0 : index
    %31 = vector.load %arg9[%c1_36, %c8_37, %c0_38] : memref<18x25x4xf32, #tpu.memory_space<vmem>>, vector<16x16x4xf32>
    %32 = vector.shape_cast %31 : vector<16x16x4xf32> to vector<256x4xf32>
    %c0_39 = arith.constant 0 : index
    %c16 = arith.constant 16 : index
    %33 = vector.load %arg10[%c0_39, %c16] : memref<256x36xf32, #tpu.memory_space<vmem>>, vector<256x4xf32>
    tpu.vector_store %arg10[%c0_39, %c16], %32 {strides = array<i32>} : memref<256x36xf32, #tpu.memory_space<vmem>>, vector<256x4xf32>,
    %c1_40 = arith.constant 1 : index
    %c9_41 = arith.constant 9 : index
    %c0_42 = arith.constant 0 : index
    %34 = vector.load %arg9[%c1_40, %c9_41, %c0_42] : memref<18x25x4xf32, #tpu.memory_space<vmem>>, vector<16x16x4xf32>
    %35 = vector.shape_cast %34 : vector<16x16x4xf32> to vector<256x4xf32>
    %c0_43 = arith.constant 0 : index
    %c20 = arith.constant 20 : index
    %36 = vector.load %arg10[%c0_43, %c20] : memref<256x36xf32, #tpu.memory_space<vmem>>, vector<256x4xf32>
    tpu.vector_store %arg10[%c0_43, %c20], %35 {strides = array<i32>} : memref<256x36xf32, #tpu.memory_space<vmem>>, vector<256x4xf32>,
    %c2 = arith.constant 2 : index
    %c7_44 = arith.constant 7 : index
    %c0_45 = arith.constant 0 : index
    %37 = vector.load %arg9[%c2, %c7_44, %c0_45] : memref<18x25x4xf32, #tpu.memory_space<vmem>>, vector<16x16x4xf32>
    %38 = vector.shape_cast %37 : vector<16x16x4xf32> to vector<256x4xf32>
    %c0_46 = arith.constant 0 : index
    %c24_47 = arith.constant 24 : index
    %39 = vector.load %arg10[%c0_46, %c24_47] : memref<256x36xf32, #tpu.memory_space<vmem>>, vector<256x4xf32>
    tpu.vector_store %arg10[%c0_46, %c24_47], %38 {strides = array<i32>} : memref<256x36xf32, #tpu.memory_space<vmem>>, vector<256x4xf32>,
    %c2_48 = arith.constant 2 : index
    %c8_49 = arith.constant 8 : index
    %c0_50 = arith.constant 0 : index
    %40 = vector.load %arg9[%c2_48, %c8_49, %c0_50] : memref<18x25x4xf32, #tpu.memory_space<vmem>>, vector<16x16x4xf32>
    %41 = vector.shape_cast %40 : vector<16x16x4xf32> to vector<256x4xf32>
    %c0_51 = arith.constant 0 : index
    %c28 = arith.constant 28 : index
    %42 = vector.load %arg10[%c0_51, %c28] : memref<256x36xf32, #tpu.memory_space<vmem>>, vector<256x4xf32>
    tpu.vector_store %arg10[%c0_51, %c28], %41 {strides = array<i32>} : memref<256x36xf32, #tpu.memory_space<vmem>>, vector<256x4xf32>,
    %c2_52 = arith.constant 2 : index
    %c9_53 = arith.constant 9 : index
    %c0_54 = arith.constant 0 : index
    %43 = vector.load %arg9[%c2_52, %c9_53, %c0_54] : memref<18x25x4xf32, #tpu.memory_space<vmem>>, vector<16x16x4xf32>
    %44 = vector.shape_cast %43 : vector<16x16x4xf32> to vector<256x4xf32>
    %c0_55 = arith.constant 0 : index
    %c32 = arith.constant 32 : index
    %45 = vector.load %arg10[%c0_55, %c32] : memref<256x36xf32, #tpu.memory_space<vmem>>, vector<256x4xf32>
    tpu.vector_store %arg10[%c0_55, %c32], %44 {strides = array<i32>} : memref<256x36xf32, #tpu.memory_space<vmem>>, vector<256x4xf32>,
    %c0_56 = arith.constant 0 : index
    %c0_57 = arith.constant 0 : index
    %46 = vector.load %arg4[%c0_56, %c0_57] : memref<4x36xf32, #tpu.memory_space<vmem>>, vector<4x36xf32>
    %c0_58 = arith.constant 0 : index
    %c0_59 = arith.constant 0 : index
    %47 = vector.load %arg10[%c0_58, %c0_59] : memref<256x36xf32, #tpu.memory_space<vmem>>, vector<256x36xf32>
    %cst_60 = arith.constant dense<0.000000e+00> : vector<4x256xf32>
    %48 = tpu.matmul %46, %47, %cst_60 {dimension_numbers = #tpu.dot_dimension_numbers<[1], [1], [0], [0], [0, 0, 1, 0], [], []>} : vector<4x36xf32>, vector<256x36xf32>, vector<4x256xf32> -> vector<4x256xf32>
    %c0_61 = arith.constant 0 : index
    %c0_62 = arith.constant 0 : index
    %49 = vector.load %arg5[%c0_61, %c0_62] : memref<4x1xf32, #tpu.memory_space<vmem>>, vector<4x1xf32>
    %50 = vector.broadcast %49 : vector<4x1xf32> to vector<4x256xf32>
    %51 = arith.addf %48, %50 : vector<4x256xf32>
    %cst_63 = arith.constant 0.000000e+00 : f32
    %52 = vector.broadcast %cst_63 : f32 to vector<4x256xf32>
    %53 = arith.maximumf %51, %52 : vector<4x256xf32>
    %c0_64 = arith.constant 0 : index
    %c0_65 = arith.constant 0 : index
    %c0_66 = arith.constant 0 : index
    %54 = vector.load %arg6[%c0_64, %c0_65, %c0_66] : memref<1x4x256xf32, #tpu.memory_space<vmem>>, vector<1x4x256xf32>
    %55 = vector.shape_cast %54 : vector<1x4x256xf32> to vector<4x256xf32>
    %56 = vector.shape_cast %53 : vector<4x256xf32> to vector<1x4x256xf32>
    tpu.vector_store %arg6[%c0_64, %c0_65, %c0_66], %56 {strides = array<i32>} : memref<1x4x256xf32, #tpu.memory_space<vmem>>, vector<1x4x256xf32>,
    %cst_67 = arith.constant dense<0.000000e+00> : vector<4xf32>
    %57 = vector.multi_reduction <add>, %53, %cst_67 [1] : vector<4x256xf32> to vector<4xf32>
    %58 = vector.shape_cast %57 : vector<4xf32> to vector<4x1xf32>
    %c0_68 = arith.constant 0 : index
    %c0_69 = arith.constant 0 : index
    %c0_70 = arith.constant 0 : index
    %59 = vector.load %arg7[%c0_68, %c0_69, %c0_70] : memref<1x4x1xf32, #tpu.memory_space<vmem>>, vector<1x4x1xf32>
    %60 = vector.shape_cast %59 : vector<1x4x1xf32> to vector<4x1xf32>
    %61 = vector.shape_cast %58 : vector<4x1xf32> to vector<1x4x1xf32>
    tpu.vector_store %arg7[%c0_68, %c0_69, %c0_70], %61 {strides = array<i32>} : memref<1x4x1xf32, #tpu.memory_space<vmem>>, vector<1x4x1xf32>,
    %62 = arith.mulf %53, %53 : vector<4x256xf32>
    %cst_71 = arith.constant dense<0.000000e+00> : vector<4xf32>
    %63 = vector.multi_reduction <add>, %62, %cst_71 [1] : vector<4x256xf32> to vector<4xf32>
    %64 = vector.shape_cast %63 : vector<4xf32> to vector<4x1xf32>
    %c0_72 = arith.constant 0 : index
    %c0_73 = arith.constant 0 : index
    %c0_74 = arith.constant 0 : index
    %65 = vector.load %arg8[%c0_72, %c0_73, %c0_74] : memref<1x4x1xf32, #tpu.memory_space<vmem>>, vector<1x4x1xf32>
    %66 = vector.shape_cast %65 : vector<1x4x1xf32> to vector<4x1xf32>
    %67 = vector.shape_cast %64 : vector<4x1xf32> to vector<1x4x1xf32>
    tpu.vector_store %arg8[%c0_72, %c0_73, %c0_74], %67 {strides = array<i32>} : memref<1x4x1xf32, #tpu.memory_space<vmem>>, vector<1x4x1xf32>,
    return
  }
  func.func @transform_0(%arg0: i32) -> (i32, i32, i32) {
    %c0_i32 = arith.constant 0 : i32
    %c0_i32_0 = arith.constant 0 : i32
    %c0_i32_1 = arith.constant 0 : i32
    return %arg0, %c0_i32, %c0_i32_0 : i32, i32, i32
  }
  func.func @transform_1(%arg0: i32) -> (i32, i32) {
    %c0_i32 = arith.constant 0 : i32
    %c0_i32_0 = arith.constant 0 : i32
    %c0_i32_1 = arith.constant 0 : i32
    return %c0_i32, %c0_i32_0 : i32, i32
  }
  func.func @transform_2(%arg0: i32) -> (i32, i32) {
    %c0_i32 = arith.constant 0 : i32
    %c0_i32_0 = arith.constant 0 : i32
    %c0_i32_1 = arith.constant 0 : i32
    return %c0_i32, %c0_i32_0 : i32, i32
  }
  func.func @transform_3(%arg0: i32) -> (i32, i32) {
    %c0_i32 = arith.constant 0 : i32
    %c0_i32_0 = arith.constant 0 : i32
    %c0_i32_1 = arith.constant 0 : i32
    return %c0_i32, %c0_i32_0 : i32, i32
  }
  func.func @transform_4(%arg0: i32) -> (i32, i32) {
    %c0_i32 = arith.constant 0 : i32
    %c0_i32_0 = arith.constant 0 : i32
    %c0_i32_1 = arith.constant 0 : i32
    return %c0_i32, %c0_i32_0 : i32, i32
  }
  func.func @transform_5(%arg0: i32) -> (i32, i32, i32) {
    %c0_i32 = arith.constant 0 : i32
    %c0_i32_0 = arith.constant 0 : i32
    %c0_i32_1 = arith.constant 0 : i32
    return %arg0, %c0_i32, %c0_i32_0 : i32, i32, i32
  }
  func.func @transform_6(%arg0: i32) -> (i32, i32, i32) {
    %c0_i32 = arith.constant 0 : i32
    %c0_i32_0 = arith.constant 0 : i32
    %c0_i32_1 = arith.constant 0 : i32
    return %arg0, %c0_i32, %c0_i32_0 : i32, i32, i32
  }
  func.func @transform_7(%arg0: i32) -> (i32, i32, i32) {
    %c0_i32 = arith.constant 0 : i32
    %c0_i32_0 = arith.constant 0 : i32
    %c0_i32_1 = arith.constant 0 : i32
    return %arg0, %c0_i32, %c0_i32_0 : i32, i32, i32
  }
}

module attributes {stable_mosaic.version = 11 : i64} {
  func.func @_affine_kernel(%arg0: i32, %arg1: memref<8x256xf32, #tpu.memory_space<vmem>>, %arg2: memref<8x1xf32, #tpu.memory_space<vmem>>, %arg3: memref<8x1xf32, #tpu.memory_space<vmem>>, %arg4: memref<8x256xf32, #tpu.memory_space<vmem>>) attributes {dimension_semantics = [#tpu.dimension_semantics<parallel>], iteration_bounds = array<i64: 1>, scalar_prefetch = 0 : i64, scratch_operands = 0 : i64, tpu.core_type = #tpu.core_type<tc>, window_params = [{transform_indices = @transform_0, window_bounds = array<i64: 8, 256>}, {transform_indices = @transform_1, window_bounds = array<i64: 8, 1>}, {transform_indices = @transform_2, window_bounds = array<i64: 8, 1>}, {transform_indices = @transform_3, window_bounds = array<i64: 8, 256>}]} {
    %c0 = arith.constant 0 : index
    %c0_0 = arith.constant 0 : index
    %0 = vector.load %arg1[%c0, %c0_0] : memref<8x256xf32, #tpu.memory_space<vmem>>, vector<8x256xf32>
    %c0_1 = arith.constant 0 : index
    %c0_2 = arith.constant 0 : index
    %1 = vector.load %arg2[%c0_1, %c0_2] : memref<8x1xf32, #tpu.memory_space<vmem>>, vector<8x1xf32>
    %2 = vector.broadcast %1 : vector<8x1xf32> to vector<8x256xf32>
    %3 = arith.mulf %0, %2 : vector<8x256xf32>
    %c0_3 = arith.constant 0 : index
    %c0_4 = arith.constant 0 : index
    %4 = vector.load %arg3[%c0_3, %c0_4] : memref<8x1xf32, #tpu.memory_space<vmem>>, vector<8x1xf32>
    %5 = vector.broadcast %4 : vector<8x1xf32> to vector<8x256xf32>
    %6 = arith.addf %3, %5 : vector<8x256xf32>
    %c0_5 = arith.constant 0 : index
    %c0_6 = arith.constant 0 : index
    %7 = vector.load %arg4[%c0_5, %c0_6] : memref<8x256xf32, #tpu.memory_space<vmem>>, vector<8x256xf32>
    tpu.vector_store %arg4[%c0_5, %c0_6], %6 {strides = array<i32>} : memref<8x256xf32, #tpu.memory_space<vmem>>, vector<8x256xf32>,
    return
  }
  func.func @transform_0(%arg0: i32) -> (i32, i32) {
    %c0_i32 = arith.constant 0 : i32
    %c0_i32_0 = arith.constant 0 : i32
    return %arg0, %c0_i32 : i32, i32
  }
  func.func @transform_1(%arg0: i32) -> (i32, i32) {
    %c0_i32 = arith.constant 0 : i32
    %c0_i32_0 = arith.constant 0 : i32
    return %arg0, %c0_i32 : i32, i32
  }
  func.func @transform_2(%arg0: i32) -> (i32, i32) {
    %c0_i32 = arith.constant 0 : i32
    %c0_i32_0 = arith.constant 0 : i32
    return %arg0, %c0_i32 : i32, i32
  }
  func.func @transform_3(%arg0: i32) -> (i32, i32) {
    %c0_i32 = arith.constant 0 : i32
    %c0_i32_0 = arith.constant 0 : i32
    return %arg0, %c0_i32 : i32, i32
  }
}

</mosaic_0001>

<bundles_post_ra>
// kernel: tile.18
= control target key start
LH: loop header
LB: loop body
LE: loop exit
PB: predicated region body
PF: predicated region fallthrough
CT: control target
= control target key end

     0   :  { %s22_s0 = inlined_call_operand.vmem [shape: f32[4], index: 0, kind: input, shape index: {}]   ;;  %s23_s1 = inlined_call_operand.vmem [shape: f32[4,4], index: 1, kind: output, shape index: {}]  }
   0x1   :  { %v4_v0 = vld [vmem:[%s22_s0] ss:$0 sm:$0xff] }
   0x2   :  { %5 = vst [vmem:[%s23_s1] sm:$0xf] %v4_v0 }

// kernel: tile.19
= control target key start
LH: loop header
LB: loop body
LE: loop exit
PB: predicated region body
PF: predicated region fallthrough
CT: control target
= control target key end

     0   :  { %vm7_vm0 = vcmask 31744   ;;  %s37_s8 = smov 4   ;;  %s38_s9 = smov 8   ;;  %vm13_vm1 = vcmask 130144   ;;  %vm19_vm2 = vcmask 97344   ;;  %vm25_vm3 = vcmask 64544   ;;  %s55_s0 = inlined_call_operand.vmem [shape: f32[4,4], index: 0, kind: input, shape index: {}]   ;;  %s56_s1 = inlined_call_operand.vmem [shape: f32[1,16], index: 1, kind: output, shape index: {}]  }
   0x1   :  { %v4_v0 = vld [vmem:[%s55_s0] sm:$0xf]  ;;  %s36_s0 = smov 12  }
   0x2   :  { %5 = vst [vmem:[#allocation1] sm:$0xf] %v4_v0 }
   0x9   :  { %v10_v1 = vld [vmem:[#allocation1 + $0x3] sm:$0x1]   ;;  %v22_v2 = vld [vmem:[#allocation1 + $0x1] sm:$0x1]   ;;  %v6_v3 = vld [vmem:[#allocation1] sm:$0x1]  }
   0xa   :  { %11 = vrot.lane.b32.xlu0 %v10_v1, %s36_s0  ;;  %23 = vrot.lane.b32.xlu1 %v22_v2, %s37_s8  ;;  %v16_v4 = vld [vmem:[#allocation1 + $0x2] sm:$0x1]   ;;  %8 = vst.msk [vmem:[#allocation0] sm:$0x1] %vm7_vm0, %v6_v3  }
   0xe   :  { %17 = vrot.lane.b32.xlu0 %v16_v4, %s38_s9 }
  0x7c   :  { %v12_v5 = vpop.permute.xlu0 %11   ;;  %v24_v6 = vpop.permute.xlu1 %23  }
  0x7d   :  { %14 = vst.msk [vmem:[#allocation0] sm:$0x1] %vm13_vm1, %v12_v5  }
  0x80   :  { %v18_v7 = vpop.permute.xlu0 %17  }
  0x81   :  { %20 = vst.msk [vmem:[#allocation0] sm:$0x1] %vm19_vm2, %v18_v7  }
  0x82   :  { %26 = vst.msk [vmem:[#allocation0] sm:$0x1] %vm25_vm3, %v24_v6  }
  0x89   :  { %v30_v8 = vld [vmem:[#allocation0] sm:$0x1] }
  0x8a   :  { %32 = vst [vmem:[%s56_s1] sm:$0x1] %v30_v8 }

// kernel: tile.28
= control target key start
LH: loop header
LB: loop body
LE: loop exit
PB: predicated region body
PF: predicated region fallthrough
CT: control target
= control target key end

     0   :  { %s22_s0 = inlined_call_operand.vmem [shape: f32[4], index: 0, kind: input, shape index: {}]   ;;  %s23_s1 = inlined_call_operand.vmem [shape: f32[2,4], index: 1, kind: output, shape index: {}]  }
   0x1   :  { %v4_v0 = vld [vmem:[%s22_s0] ss:$0 sm:$0xff] }
   0x2   :  { %5 = vst [vmem:[%s23_s1] sm:$0x3] %v4_v0 }

// kernel: tile.0
= control target key start
LH: loop header
LB: loop body
LE: loop exit
PB: predicated region body
PF: predicated region fallthrough
CT: control target
= control target key end

     0   :  { %s34_s8 = smov 125   ;;  %vm7_vm0 = vcmask 7168   ;;  %s35_s11 = smov 126   ;;  %s61_s0 = inlined_call_operand.vmem [shape: f32[2,4], index: 0, kind: input, shape index: {}]   ;;  %s62_s1 = inlined_call_operand.vmem [shape: f32[8,1], index: 1, kind: output, shape index: {}]  }
   0x1   :  { %v4_v0 = vld [vmem:[%s61_s0] sm:$0x3]  ;;  %s33_s0 = smov 127  }
   0x2   :  { %5 = vst [vmem:[#allocation0] sm:$0x3] %v4_v0 }
   0x9   :  { %v9_v1 = vld [vmem:[#allocation0] sm:$0x3]  }
   0xa   :  { %v21_v2 = vld [vmem:[#allocation0] sm:$0x3]   ;;  %10 = vrot.lane.b32.xlu0 %v9_v1, %s33_s0 }
   0xb   :  { %22 = vrot.lane.b32.xlu1 %v21_v2, %s34_s8  ;;  %v6_v3 = vld [vmem:[#allocation0] sm:$0x3]  }
   0xc   :  { %v15_v4 = vld [vmem:[#allocation0] sm:$0x3]   ;;  %8 = vst.msk [vmem:[%s62_s1] ss:$4 sm:$0x3] %vm7_vm0, %v6_v3  }
   0xe   :  { %16 = vrot.lane.b32.xlu0 %v15_v4, %s35_s11 }
  0x7c   :  { %v11_v5 = vpop.permute.xlu0 %10  }
  0x7d   :  { %v23_v6 = vpop.permute.xlu1 %22   ;;  %27 = vst.msk [vmem:[%s62_s1 + $0x1] ss:$4 sm:$0x3] %vm7_vm0, %v11_v5  }
  0x7e   :  { %29 = vst.msk [vmem:[%s62_s1 + $0x3] ss:$4 sm:$0x3] %vm7_vm0, %v23_v6  }
  0x80   :  { %v17_v7 = vpop.permute.xlu0 %16  }
  0x81   :  { %28 = vst.msk [vmem:[%s62_s1 + $0x2] ss:$4 sm:$0x3] %vm7_vm0, %v17_v7  }

// kernel: up_layer_forward.4
= control target key start
LH: loop header
LB: loop body
LE: loop exit
PB: predicated region body
PF: predicated region fallthrough
CT: control target
= control target key end

     0   :  { %s535_s12 = smov 0   ;;  %s600_s0 = inlined_call_operand.vmem [shape: f32[2,8,8,8], index: 0, kind: input, shape index: {}]   ;;  %s601_s1 = inlined_call_operand.vmem [shape: f32[8,16], index: 1, kind: input, shape index: {}]   ;;  %s602_s2 = inlined_call_operand.vmem [shape: f32[1,16], index: 2, kind: input, shape index: {}]   ;;  %s603_s3 = inlined_call_operand.vmem [shape: f32[2,16,8,8], index: 3, kind: output, shape index: {}]  }
   0x1 LB: > { %s435_s13 = sadd.s32 4294967295, %s512_s12   ;;  %p439_p0 = scmp.ge.s32.totalorder %s512_s12, 1  ;;  %s512_s12 = sphi %s535_s12, %s13_s12  }
   0x2   : > { %p137_p1 = scmp.lt.s32.totalorder %s512_s12, 3 }
   0x4   : > { %p138_p2 = pnand %p439_p0, %p137_p1 }
   0x5   : > { %v179_v0 = vld [vmem:[%s601_s1] sm:$0xff] (!%p138_p2)  ;;  %p161_p3 = scmp.lt.s32.totalorder (!%p138_p2), %s435_s13, 1  ;;  %vm187_vm0 = vcmask (!%p138_p2), 64512   ;;  %s514_s26 = smov (!%p138_p2), 120  }
   0x6   : > { %141 = sbr.rel (%p138_p2) target bundleno = 361 (0x169), region = 32  ;;  %481 = vmatprep.subr.mxu0 (!%p138_p2), %v179_v0  ;;  %495 = vmatprep.subr.mxu1 (!%p138_p2), %v179_v0  ;;  %v444_v9 = vld [vmem:[%s602_s2] ss:$0 sm:$0xff] (!%p138_p2) }
   0x7   : > { %482 = vmatpush3.msra.mxu0 (!%p138_p2), %v179_v0  ;;  %496 = vmatpush3.msra.mxu1 (!%p138_p2), %v179_v0 }
   0xd   : > { %s605_s13 = smov (!%p161_p3, %s435_s13), 1 }
   0xe   : > { %s470_s16 = sshll.u32 %s605_s13, 6  ;;  %s471_s20 = sshll.u32 %s605_s13, 7 }
   0xf   : > { %s165_s19 = scalar_lea.vmem %s600_s0, %s470_s16  ;;  %s563_s25 = scalar_lea.vmem %s603_s3, %s471_s20 }
  0x10   : > { %v171_v1 = vld [vmem:[%s165_s19] sm:$0xff]  ;;  %v172_v3 = vld [vmem:[%s165_s19 + $0x8] sm:$0xff]  ;;  %v173_v5 = vld [vmem:[%s165_s19 + $0x10] sm:$0xff] }
  0x11   : > { %v175_v2 = vld [vmem:[%s165_s19 + $0x20] sm:$0xff]  ;;  %483 = vmatprep.mubr.msk.f32.mxu0 %vm187_vm0, %v171_v1  ;;  %v176_v4 = vld [vmem:[%s165_s19 + $0x28] sm:$0xff]  ;;  %v177_v6 = vld [vmem:[%s165_s19 + $0x30] sm:$0xff] }
  0x12   : > { %489 = vmatprep.mubr.msk.f32.mxu1 %vm187_vm0, %v175_v2  ;;  %484 = vmatmul.mubr.msk.f32.vlgmr.msra.gmra.mrb[0].mxu0 %vm187_vm0, %v172_v3  ;;  %v174_v7 = vld [vmem:[%s165_s19 + $0x18] sm:$0xff] }
  0x13   : > { %490 = vmatmul.mubr.msk.f32.vlgmr.msra.gmra.mrb[0].mxu1 %vm187_vm0, %v176_v4  ;;  %486 = vmatprep.mubr.msk.f32.mxu0 %vm187_vm0, %v173_v5  ;;  %v178_v8 = vld [vmem:[%s165_s19 + $0x38] sm:$0xff] }
  0x14   : > { %492 = vmatprep.mubr.msk.f32.mxu1 %vm187_vm0, %v177_v6 }
  0x16   : > { %487 = vmatmul.mubr.msk.f32.gmra.mrb[2].mxu0 %vm187_vm0, %v174_v7 }
  0x17   : > { %493 = vmatmul.mubr.msk.f32.gmra.mrb[2].mxu1 %vm187_vm0, %v178_v8 }
  0xe5   : > { %v485_v10 = vpop.f32.mrb[0].mxu0 }
  0xe6   : > { %v491_v11 = vpop.f32.mrb[0].mxu1  ;;  %v284_v12 = vadd.f32 %v485_v10, %v444_v9  ;;  %v278_v14 = vpop.f32.mrb[1].mxu0 }
  0xe7   : > { %v304_v13 = vadd.f32 %v491_v11, %v444_v9  ;;  %v298_v15 = vpop.f32.mrb[1].mxu1  ;;  %v279_v16 = vadd.f32 %v444_v9, %v278_v14 }
  0xe8   : > { %v299_v17 = vadd.f32 %v444_v9, %v298_v15  ;;  %453 = vst.msk [vmem:[%s563_s25 + $0x10] sm:$0xff] %vm187_vm0, %v284_v12  ;;  %339 = vrot.lane.b32.xlu0 %v284_v12, %s514_s26 }
  0xe9   : > { %457 = vst.msk [vmem:[%s563_s25 + $0x50] sm:$0xff] %vm187_vm0, %v304_v13  ;;  %363 = vrot.lane.b32.xlu1 %v304_v13, %s514_s26  ;;  %317 = vst.msk [vmem:[%s563_s25] sm:$0xff] %vm187_vm0, %v279_v16  ;;  %v488_v18 = vpop.f32.mrb[2].mxu0 }
  0xea   : > { %456 = vst.msk [vmem:[%s563_s25 + $0x40] sm:$0xff] %vm187_vm0, %v299_v17  ;;  %v494_v19 = vpop.f32.mrb[2].mxu1  ;;  %v294_v20 = vadd.f32 %v488_v18, %v444_v9  ;;  %v288_v21 = vpop.f32.mrb[3].mxu0 }
  0xeb   : > { %v314_v22 = vadd.f32 %v494_v19, %v444_v9  ;;  %v308_v23 = vpop.f32.mrb[3].mxu1  ;;  %v289_v24 = vadd.f32 %v444_v9, %v288_v21 }
  0xec   : > { %v309_v25 = vadd.f32 %v444_v9, %v308_v23  ;;  %455 = vst.msk [vmem:[%s563_s25 + $0x30] sm:$0xff] %vm187_vm0, %v294_v20  ;;  %333 = vrot.lane.b32.xlu0 %v279_v16, %s514_s26 }
  0xed   : > { %351 = vrot.lane.b32.xlu1 %v294_v20, %s514_s26  ;;  %459 = vst.msk [vmem:[%s563_s25 + $0x70] sm:$0xff] %vm187_vm0, %v314_v22  ;;  %454 = vst.msk [vmem:[%s563_s25 + $0x20] sm:$0xff] %vm187_vm0, %v289_v24 }
  0xee   : > { %458 = vst.msk [vmem:[%s563_s25 + $0x60] sm:$0xff] %vm187_vm0, %v309_v25 }
  0xf0   : > { %357 = vrot.lane.b32.xlu0 %v299_v17, %s514_s26 }
  0xf1   : > { %345 = vrot.lane.b32.xlu1 %v289_v24, %s514_s26 }
  0xf4   : > { %369 = vrot.lane.b32.xlu0 %v309_v25, %s514_s26 }
  0xf5   : > { %375 = vrot.lane.b32.xlu1 %v314_v22, %s514_s26 }
 0x15a   : > { %v340_v27 = vpop.permute.xlu0 %339 }
 0x15b   : > { %v364_v26 = vpop.permute.xlu1 %363  ;;  %461 = vst.msk [vmem:[%s563_s25 + $0x18] sm:$0xff] %vm187_vm0, %v340_v27 }
 0x15c   : > { %465 = vst.msk [vmem:[%s563_s25 + $0x58] sm:$0xff] %vm187_vm0, %v364_v26 }
 0x15e   : > { %v334_v29 = vpop.permute.xlu0 %333 }
 0x15f   : > { %v352_v28 = vpop.permute.xlu1 %351  ;;  %460 = vst.msk [vmem:[%s563_s25 + $0x8] sm:$0xff] %vm187_vm0, %v334_v29 }
 0x160   : > { %463 = vst.msk [vmem:[%s563_s25 + $0x38] sm:$0xff] %vm187_vm0, %v352_v28 }
 0x162   : > { %v358_v31 = vpop.permute.xlu0 %357 }
 0x163   : > { %v346_v30 = vpop.permute.xlu1 %345  ;;  %464 = vst.msk [vmem:[%s563_s25 + $0x48] sm:$0xff] %vm187_vm0, %v358_v31 }
 0x164   : > { %462 = vst.msk [vmem:[%s563_s25 + $0x28] sm:$0xff] %vm187_vm0, %v346_v30 }
 0x166   : > { %v370_v33 = vpop.permute.xlu0 %369 }
 0x167   : > { %v376_v32 = vpop.permute.xlu1 %375  ;;  %466 = vst.msk [vmem:[%s563_s25 + $0x68] sm:$0xff] %vm187_vm0, %v370_v33 }
 0x168   : > { %467 = vst.msk [vmem:[%s563_s25 + $0x78] sm:$0xff] %vm187_vm0, %v376_v32 }
 0x169 PF: > { %s13_s12 = sadd.s32 1, %s512_s12  }
 0x16a   : > { %p10_p4 = scmp.ge.s32.totalorder %s13_s12, 4  }
 0x16c   :  { %12 = sbr.rel (!%p10_p4) target bundleno = 1 (0x1), region = 77 }

// kernel: up_layer_forward.7
= control target key start
LH: loop header
LB: loop body
LE: loop exit
PB: predicated region body
PF: predicated region fallthrough
CT: control target
= control target key end

     0   :  { %v40_v0 = vmov 0   ;;  %s79_s1 = inlined_call_operand.vmem [shape: f32[8,1], index: 1, kind: input, shape index: {}]   ;;  %s80_s2 = inlined_call_operand.vmem [shape: f32[8,1], index: 2, kind: input, shape index: {}]   ;;  %s81_s0 = inlined_call_operand.vmem [shape: f32[8,256], index: 0, kind: input, shape index: {}]   ;;  %s82_s3 = inlined_call_operand.vmem [shape: f32[8,256], index: 3, kind: output, shape index: {}]  }
   0x1   :  { %39 = vset.pattern.permute.xlu0 %v40_v0  ;;  %v16_v1 = vld [vmem:[%s79_s1] sm:$0xff]  ;;  %v15_v5 = vld [vmem:[%s81_s0 + $0x8] sm:$0xff] }
   0x2   :  { %19 = vperm.xlu0 %39, %v16_v1   ;;  %v24_v2 = vld [vmem:[%s80_s2] sm:$0xff] }
   0x3   :  { %v14_v4 = vld [vmem:[%s81_s0] sm:$0xff] }
   0x6   :  { %27 = vperm.xlu0 %39, %v24_v2  }
  0x81   :  { %v20_v3 = vpop.permute.xlu0 %19 }
  0x82   :  { %v22_v6 = vmul.f32 %v20_v3, %v14_v4  ;;  %v23_v7 = vmul.f32 %v20_v3, %v15_v5 }
  0x85   :  { %v28_v8 = vpop.permute.xlu0 %27 }
  0x86   :  { %v30_v9 = vadd.f32 %v28_v8, %v22_v6  ;;  %v31_v10 = vadd.f32 %v28_v8, %v23_v7 }
  0x88   :  { %32 = vst [vmem:[%s82_s3] sm:$0xff] %v30_v9  ;;  %33 = vst [vmem:[%s82_s3 + $0x8] sm:$0xff] %v31_v10 }

// kernel: up_layer_forward.5
= control target key start
LH: loop header
LB: loop body
LE: loop exit
PB: predicated region body
PF: predicated region fallthrough
CT: control target
= control target key end

     0   :  { %s2809_s21 = smov 0   ;;  %s3949_s0 = inlined_call_operand.vmem [shape: f32[2,20,20,4], index: 0, kind: input, shape index: {}]   ;;  %s3950_s1 = inlined_call_operand.vmem [shape: f32[2,16,16,4], index: 1, kind: input, shape index: {}]   ;;  %s3951_s2 = inlined_call_operand.vmem [shape: f32[4,72], index: 2, kind: input, shape index: {}]   ;;  %s3952_s3 = inlined_call_operand.vmem [shape: f32[4,1], index: 3, kind: input, shape index: {}]   ;;  %s3953_s4 = inlined_call_operand.vmem [shape: f32[2,4,256], index: 4, kind: output, shape index: {0}]   ;;  %s3954_s5 = inlined_call_operand.vmem [shape: f32[2,4,1], index: 5, kind: output, shape index: {1}]   ;;  %s3955_s6 = inlined_call_operand.vmem [shape: f32[2,4,1], index: 6, kind: output, shape index: {2}]  }
   0x1 LB: > { %s2571_s22 = sadd.s32 4294967295, %s2761_s21   ;;  %p2575_p0 = scmp.ge.s32.totalorder %s2761_s21, 1  ;;  %s2761_s21 = sphi %s2809_s21, %s17_s21  }
   0x2   : > { %p227_p1 = scmp.lt.s32.totalorder %s2761_s21, 3 }
   0x4   : > { %p228_p2 = pnand %p2575_p0, %p227_p1 }
   0x5   : > { %p270_p3 = scmp.lt.s32.totalorder (!%p228_p2), %s2571_s22, 1  ;;  %vm293_vm0 = vcmask (!%p228_p2), 64512   ;;  %v2763_v0 = vmov (!%p228_p2), 0.0   ;;  %vm297_vm1 = vcmask (!%p228_p2), 57344   ;;  %s2764_s27 = smov (!%p228_p2), 4   ;;  %vm374_vm2 = vcmask (!%p228_p2), 31744  }
   0x6   : > { %231 = sbr.rel (%p228_p2) target bundleno = 1141 (0x475), region = 36  ;;  %295 = vst.msk [vmem:[#allocation2 + $0x8] sm:$0xff] (!%p228_p2), %vm293_vm0, %v2763_v0  ;;  %294 = vst.msk [vmem:[#allocation2] sm:$0xff] (!%p228_p2), %vm293_vm0, %v2763_v0  ;;  %s2765_s8 = smov (!%p228_p2), 8   ;;  %vm567_vm3 = vcmask (!%p228_p2), 64544   ;;  %vm824_vm4 = vcmask (!%p228_p2), 130112  }
   0x7   : > { %296 = vst.msk [vmem:[#allocation2 + $0x10] sm:$0xff] (!%p228_p2), %vm293_vm0, %v2763_v0  ;;  %300 = vst.msk [vmem:[#allocation2 + $0x220] sm:$0xff] (!%p228_p2), %vm293_vm0, %v2763_v0  ;;  %s2766_s9 = smov (!%p228_p2), 16   ;;  %vm1017_vm5 = vcmask (!%p228_p2), 195712   ;;  %s2767_s10 = smov (!%p228_p2), 24   ;;  %vm1210_vm6 = vcmask (!%p228_p2), 261312  }
   0x8   : > { %301 = vst.msk [vmem:[#allocation2 + $0x228] sm:$0xff] (!%p228_p2), %vm293_vm0, %v2763_v0  ;;  %302 = vst.msk [vmem:[#allocation2 + $0x230] sm:$0xff] (!%p228_p2), %vm293_vm0, %v2763_v0  ;;  %s2768_s11 = smov (!%p228_p2), 32   ;;  %s2769_s12 = smov (!%p228_p2), 40   ;;  %vm1403_vm7 = vcmask (!%p228_p2), 326912   ;;  %vm1596_vm8 = vcmask (!%p228_p2), 392512  }
   0x9   : > { %298 = vst.msk [vmem:[#allocation2 + $0x18] sm:$0x1] (!%p228_p2), %vm297_vm1, %v2763_v0  ;;  %303 = vst.msk [vmem:[#allocation2 + $0x238] sm:$0x1] (!%p228_p2), %vm297_vm1, %v2763_v0  ;;  %s2770_s13 = smov (!%p228_p2), 48   ;;  %s2771_s14 = smov (!%p228_p2), 56  }
   0xa   : > { %304 = vst.msk [vmem:[#allocation2 + $0x7] sm:$0x1] (!%p228_p2), %vm297_vm1, %v2763_v0  ;;  %305 = vst.msk [vmem:[#allocation2 + $0x27] sm:$0x1] (!%p228_p2), %vm297_vm1, %v2763_v0  ;;  %s2772_s15 = smov (!%p228_p2), 64   ;;  %vm1790_vm9 = vcmask (!%p228_p2), 458112  }
   0xb   : > { %306 = vst.msk [vmem:[#allocation2 + $0x47] sm:$0x1] (!%p228_p2), %vm297_vm1, %v2763_v0  ;;  %307 = vst.msk [vmem:[#allocation2 + $0x67] sm:$0x1] (!%p228_p2), %vm297_vm1, %v2763_v0  ;;  %vm1983_vm10 = vcmask (!%p228_p2), 523712   ;;  %vm2176_vm11 = vcmask (!%p228_p2), 589312  }
   0xc   : > { %308 = vst.msk [vmem:[#allocation2 + $0x87] sm:$0x1] (!%p228_p2), %vm297_vm1, %v2763_v0  ;;  %309 = vst.msk [vmem:[#allocation2 + $0xa7] sm:$0x1] (!%p228_p2), %vm297_vm1, %v2763_v0  ;;  %vm2248_vm12 = vcmask (!%p228_p2), 588800   ;;  %vm2426_vm14 = vcmask (!%p228_p2), 1043456  }
   0xd   : > { %s3959_s22 = smov (!%p270_p3, %s2571_s22), 1  ;;  %310 = vst.msk [vmem:[#allocation2 + $0xc7] sm:$0x1] %vm297_vm1, %v2763_v0  ;;  %311 = vst.msk [vmem:[#allocation2 + $0xe7] sm:$0x1] %vm297_vm1, %v2763_v0  ;;  %v664_v63 = vld [vmem:[#allocation2 + $0x8] sm:$0xff] }
   0xe   : > { %312 = vst.msk [vmem:[#allocation2 + $0x107] sm:$0x1] %vm297_vm1, %v2763_v0  ;;  %313 = vst.msk [vmem:[#allocation2 + $0x127] sm:$0x1] %vm297_vm1, %v2763_v0  ;;  %s2650_s23 = sshll.u32 %s3959_s22, 8  ;;  %s2734_s28 = smul.u32 480, %s3959_s22 }
   0xf   : > { %314 = vst.msk [vmem:[#allocation2 + $0x147] sm:$0x1] %vm297_vm1, %v2763_v0  ;;  %315 = vst.msk [vmem:[#allocation2 + $0x167] sm:$0x1] %vm297_vm1, %v2763_v0  ;;  %s2867_s26 = scalar_lea.vmem %s3950_s1, %s2650_s23  ;;  %s2651_s20 = sshll.u32 %s3959_s22, 3  ;;  %vm2432_vm15 = vcmask 3072  }
  0x10   : > { %316 = vst.msk [vmem:[#allocation2 + $0x187] sm:$0x1] %vm297_vm1, %v2763_v0  ;;  %317 = vst.msk [vmem:[#allocation2 + $0x1a7] sm:$0x1] %vm297_vm1, %v2763_v0  ;;  %v409_v1 = vld [vmem:[%s2867_s26 + $0x10] sm:$0xff]  ;;  %v407_v2 = vld [vmem:[%s2867_s26] sm:$0xff]  ;;  %s2883_s7 = scalar_lea.vmem %s3949_s0, %s2734_s28  ;;  %s284_s25 = scalar_lea.vmem %s3953_s4, %s2651_s20 }
  0x11   : > { %318 = vst.msk [vmem:[#allocation2 + $0x1c7] sm:$0x1] %vm297_vm1, %v2763_v0  ;;  %319 = vst.msk [vmem:[#allocation2 + $0x1e7] sm:$0x1] %vm297_vm1, %v2763_v0  ;;  %475 = vrot.lane.b32.xlu1 %v409_v1, %s2764_s27  ;;  %471 = vrot.lane.b32.xlu0 %v407_v2, %s2764_s27  ;;  %v410_v3 = vld [vmem:[%s2867_s26 + $0x18] sm:$0xff]  ;;  %v408_v4 = vld [vmem:[%s2867_s26 + $0x8] sm:$0xff] }
  0x12   : > { %320 = vst.msk [vmem:[#allocation2 + $0x207] sm:$0x1] %vm297_vm1, %v2763_v0  ;;  %321 = vst.msk [vmem:[#allocation2 + $0x227] sm:$0x1] %vm297_vm1, %v2763_v0  ;;  %v411_v5 = vld [vmem:[%s2867_s26 + $0x20] sm:$0xff]  ;;  %v412_v6 = vld [vmem:[%s2867_s26 + $0x28] sm:$0xff] }
  0x13   : > { %323 = vst.msk [vmem:[#allocation2 + $0x38] sm:$0x1] %vm297_vm1, %v2763_v0  ;;  %324 = vst.msk [vmem:[#allocation2 + $0x58] sm:$0x1] %vm297_vm1, %v2763_v0  ;;  %v413_v7 = vld [vmem:[%s2867_s26 + $0x30] sm:$0xff]  ;;  %v414_v8 = vld [vmem:[%s2867_s26 + $0x38] sm:$0xff] }
  0x14   : > { %325 = vst.msk [vmem:[#allocation2 + $0x78] sm:$0x1] %vm297_vm1, %v2763_v0  ;;  %326 = vst.msk [vmem:[#allocation2 + $0x98] sm:$0x1] %vm297_vm1, %v2763_v0  ;;  %v2585_v9 = vld [vmem:[%s2883_s7 + $0x4a] sm:$0xff]  ;;  %v2583_v10 = vld [vmem:[%s2883_s7 + $0x32] sm:$0xff] }
  0x15   : > { %327 = vst.msk [vmem:[#allocation2 + $0xb8] sm:$0x1] %vm297_vm1, %v2763_v0  ;;  %328 = vst.msk [vmem:[#allocation2 + $0xd8] sm:$0x1] %vm297_vm1, %v2763_v0  ;;  %477 = vrot.lane.b32.xlu1 %v410_v3, %s2764_s27  ;;  %473 = vrot.lane.b32.xlu0 %v408_v4, %s2764_s27  ;;  %v415_v11 = vld [vmem:[%s2867_s26 + $0x40] sm:$0xff]  ;;  %v2586_v12 = vld [vmem:[%s2883_s7 + $0x52] sm:$0xff] }
  0x16   : > { %329 = vst.msk [vmem:[#allocation2 + $0xf8] sm:$0x1] %vm297_vm1, %v2763_v0  ;;  %330 = vst.msk [vmem:[#allocation2 + $0x118] sm:$0x1] %vm297_vm1, %v2763_v0  ;;  %v2584_v13 = vld [vmem:[%s2883_s7 + $0x3a] sm:$0xff]  ;;  %v416_v14 = vld [vmem:[%s2867_s26 + $0x48] sm:$0xff] }
  0x17   : > { %331 = vst.msk [vmem:[#allocation2 + $0x138] sm:$0x1] %vm297_vm1, %v2763_v0  ;;  %332 = vst.msk [vmem:[#allocation2 + $0x158] sm:$0x1] %vm297_vm1, %v2763_v0  ;;  %v2587_v15 = vld [vmem:[%s2883_s7 + $0x62] sm:$0xff]  ;;  %v2588_v16 = vld [vmem:[%s2883_s7 + $0x6a] sm:$0xff] }
  0x18   : > { %333 = vst.msk [vmem:[#allocation2 + $0x178] sm:$0x1] %vm297_vm1, %v2763_v0  ;;  %334 = vst.msk [vmem:[#allocation2 + $0x198] sm:$0x1] %vm297_vm1, %v2763_v0  ;;  %v2589_v17 = vld [vmem:[%s2883_s7 + $0x7a] sm:$0xff]  ;;  %v2590_v18 = vld [vmem:[%s2883_s7 + $0x82] sm:$0xff] }
  0x19   : > { %335 = vst.msk [vmem:[#allocation2 + $0x1b8] sm:$0x1] %vm297_vm1, %v2763_v0  ;;  %336 = vst.msk [vmem:[#allocation2 + $0x1d8] sm:$0x1] %vm297_vm1, %v2763_v0  ;;  %479 = vrot.lane.b32.xlu0 %v411_v5, %s2764_s27  ;;  %481 = vrot.lane.b32.xlu1 %v412_v6, %s2764_s27  ;;  %v2591_v19 = vld [vmem:[%s2883_s7 + $0x92] sm:$0xff]  ;;  %v2592_v20 = vld [vmem:[%s2883_s7 + $0x9a] sm:$0xff] }
  0x1a   : > { %337 = vst.msk [vmem:[#allocation2 + $0x1f8] sm:$0x1] %vm297_vm1, %v2763_v0  ;;  %338 = vst.msk [vmem:[#allocation2 + $0x218] sm:$0x1] %vm297_vm1, %v2763_v0  ;;  %v2593_v21 = vld [vmem:[%s2883_s7 + $0xaa] sm:$0xff]  ;;  %v2594_v22 = vld [vmem:[%s2883_s7 + $0xb2] sm:$0xff] }
  0x1b   : > { %322 = vst.msk [vmem:[#allocation2 + $0x18] sm:$0x1] %vm297_vm1, %v2763_v0  ;;  %339 = vst.msk [vmem:[#allocation2 + $0x238] sm:$0x1] %vm297_vm1, %v2763_v0  ;;  %v2595_v23 = vld [vmem:[%s2883_s7 + $0xc2] sm:$0xff]  ;;  %v2596_v24 = vld [vmem:[%s2883_s7 + $0xca] sm:$0xff] }
  0x1c   : > { %377 = vst.msk [vmem:[#allocation2 + $0x48] sm:$0xff] %vm374_vm2, %v2585_v9  ;;  %375 = vst.msk [vmem:[#allocation2 + $0x28] sm:$0xff] %vm374_vm2, %v2583_v10  ;;  %v2597_v25 = vld [vmem:[%s2883_s7 + $0xda] sm:$0xff]  ;;  %v2598_v26 = vld [vmem:[%s2883_s7 + $0xe2] sm:$0xff] }
  0x1d   : > { %483 = vrot.lane.b32.xlu0 %v413_v7, %s2764_s27  ;;  %485 = vrot.lane.b32.xlu1 %v414_v8, %s2764_s27  ;;  %378 = vst.msk [vmem:[#allocation2 + $0x50] sm:$0xff] %vm374_vm2, %v2586_v12  ;;  %376 = vst.msk [vmem:[#allocation2 + $0x30] sm:$0xff] %vm374_vm2, %v2584_v13  ;;  %v417_v27 = vld [vmem:[%s2867_s26 + $0x50] sm:$0xff]  ;;  %v418_v28 = vld [vmem:[%s2867_s26 + $0x58] sm:$0xff] }
  0x1e   : > { %379 = vst.msk [vmem:[#allocation2 + $0x68] sm:$0xff] %vm374_vm2, %v2587_v15  ;;  %380 = vst.msk [vmem:[#allocation2 + $0x70] sm:$0xff] %vm374_vm2, %v2588_v16  ;;  %v2599_v29 = vld [vmem:[%s2883_s7 + $0xf2] sm:$0xff]  ;;  %v2600_v30 = vld [vmem:[%s2883_s7 + $0xfa] sm:$0xff] }
  0x1f   : > { %381 = vst.msk [vmem:[#allocation2 + $0x88] sm:$0xff] %vm374_vm2, %v2589_v17  ;;  %382 = vst.msk [vmem:[#allocation2 + $0x90] sm:$0xff] %vm374_vm2, %v2590_v18  ;;  %v419_v31 = vld [vmem:[%s2867_s26 + $0x60] sm:$0xff]  ;;  %v420_v32 = vld [vmem:[%s2867_s26 + $0x68] sm:$0xff] }
  0x20   : > { %383 = vst.msk [vmem:[#allocation2 + $0xa8] sm:$0xff] %vm374_vm2, %v2591_v19  ;;  %384 = vst.msk [vmem:[#allocation2 + $0xb0] sm:$0xff] %vm374_vm2, %v2592_v20  ;;  %v2601_v33 = vld [vmem:[%s2883_s7 + $0x10a] sm:$0xff]  ;;  %v2602_v34 = vld [vmem:[%s2883_s7 + $0x112] sm:$0xff] }
  0x21   : > { %385 = vst.msk [vmem:[#allocation2 + $0xc8] sm:$0xff] %vm374_vm2, %v2593_v21  ;;  %487 = vrot.lane.b32.xlu0 %v415_v11, %s2764_s27  ;;  %489 = vrot.lane.b32.xlu1 %v416_v14, %s2764_s27  ;;  %386 = vst.msk [vmem:[#allocation2 + $0xd0] sm:$0xff] %vm374_vm2, %v2594_v22  ;;  %v421_v35 = vld [vmem:[%s2867_s26 + $0x70] sm:$0xff]  ;;  %v422_v36 = vld [vmem:[%s2867_s26 + $0x78] sm:$0xff] }
  0x22   : > { %387 = vst.msk [vmem:[#allocation2 + $0xe8] sm:$0xff] %vm374_vm2, %v2595_v23  ;;  %388 = vst.msk [vmem:[#allocation2 + $0xf0] sm:$0xff] %vm374_vm2, %v2596_v24  ;;  %v2603_v37 = vld [vmem:[%s2883_s7 + $0x122] sm:$0xff]  ;;  %v2604_v38 = vld [vmem:[%s2883_s7 + $0x12a] sm:$0xff] }
  0x23   : > { %389 = vst.msk [vmem:[#allocation2 + $0x108] sm:$0xff] %vm374_vm2, %v2597_v25  ;;  %390 = vst.msk [vmem:[#allocation2 + $0x110] sm:$0xff] %vm374_vm2, %v2598_v26  ;;  %v423_v39 = vld [vmem:[%s2867_s26 + $0x80] sm:$0xff]  ;;  %v424_v40 = vld [vmem:[%s2867_s26 + $0x88] sm:$0xff] }
  0x24   : > { %391 = vst.msk [vmem:[#allocation2 + $0x128] sm:$0xff] %vm374_vm2, %v2599_v29  ;;  %392 = vst.msk [vmem:[#allocation2 + $0x130] sm:$0xff] %vm374_vm2, %v2600_v30  ;;  %v2605_v41 = vld [vmem:[%s2883_s7 + $0x13a] sm:$0xff]  ;;  %v2606_v42 = vld [vmem:[%s2883_s7 + $0x142] sm:$0xff] }
  0x25   : > { %491 = vrot.lane.b32.xlu0 %v417_v27, %s2764_s27  ;;  %493 = vrot.lane.b32.xlu1 %v418_v28, %s2764_s27  ;;  %393 = vst.msk [vmem:[#allocation2 + $0x148] sm:$0xff] %vm374_vm2, %v2601_v33  ;;  %394 = vst.msk [vmem:[#allocation2 + $0x150] sm:$0xff] %vm374_vm2, %v2602_v34  ;;  %v425_v43 = vld [vmem:[%s2867_s26 + $0x90] sm:$0xff]  ;;  %v426_v44 = vld [vmem:[%s2867_s26 + $0x98] sm:$0xff] }
  0x26   : > { %395 = vst.msk [vmem:[#allocation2 + $0x168] sm:$0xff] %vm374_vm2, %v2603_v37  ;;  %396 = vst.msk [vmem:[#allocation2 + $0x170] sm:$0xff] %vm374_vm2, %v2604_v38  ;;  %v2607_v45 = vld [vmem:[%s2883_s7 + $0x152] sm:$0xff]  ;;  %v2608_v46 = vld [vmem:[%s2883_s7 + $0x15a] sm:$0xff] }
  0x27   : > { %397 = vst.msk [vmem:[#allocation2 + $0x188] sm:$0xff] %vm374_vm2, %v2605_v41  ;;  %398 = vst.msk [vmem:[#allocation2 + $0x190] sm:$0xff] %vm374_vm2, %v2606_v42  ;;  %v427_v47 = vld [vmem:[%s2867_s26 + $0xa0] sm:$0xff]  ;;  %v428_v48 = vld [vmem:[%s2867_s26 + $0xa8] sm:$0xff] }
  0x28   : > { %399 = vst.msk [vmem:[#allocation2 + $0x1a8] sm:$0xff] %vm374_vm2, %v2607_v45  ;;  %400 = vst.msk [vmem:[#allocation2 + $0x1b0] sm:$0xff] %vm374_vm2, %v2608_v46  ;;  %v2609_v49 = vld [vmem:[%s2883_s7 + $0x16a] sm:$0xff]  ;;  %v2610_v50 = vld [vmem:[%s2883_s7 + $0x172] sm:$0xff] }
  0x29   : > { %495 = vrot.lane.b32.xlu0 %v419_v31, %s2764_s27  ;;  %497 = vrot.lane.b32.xlu1 %v420_v32, %s2764_s27  ;;  %401 = vst.msk [vmem:[#allocation2 + $0x1c8] sm:$0xff] %vm374_vm2, %v2609_v49  ;;  %402 = vst.msk [vmem:[#allocation2 + $0x1d0] sm:$0xff] %vm374_vm2, %v2610_v50  ;;  %v429_v51 = vld [vmem:[%s2867_s26 + $0xb0] sm:$0xff]  ;;  %v430_v52 = vld [vmem:[%s2867_s26 + $0xb8] sm:$0xff] }
  0x2a   : > { %v2611_v53 = vld [vmem:[%s2883_s7 + $0x182] sm:$0xff]  ;;  %v2612_v54 = vld [vmem:[%s2883_s7 + $0x18a] sm:$0xff]  ;;  %v434_v58 = vld [vmem:[%s2867_s26 + $0xd8] sm:$0xff] }
  0x2b   : > { %403 = vst.msk [vmem:[#allocation2 + $0x1e8] sm:$0xff] %vm374_vm2, %v2611_v53  ;;  %404 = vst.msk [vmem:[#allocation2 + $0x1f0] sm:$0xff] %vm374_vm2, %v2612_v54  ;;  %v431_v55 = vld [vmem:[%s2867_s26 + $0xc0] sm:$0xff]  ;;  %v432_v56 = vld [vmem:[%s2867_s26 + $0xc8] sm:$0xff] }
  0x2c   : > { %v433_v57 = vld [vmem:[%s2867_s26 + $0xd0] sm:$0xff]  ;;  %v435_v59 = vld [vmem:[%s2867_s26 + $0xe0] sm:$0xff]  ;;  %v436_v60 = vld [vmem:[%s2867_s26 + $0xe8] sm:$0xff] }
  0x2d   : > { %499 = vrot.lane.b32.xlu0 %v421_v35, %s2764_s27  ;;  %501 = vrot.lane.b32.xlu1 %v422_v36, %s2764_s27  ;;  %v437_v61 = vld [vmem:[%s2867_s26 + $0xf0] sm:$0xff]  ;;  %v438_v62 = vld [vmem:[%s2867_s26 + $0xf8] sm:$0xff]  ;;  %v600_v5 = vld [vmem:[#allocation2 + $0x7] sm:$0xff]  ;;  %s2581_s26 = sshll.u32 %s3959_s22, 2 }
  0x2e   : > { %v665_v0 = vld [vmem:[#allocation2 + $0x10] sm:$0xff]  ;;  %v2613_v3 = vld [vmem:[%s2883_s7 + $0x19a] sm:$0xff]  ;;  %v2614_v4 = vld [vmem:[%s2883_s7 + $0x1a2] sm:$0xff]  ;;  %632 = vst.msk [vmem:[#allocation3] sm:$0xff] %vm293_vm0, %v600_v5  ;;  %s288_s29 = scalar_lea.vmem %s3954_s5, %s2581_s26 }
  0x2f   : > { %v857_v1 = vld [vmem:[#allocation2 + $0x9] sm:$0xff]  ;;  %v858_v2 = vld [vmem:[#allocation2 + $0x11] sm:$0xff]  ;;  %405 = vst.msk [vmem:[#allocation2 + $0x208] sm:$0xff] %vm374_vm2, %v2613_v3  ;;  %406 = vst.msk [vmem:[#allocation2 + $0x210] sm:$0xff] %vm374_vm2, %v2614_v4 }
  0x30   : > { %v601_v6 = vld [vmem:[#allocation2 + $0xf] sm:$0xff]  ;;  %vm3527_vm13 = vmpackc.low %vm2248_vm12, %vm2248_vm12 }
  0x31   : > { %503 = vrot.lane.b32.xlu0 %v423_v39, %s2764_s27  ;;  %505 = vrot.lane.b32.xlu1 %v424_v40, %s2764_s27  ;;  %633 = vst.msk [vmem:[#allocation3 + $0x8] sm:$0xff] %vm293_vm0, %v601_v6 }
  0x35   : > { %507 = vrot.lane.b32.xlu0 %v425_v43, %s2764_s27  ;;  %509 = vrot.lane.b32.xlu1 %v426_v44, %s2764_s27 }
  0x39   : > { %511 = vrot.lane.b32.xlu0 %v427_v47, %s2764_s27  ;;  %513 = vrot.lane.b32.xlu1 %v428_v48, %s2764_s27 }
  0x3d   : > { %515 = vrot.lane.b32.xlu0 %v429_v51, %s2764_s27  ;;  %517 = vrot.lane.b32.xlu1 %v430_v52, %s2764_s27 }
  0x41   : > { %519 = vrot.lane.b32.xlu0 %v431_v55, %s2764_s27  ;;  %521 = vrot.lane.b32.xlu1 %v432_v56, %s2764_s27 }
  0x45   : > { %523 = vrot.lane.b32.xlu0 %v433_v57, %s2764_s27  ;;  %525 = vrot.lane.b32.xlu1 %v434_v58, %s2764_s27 }
  0x49   : > { %527 = vrot.lane.b32.xlu0 %v435_v59, %s2764_s27  ;;  %529 = vrot.lane.b32.xlu1 %v436_v60, %s2764_s27 }
  0x4d   : > { %531 = vrot.lane.b32.xlu0 %v437_v61, %s2764_s27  ;;  %533 = vrot.lane.b32.xlu1 %v438_v62, %s2764_s27 }
  0x51   : > { %728 = vrot.lane.b32.xlu0 %v664_v63, %s2765_s8  ;;  %730 = vrot.lane.b32.xlu1 %v665_v0, %s2765_s8 }
  0x55   : > { %921 = vrot.lane.b32.xlu0 %v857_v1, %s2766_s9  ;;  %923 = vrot.lane.b32.xlu1 %v858_v2, %s2766_s9 }
  0x83   : > { %v476_v7 = vpop.permute.xlu1 %475  ;;  %v472_v8 = vpop.permute.xlu0 %471 }
  0x84   : > { %570 = vst.msk [vmem:[#allocation2 + $0x48] sm:$0xff] %vm567_vm3, %v476_v7  ;;  %568 = vst.msk [vmem:[#allocation2 + $0x28] sm:$0xff] %vm567_vm3, %v472_v8 }
  0x87   : > { %v478_v9 = vpop.permute.xlu1 %477  ;;  %v474_v10 = vpop.permute.xlu0 %473 }
  0x88   : > { %571 = vst.msk [vmem:[#allocation2 + $0x50] sm:$0xff] %vm567_vm3, %v478_v9  ;;  %569 = vst.msk [vmem:[#allocation2 + $0x30] sm:$0xff] %vm567_vm3, %v474_v10 }
  0x8b   : > { %v480_v11 = vpop.permute.xlu0 %479  ;;  %v3013_v12 = vld [vmem:[#allocation2 + $0x28] sm:$0xff]  ;;  %v482_v13 = vpop.permute.xlu1 %481 }
  0x8c   : > { %v3015_v14 = vld [vmem:[#allocation2 + $0x27] sm:$0xff]  ;;  %572 = vst.msk [vmem:[#allocation2 + $0x68] sm:$0xff] %vm567_vm3, %v480_v11  ;;  %732 = vrot.lane.b32.xlu0 %v3013_v12, %s2765_s8  ;;  %573 = vst.msk [vmem:[#allocation2 + $0x70] sm:$0xff] %vm567_vm3, %v482_v13 }
  0x8d   : > { %634 = vst.msk [vmem:[#allocation3 + $0x10] sm:$0xff] %vm293_vm0, %v3015_v14  ;;  %v3023_v15 = vld [vmem:[#allocation2 + $0x47] sm:$0xff] }
  0x8e   : > { %v3025_v16 = vld [vmem:[#allocation2 + $0x48] sm:$0xff]  ;;  %636 = vst.msk [vmem:[#allocation3 + $0x20] sm:$0xff] %vm293_vm0, %v3023_v15 }
  0x8f   : > { %v484_v17 = vpop.permute.xlu0 %483  ;;  %v3029_v18 = vld [vmem:[#allocation2 + $0x30] sm:$0xff]  ;;  %v486_v19 = vpop.permute.xlu1 %485 }
  0x90   : > { %574 = vst.msk [vmem:[#allocation2 + $0x88] sm:$0xff] %vm567_vm3, %v484_v17  ;;  %734 = vrot.lane.b32.xlu1 %v3029_v18, %s2765_s8  ;;  %736 = vrot.lane.b32.xlu0 %v3025_v16, %s2765_s8  ;;  %575 = vst.msk [vmem:[#allocation2 + $0x90] sm:$0xff] %vm567_vm3, %v486_v19  ;;  %v3037_v20 = vld [vmem:[#allocation2 + $0x50] sm:$0xff] }
  0x91   : > { %v3039_v21 = vld [vmem:[#allocation2 + $0x2f] sm:$0xff] }
  0x92   : > { %v3041_v22 = vld [vmem:[#allocation2 + $0x4f] sm:$0xff]  ;;  %635 = vst.msk [vmem:[#allocation3 + $0x18] sm:$0xff] %vm293_vm0, %v3039_v21 }
  0x93   : > { %637 = vst.msk [vmem:[#allocation3 + $0x28] sm:$0xff] %vm293_vm0, %v3041_v22  ;;  %v488_v23 = vpop.permute.xlu0 %487  ;;  %v3047_v24 = vld [vmem:[#allocation2 + $0x68] sm:$0xff]  ;;  %v490_v25 = vpop.permute.xlu1 %489  ;;  %v3059_v28 = vld [vmem:[#allocation2 + $0x70] sm:$0xff] }
  0x94   : > { %576 = vst.msk [vmem:[#allocation2 + $0xa8] sm:$0xff] %vm567_vm3, %v488_v23  ;;  %738 = vrot.lane.b32.xlu1 %v3037_v20, %s2765_s8  ;;  %740 = vrot.lane.b32.xlu0 %v3047_v24, %s2765_s8  ;;  %577 = vst.msk [vmem:[#allocation2 + $0xb0] sm:$0xff] %vm567_vm3, %v490_v25  ;;  %v3055_v26 = vld [vmem:[#allocation2 + $0x67] sm:$0xff]  ;;  %v3057_v27 = vld [vmem:[#allocation2 + $0x6f] sm:$0xff] }
  0x95   : > { %638 = vst.msk [vmem:[#allocation3 + $0x30] sm:$0xff] %vm293_vm0, %v3055_v26  ;;  %639 = vst.msk [vmem:[#allocation3 + $0x38] sm:$0xff] %vm293_vm0, %v3057_v27 }
  0x97   : > { %v492_v29 = vpop.permute.xlu0 %491  ;;  %v3065_v30 = vld [vmem:[#allocation2 + $0x88] sm:$0xff]  ;;  %v494_v31 = vpop.permute.xlu1 %493  ;;  %v3077_v34 = vld [vmem:[#allocation2 + $0x90] sm:$0xff] }
  0x98   : > { %578 = vst.msk [vmem:[#allocation2 + $0xc8] sm:$0xff] %vm567_vm3, %v492_v29  ;;  %742 = vrot.lane.b32.xlu1 %v3059_v28, %s2765_s8  ;;  %744 = vrot.lane.b32.xlu0 %v3065_v30, %s2765_s8  ;;  %579 = vst.msk [vmem:[#allocation2 + $0xd0] sm:$0xff] %vm567_vm3, %v494_v31  ;;  %v3073_v32 = vld [vmem:[#allocation2 + $0x87] sm:$0xff]  ;;  %v3075_v33 = vld [vmem:[#allocation2 + $0x8f] sm:$0xff] }
  0x99   : > { %640 = vst.msk [vmem:[#allocation3 + $0x40] sm:$0xff] %vm293_vm0, %v3073_v32  ;;  %641 = vst.msk [vmem:[#allocation3 + $0x48] sm:$0xff] %vm293_vm0, %v3075_v33 }
  0x9b   : > { %v496_v35 = vpop.permute.xlu0 %495  ;;  %v674_v36 = vld [vmem:[#allocation2 + $0xa8] sm:$0xff]  ;;  %v498_v37 = vpop.permute.xlu1 %497  ;;  %v675_v40 = vld [vmem:[#allocation2 + $0xb0] sm:$0xff] }
  0x9c   : > { %580 = vst.msk [vmem:[#allocation2 + $0xe8] sm:$0xff] %vm567_vm3, %v496_v35  ;;  %746 = vrot.lane.b32.xlu1 %v3077_v34, %s2765_s8  ;;  %748 = vrot.lane.b32.xlu0 %v674_v36, %s2765_s8  ;;  %581 = vst.msk [vmem:[#allocation2 + $0xf0] sm:$0xff] %vm567_vm3, %v498_v37  ;;  %v3088_v38 = vld [vmem:[#allocation2 + $0xa7] sm:$0xff]  ;;  %v3090_v39 = vld [vmem:[#allocation2 + $0xaf] sm:$0xff] }
  0x9d   : > { %642 = vst.msk [vmem:[#allocation3 + $0x50] sm:$0xff] %vm293_vm0, %v3088_v38  ;;  %643 = vst.msk [vmem:[#allocation3 + $0x58] sm:$0xff] %vm293_vm0, %v3090_v39 }
  0x9f   : > { %v500_v41 = vpop.permute.xlu0 %499  ;;  %v676_v42 = vld [vmem:[#allocation2 + $0xc8] sm:$0xff]  ;;  %v502_v43 = vpop.permute.xlu1 %501  ;;  %v677_v46 = vld [vmem:[#allocation2 + $0xd0] sm:$0xff] }
  0xa0   : > { %582 = vst.msk [vmem:[#allocation2 + $0x108] sm:$0xff] %vm567_vm3, %v500_v41  ;;  %750 = vrot.lane.b32.xlu1 %v675_v40, %s2765_s8  ;;  %752 = vrot.lane.b32.xlu0 %v676_v42, %s2765_s8  ;;  %583 = vst.msk [vmem:[#allocation2 + $0x110] sm:$0xff] %vm567_vm3, %v502_v43  ;;  %v3100_v44 = vld [vmem:[#allocation2 + $0xc7] sm:$0xff]  ;;  %v3102_v45 = vld [vmem:[#allocation2 + $0xcf] sm:$0xff] }
  0xa1   : > { %644 = vst.msk [vmem:[#allocation3 + $0x60] sm:$0xff] %vm293_vm0, %v3100_v44  ;;  %645 = vst.msk [vmem:[#allocation3 + $0x68] sm:$0xff] %vm293_vm0, %v3102_v45 }
  0xa3   : > { %v504_v47 = vpop.permute.xlu0 %503  ;;  %v678_v48 = vld [vmem:[#allocation2 + $0xe8] sm:$0xff]  ;;  %v506_v49 = vpop.permute.xlu1 %505  ;;  %v679_v52 = vld [vmem:[#allocation2 + $0xf0] sm:$0xff] }
  0xa4   : > { %584 = vst.msk [vmem:[#allocation2 + $0x128] sm:$0xff] %vm567_vm3, %v504_v47  ;;  %754 = vrot.lane.b32.xlu1 %v677_v46, %s2765_s8  ;;  %756 = vrot.lane.b32.xlu0 %v678_v48, %s2765_s8  ;;  %585 = vst.msk [vmem:[#allocation2 + $0x130] sm:$0xff] %vm567_vm3, %v506_v49  ;;  %v614_v50 = vld [vmem:[#allocation2 + $0xe7] sm:$0xff]  ;;  %v615_v51 = vld [vmem:[#allocation2 + $0xef] sm:$0xff] }
  0xa5   : > { %646 = vst.msk [vmem:[#allocation3 + $0x70] sm:$0xff] %vm293_vm0, %v614_v50  ;;  %647 = vst.msk [vmem:[#allocation3 + $0x78] sm:$0xff] %vm293_vm0, %v615_v51 }
  0xa7   : > { %v508_v53 = vpop.permute.xlu0 %507  ;;  %v680_v54 = vld [vmem:[#allocation2 + $0x108] sm:$0xff]  ;;  %v510_v55 = vpop.permute.xlu1 %509  ;;  %v681_v58 = vld [vmem:[#allocation2 + $0x110] sm:$0xff] }
  0xa8   : > { %586 = vst.msk [vmem:[#allocation2 + $0x148] sm:$0xff] %vm567_vm3, %v508_v53  ;;  %758 = vrot.lane.b32.xlu1 %v679_v52, %s2765_s8  ;;  %760 = vrot.lane.b32.xlu0 %v680_v54, %s2765_s8  ;;  %587 = vst.msk [vmem:[#allocation2 + $0x150] sm:$0xff] %vm567_vm3, %v510_v55  ;;  %v616_v56 = vld [vmem:[#allocation2 + $0x107] sm:$0xff]  ;;  %v617_v57 = vld [vmem:[#allocation2 + $0x10f] sm:$0xff] }
  0xa9   : > { %648 = vst.msk [vmem:[#allocation3 + $0x80] sm:$0xff] %vm293_vm0, %v616_v56  ;;  %649 = vst.msk [vmem:[#allocation3 + $0x88] sm:$0xff] %vm293_vm0, %v617_v57  ;;  %v859_v57 = vld [vmem:[#allocation2 + $0x29] sm:$0xff] }
  0xab   : > { %v512_v59 = vpop.permute.xlu0 %511  ;;  %v3120_v60 = vld [vmem:[#allocation2 + $0x128] sm:$0xff]  ;;  %v514_v61 = vpop.permute.xlu1 %513  ;;  %v3131_v0 = vld [vmem:[#allocation2 + $0x130] sm:$0xff] }
  0xac   : > { %588 = vst.msk [vmem:[#allocation2 + $0x168] sm:$0xff] %vm567_vm3, %v512_v59  ;;  %762 = vrot.lane.b32.xlu1 %v681_v58, %s2765_s8  ;;  %764 = vrot.lane.b32.xlu0 %v3120_v60, %s2765_s8  ;;  %589 = vst.msk [vmem:[#allocation2 + $0x170] sm:$0xff] %vm567_vm3, %v514_v61  ;;  %v3127_v62 = vld [vmem:[#allocation2 + $0x127] sm:$0xff]  ;;  %v3129_v63 = vld [vmem:[#allocation2 + $0x12f] sm:$0xff] }
  0xad   : > { %650 = vst.msk [vmem:[#allocation3 + $0x90] sm:$0xff] %vm293_vm0, %v3127_v62  ;;  %651 = vst.msk [vmem:[#allocation3 + $0x98] sm:$0xff] %vm293_vm0, %v3129_v63  ;;  %v860_v61 = vld [vmem:[#allocation2 + $0x31] sm:$0xff] }
  0xaf   : > { %v516_v1 = vpop.permute.xlu0 %515  ;;  %v3137_v2 = vld [vmem:[#allocation2 + $0x148] sm:$0xff]  ;;  %v518_v3 = vpop.permute.xlu1 %517  ;;  %v3151_v6 = vld [vmem:[#allocation2 + $0x150] sm:$0xff] }
  0xb0   : > { %v3139_v4 = vld [vmem:[#allocation2 + $0x147] sm:$0xff]  ;;  %590 = vst.msk [vmem:[#allocation2 + $0x188] sm:$0xff] %vm567_vm3, %v516_v1  ;;  %766 = vrot.lane.b32.xlu1 %v3131_v0, %s2765_s8  ;;  %768 = vrot.lane.b32.xlu0 %v3137_v2, %s2765_s8  ;;  %591 = vst.msk [vmem:[#allocation2 + $0x190] sm:$0xff] %vm567_vm3, %v518_v3  ;;  %v3147_v5 = vld [vmem:[#allocation2 + $0x14f] sm:$0xff] }
  0xb1   : > { %652 = vst.msk [vmem:[#allocation3 + $0xa0] sm:$0xff] %vm293_vm0, %v3139_v4  ;;  %653 = vst.msk [vmem:[#allocation3 + $0xa8] sm:$0xff] %vm293_vm0, %v3147_v5  ;;  %v3238_v1 = vld [vmem:[#allocation2 + $0x49] sm:$0xff]  ;;  %v3243_v3 = vld [vmem:[#allocation2 + $0x51] sm:$0xff] }
  0xb3   : > { %v520_v7 = vpop.permute.xlu0 %519  ;;  %v3155_v8 = vld [vmem:[#allocation2 + $0x168] sm:$0xff]  ;;  %v522_v9 = vpop.permute.xlu1 %521  ;;  %v3169_v13 = vld [vmem:[#allocation2 + $0x170] sm:$0xff] }
  0xb4   : > { %v3157_v10 = vld [vmem:[#allocation2 + $0x167] sm:$0xff]  ;;  %592 = vst.msk [vmem:[#allocation2 + $0x1a8] sm:$0xff] %vm567_vm3, %v520_v7  ;;  %770 = vrot.lane.b32.xlu1 %v3151_v6, %s2765_s8  ;;  %772 = vrot.lane.b32.xlu0 %v3155_v8, %s2765_s8  ;;  %593 = vst.msk [vmem:[#allocation2 + $0x1b0] sm:$0xff] %vm567_vm3, %v522_v9  ;;  %v3167_v11 = vld [vmem:[#allocation2 + $0x16f] sm:$0xff] }
  0xb5   : > { %654 = vst.msk [vmem:[#allocation3 + $0xb0] sm:$0xff] %vm293_vm0, %v3157_v10  ;;  %655 = vst.msk [vmem:[#allocation3 + $0xb8] sm:$0xff] %vm293_vm0, %v3167_v11  ;;  %v3245_v7 = vld [vmem:[#allocation2 + $0x69] sm:$0xff]  ;;  %v3251_v9 = vld [vmem:[#allocation2 + $0x71] sm:$0xff] }
  0xb7   : > { %v524_v17 = vpop.permute.xlu0 %523  ;;  %v3173_v19 = vld [vmem:[#allocation2 + $0x188] sm:$0xff]  ;;  %v526_v23 = vpop.permute.xlu1 %525  ;;  %v3187_v31 = vld [vmem:[#allocation2 + $0x190] sm:$0xff] }
  0xb8   : > { %v3175_v25 = vld [vmem:[#allocation2 + $0x187] sm:$0xff]  ;;  %594 = vst.msk [vmem:[#allocation2 + $0x1c8] sm:$0xff] %vm567_vm3, %v524_v17  ;;  %774 = vrot.lane.b32.xlu1 %v3169_v13, %s2765_s8  ;;  %776 = vrot.lane.b32.xlu0 %v3173_v19, %s2765_s8  ;;  %595 = vst.msk [vmem:[#allocation2 + $0x1d0] sm:$0xff] %vm567_vm3, %v526_v23  ;;  %v3185_v29 = vld [vmem:[#allocation2 + $0x18f] sm:$0xff] }
  0xb9   : > { %656 = vst.msk [vmem:[#allocation3 + $0xc0] sm:$0xff] %vm293_vm0, %v3175_v25  ;;  %657 = vst.msk [vmem:[#allocation3 + $0xc8] sm:$0xff] %vm293_vm0, %v3185_v29  ;;  %v3253_v17 = vld [vmem:[#allocation2 + $0x89] sm:$0xff]  ;;  %v3259_v23 = vld [vmem:[#allocation2 + $0x91] sm:$0xff] }
  0xbb   : > { %v528_v35 = vpop.permute.xlu0 %527  ;;  %v3191_v36 = vld [vmem:[#allocation2 + $0x1a8] sm:$0xff]  ;;  %v530_v37 = vpop.permute.xlu1 %529  ;;  %v3205_v42 = vld [vmem:[#allocation2 + $0x1b0] sm:$0xff] }
  0xbc   : > { %v3193_v40 = vld [vmem:[#allocation2 + $0x1a7] sm:$0xff]  ;;  %596 = vst.msk [vmem:[#allocation2 + $0x1e8] sm:$0xff] %vm567_vm3, %v528_v35  ;;  %778 = vrot.lane.b32.xlu1 %v3187_v31, %s2765_s8  ;;  %780 = vrot.lane.b32.xlu0 %v3191_v36, %s2765_s8  ;;  %597 = vst.msk [vmem:[#allocation2 + $0x1f0] sm:$0xff] %vm567_vm3, %v530_v37  ;;  %v3203_v41 = vld [vmem:[#allocation2 + $0x1af] sm:$0xff] }
  0xbd   : > { %658 = vst.msk [vmem:[#allocation3 + $0xd0] sm:$0xff] %vm293_vm0, %v3193_v40  ;;  %659 = vst.msk [vmem:[#allocation3 + $0xd8] sm:$0xff] %vm293_vm0, %v3203_v41  ;;  %v3261_v35 = vld [vmem:[#allocation2 + $0xa9] sm:$0xff]  ;;  %v3267_v37 = vld [vmem:[#allocation2 + $0xb1] sm:$0xff] }
  0xbf   : > { %v692_v43 = vld [vmem:[#allocation2 + $0x1c8] sm:$0xff]  ;;  %v532_v46 = vpop.permute.xlu0 %531  ;;  %v534_v47 = vpop.permute.xlu1 %533  ;;  %v693_v50 = vld [vmem:[#allocation2 + $0x1d0] sm:$0xff] }
  0xc0   : > { %v3209_v48 = vld [vmem:[#allocation2 + $0x1c7] sm:$0xff]  ;;  %782 = vrot.lane.b32.xlu1 %v3205_v42, %s2765_s8  ;;  %784 = vrot.lane.b32.xlu0 %v692_v43, %s2765_s8  ;;  %598 = vst.msk [vmem:[#allocation2 + $0x208] sm:$0xff] %vm567_vm3, %v532_v46  ;;  %599 = vst.msk [vmem:[#allocation2 + $0x210] sm:$0xff] %vm567_vm3, %v534_v47  ;;  %v3218_v49 = vld [vmem:[#allocation2 + $0x1cf] sm:$0xff] }
  0xc1   : > { %660 = vst.msk [vmem:[#allocation3 + $0xe0] sm:$0xff] %vm293_vm0, %v3209_v48  ;;  %661 = vst.msk [vmem:[#allocation3 + $0xe8] sm:$0xff] %vm293_vm0, %v3218_v49  ;;  %v869_v43 = vld [vmem:[#allocation2 + $0xc9] sm:$0xff]  ;;  %v870_v46 = vld [vmem:[#allocation2 + $0xd1] sm:$0xff] }
  0xc2   : > { %v871_v47 = vld [vmem:[#allocation2 + $0xe9] sm:$0xff] }
  0xc3   : > { %v694_v51 = vld [vmem:[#allocation2 + $0x1e8] sm:$0xff]  ;;  %v729_v52 = vpop.permute.xlu0 %728  ;;  %v731_v53 = vpop.permute.xlu1 %730  ;;  %v695_v56 = vld [vmem:[#allocation2 + $0x1f0] sm:$0xff] }
  0xc4   : > { %v3222_v54 = vld [vmem:[#allocation2 + $0x1e7] sm:$0xff]  ;;  %786 = vrot.lane.b32.xlu1 %v693_v50, %s2765_s8  ;;  %788 = vrot.lane.b32.xlu0 %v694_v51, %s2765_s8  ;;  %825 = vst.msk [vmem:[#allocation3] sm:$0xff] %vm824_vm4, %v729_v52  ;;  %826 = vst.msk [vmem:[#allocation3 + $0x8] sm:$0xff] %vm824_vm4, %v731_v53  ;;  %v3230_v55 = vld [vmem:[#allocation2 + $0x1ef] sm:$0xff] }
  0xc5   : > { %662 = vst.msk [vmem:[#allocation3 + $0xf0] sm:$0xff] %vm293_vm0, %v3222_v54  ;;  %663 = vst.msk [vmem:[#allocation3 + $0xf8] sm:$0xff] %vm293_vm0, %v3230_v55  ;;  %v872_v50 = vld [vmem:[#allocation2 + $0xf1] sm:$0xff]  ;;  %v873_v51 = vld [vmem:[#allocation2 + $0x109] sm:$0xff] }
  0xc6   : > { %v874_v52 = vld [vmem:[#allocation2 + $0x111] sm:$0xff]  ;;  %v875_v53 = vld [vmem:[#allocation2 + $0x129] sm:$0xff] }
  0xc7   : > { %v922_v58 = vpop.permute.xlu0 %921  ;;  %v924_v59 = vpop.permute.xlu1 %923 }
  0xc8   : > { %790 = vrot.lane.b32.xlu1 %v695_v56, %s2765_s8  ;;  %925 = vrot.lane.b32.xlu0 %v859_v57, %s2766_s9  ;;  %1018 = vst.msk [vmem:[#allocation3] sm:$0xff] %vm1017_vm5, %v922_v58  ;;  %1019 = vst.msk [vmem:[#allocation3 + $0x8] sm:$0xff] %vm1017_vm5, %v924_v59  ;;  %v876_v56 = vld [vmem:[#allocation2 + $0x131] sm:$0xff]  ;;  %s292_s8 = scalar_lea.vmem %s3955_s6, %s2581_s26 }
  0xcc   : > { %927 = vrot.lane.b32.xlu1 %v860_v61, %s2766_s9  ;;  %929 = vrot.lane.b32.xlu0 %v3238_v1, %s2766_s9 }
  0xd0   : > { %931 = vrot.lane.b32.xlu1 %v3243_v3, %s2766_s9  ;;  %933 = vrot.lane.b32.xlu0 %v3245_v7, %s2766_s9 }
  0xd4   : > { %935 = vrot.lane.b32.xlu1 %v3251_v9, %s2766_s9  ;;  %937 = vrot.lane.b32.xlu0 %v3253_v17, %s2766_s9 }
  0xd8   : > { %939 = vrot.lane.b32.xlu1 %v3259_v23, %s2766_s9  ;;  %941 = vrot.lane.b32.xlu0 %v3261_v35, %s2766_s9 }
  0xdc   : > { %943 = vrot.lane.b32.xlu1 %v3267_v37, %s2766_s9  ;;  %945 = vrot.lane.b32.xlu0 %v869_v43, %s2766_s9 }
  0xe0   : > { %947 = vrot.lane.b32.xlu1 %v870_v46, %s2766_s9  ;;  %949 = vrot.lane.b32.xlu0 %v871_v47, %s2766_s9  ;;  %v3332_v47 = vld [vmem:[#allocation2 + $0x151] sm:$0xff] }
  0xe4   : > { %951 = vrot.lane.b32.xlu1 %v872_v50, %s2766_s9  ;;  %953 = vrot.lane.b32.xlu0 %v873_v51, %s2766_s9 }
  0xe8   : > { %955 = vrot.lane.b32.xlu1 %v874_v52, %s2766_s9  ;;  %957 = vrot.lane.b32.xlu0 %v875_v53, %s2766_s9 }
  0xec   : > { %959 = vrot.lane.b32.xlu1 %v876_v56, %s2766_s9  ;;  %1146 = vrot.lane.b32.xlu0 %v3127_v62, %s2767_s10 }
  0xf0   : > { %1148 = vrot.lane.b32.xlu1 %v3129_v63, %s2767_s10  ;;  %1114 = vrot.lane.b32.xlu0 %v3015_v14, %s2767_s10 }
  0xf4   : > { %1116 = vrot.lane.b32.xlu1 %v3039_v21, %s2767_s10  ;;  %1339 = vrot.lane.b32.xlu0 %v3120_v60, %s2768_s11 }
  0xf8   : > { %1341 = vrot.lane.b32.xlu1 %v3131_v0, %s2768_s11  ;;  %1307 = vrot.lane.b32.xlu0 %v3013_v12, %s2768_s11 }
  0xfc   : > { %1309 = vrot.lane.b32.xlu1 %v3029_v18, %s2768_s11  ;;  %1532 = vrot.lane.b32.xlu0 %v875_v53, %s2769_s12 }
  0xfe   : > { %v733_v14 = vpop.permute.xlu0 %732 }
  0xff   : > { %827 = vst.msk [vmem:[#allocation3 + $0x10] sm:$0xff] %vm824_vm4, %v733_v14 }
 0x100   : > { %1534 = vrot.lane.b32.xlu1 %v876_v56, %s2769_s12  ;;  %1500 = vrot.lane.b32.xlu0 %v859_v57, %s2769_s12 }
 0x102   : > { %v735_v21 = vpop.permute.xlu1 %734  ;;  %v737_v60 = vpop.permute.xlu0 %736 }
 0x103   : > { %828 = vst.msk [vmem:[#allocation3 + $0x18] sm:$0xff] %vm824_vm4, %v735_v21  ;;  %829 = vst.msk [vmem:[#allocation3 + $0x20] sm:$0xff] %vm824_vm4, %v737_v60 }
 0x104   : > { %1502 = vrot.lane.b32.xlu1 %v860_v61, %s2769_s12  ;;  %1726 = vrot.lane.b32.xlu0 %v3139_v4, %s2770_s13  ;;  %v3324_v61 = vld [vmem:[#allocation2 + $0x149] sm:$0xff] }
 0x106   : > { %v739_v12 = vpop.permute.xlu1 %738  ;;  %v741_v18 = vpop.permute.xlu0 %740 }
 0x107   : > { %830 = vst.msk [vmem:[#allocation3 + $0x28] sm:$0xff] %vm824_vm4, %v739_v12  ;;  %831 = vst.msk [vmem:[#allocation3 + $0x30] sm:$0xff] %vm824_vm4, %v741_v18 }
 0x108   : > { %1728 = vrot.lane.b32.xlu1 %v3147_v5, %s2770_s13  ;;  %1694 = vrot.lane.b32.xlu0 %v3023_v15, %s2770_s13 }
 0x10a   : > { %v743_v62 = vpop.permute.xlu1 %742  ;;  %v745_v63 = vpop.permute.xlu0 %744 }
 0x10b   : > { %832 = vst.msk [vmem:[#allocation3 + $0x38] sm:$0xff] %vm824_vm4, %v743_v62  ;;  %833 = vst.msk [vmem:[#allocation3 + $0x40] sm:$0xff] %vm824_vm4, %v745_v63 }
 0x10c   : > { %1696 = vrot.lane.b32.xlu1 %v3041_v22, %s2770_s13  ;;  %1919 = vrot.lane.b32.xlu0 %v3137_v2, %s2771_s14 }
 0x10e   : > { %v747_v0 = vpop.permute.xlu1 %746  ;;  %v749_v57 = vpop.permute.xlu0 %748 }
 0x10f   : > { %834 = vst.msk [vmem:[#allocation3 + $0x48] sm:$0xff] %vm824_vm4, %v747_v0  ;;  %835 = vst.msk [vmem:[#allocation3 + $0x50] sm:$0xff] %vm824_vm4, %v749_v57  ;;  %v3400_v0 = vld [vmem:[#allocation2 + $0x169] sm:$0xff] }
 0x110   : > { %1921 = vrot.lane.b32.xlu1 %v3151_v6, %s2771_s14  ;;  %1887 = vrot.lane.b32.xlu0 %v3025_v16, %s2771_s14 }
 0x112   : > { %v751_v58 = vpop.permute.xlu1 %750  ;;  %v753_v59 = vpop.permute.xlu0 %752 }
 0x113   : > { %836 = vst.msk [vmem:[#allocation3 + $0x58] sm:$0xff] %vm824_vm4, %v751_v58  ;;  %837 = vst.msk [vmem:[#allocation3 + $0x60] sm:$0xff] %vm824_vm4, %v753_v59  ;;  %v3408_v59 = vld [vmem:[#allocation2 + $0x171] sm:$0xff] }
 0x114   : > { %1889 = vrot.lane.b32.xlu1 %v3037_v20, %s2771_s14  ;;  %2112 = vrot.lane.b32.xlu0 %v3324_v61, %s2772_s15 }
 0x116   : > { %v755_v43 = vpop.permute.xlu1 %754  ;;  %v757_v46 = vpop.permute.xlu0 %756 }
 0x117   : > { %838 = vst.msk [vmem:[#allocation3 + $0x68] sm:$0xff] %vm824_vm4, %v755_v43  ;;  %839 = vst.msk [vmem:[#allocation3 + $0x70] sm:$0xff] %vm824_vm4, %v757_v46 }
 0x118   : > { %2114 = vrot.lane.b32.xlu1 %v3332_v47, %s2772_s15  ;;  %2080 = vrot.lane.b32.xlu0 %v3238_v1, %s2772_s15 }
 0x11a   : > { %v759_v50 = vpop.permute.xlu1 %758  ;;  %v761_v51 = vpop.permute.xlu0 %760 }
 0x11b   : > { %840 = vst.msk [vmem:[#allocation3 + $0x78] sm:$0xff] %vm824_vm4, %v759_v50  ;;  %841 = vst.msk [vmem:[#allocation3 + $0x80] sm:$0xff] %vm824_vm4, %v761_v51 }
 0x11c   : > { %2082 = vrot.lane.b32.xlu1 %v3243_v3, %s2772_s15  ;;  %1150 = vrot.lane.b32.xlu0 %v3139_v4, %s2767_s10 }
 0x11e   : > { %v763_v52 = vpop.permute.xlu1 %762  ;;  %v765_v53 = vpop.permute.xlu0 %764 }
 0x11f   : > { %842 = vst.msk [vmem:[#allocation3 + $0x88] sm:$0xff] %vm824_vm4, %v763_v52  ;;  %843 = vst.msk [vmem:[#allocation3 + $0x90] sm:$0xff] %vm824_vm4, %v765_v53 }
 0x120   : > { %1152 = vrot.lane.b32.xlu1 %v3147_v5, %s2767_s10  ;;  %1118 = vrot.lane.b32.xlu0 %v3023_v15, %s2767_s10 }
 0x122   : > { %v767_v56 = vpop.permute.xlu1 %766  ;;  %v769_v14 = vpop.permute.xlu0 %768 }
 0x123   : > { %844 = vst.msk [vmem:[#allocation3 + $0x98] sm:$0xff] %vm824_vm4, %v767_v56  ;;  %845 = vst.msk [vmem:[#allocation3 + $0xa0] sm:$0xff] %vm824_vm4, %v769_v14 }
 0x124   : > { %1120 = vrot.lane.b32.xlu1 %v3041_v22, %s2767_s10  ;;  %1343 = vrot.lane.b32.xlu0 %v3137_v2, %s2768_s11 }
 0x126   : > { %v771_v4 = vpop.permute.xlu1 %770  ;;  %v773_v21 = vpop.permute.xlu0 %772 }
 0x127   : > { %846 = vst.msk [vmem:[#allocation3 + $0xa8] sm:$0xff] %vm824_vm4, %v771_v4  ;;  %847 = vst.msk [vmem:[#allocation3 + $0xb0] sm:$0xff] %vm824_vm4, %v773_v21 }
 0x128   : > { %1345 = vrot.lane.b32.xlu1 %v3151_v6, %s2768_s11  ;;  %1311 = vrot.lane.b32.xlu0 %v3025_v16, %s2768_s11 }
 0x12a   : > { %v775_v15 = vpop.permute.xlu1 %774  ;;  %v777_v5 = vpop.permute.xlu0 %776 }
 0x12b   : > { %848 = vst.msk [vmem:[#allocation3 + $0xb8] sm:$0xff] %vm824_vm4, %v775_v15  ;;  %849 = vst.msk [vmem:[#allocation3 + $0xc0] sm:$0xff] %vm824_vm4, %v777_v5 }
 0x12c   : > { %1313 = vrot.lane.b32.xlu1 %v3037_v20, %s2768_s11  ;;  %1536 = vrot.lane.b32.xlu0 %v3324_v61, %s2769_s12 }
 0x12e   : > { %v779_v22 = vpop.permute.xlu1 %778  ;;  %v781_v2 = vpop.permute.xlu0 %780 }
 0x12f   : > { %850 = vst.msk [vmem:[#allocation3 + $0xc8] sm:$0xff] %vm824_vm4, %v779_v22  ;;  %851 = vst.msk [vmem:[#allocation3 + $0xd0] sm:$0xff] %vm824_vm4, %v781_v2  ;;  %v3482_v22 = vld [vmem:[#allocation2 + $0x189] sm:$0xff] }
 0x130   : > { %1538 = vrot.lane.b32.xlu1 %v3332_v47, %s2769_s12  ;;  %1504 = vrot.lane.b32.xlu0 %v3238_v1, %s2769_s12 }
 0x132   : > { %v783_v16 = vpop.permute.xlu1 %782  ;;  %v785_v6 = vpop.permute.xlu0 %784 }
 0x133   : > { %852 = vst.msk [vmem:[#allocation3 + $0xd8] sm:$0xff] %vm824_vm4, %v783_v16  ;;  %853 = vst.msk [vmem:[#allocation3 + $0xe0] sm:$0xff] %vm824_vm4, %v785_v6 }
 0x134   : > { %1506 = vrot.lane.b32.xlu1 %v3243_v3, %s2769_s12  ;;  %1730 = vrot.lane.b32.xlu0 %v3157_v10, %s2770_s13 }
 0x136   : > { %v787_v20 = vpop.permute.xlu1 %786  ;;  %v789_v60 = vpop.permute.xlu0 %788 }
 0x137   : > { %854 = vst.msk [vmem:[#allocation3 + $0xe8] sm:$0xff] %vm824_vm4, %v787_v20  ;;  %855 = vst.msk [vmem:[#allocation3 + $0xf0] sm:$0xff] %vm824_vm4, %v789_v60 }
 0x138   : > { %1732 = vrot.lane.b32.xlu1 %v3167_v11, %s2770_s13  ;;  %1698 = vrot.lane.b32.xlu0 %v3055_v26, %s2770_s13 }
 0x13a   : > { %v791_v1 = vpop.permute.xlu1 %790  ;;  %v926_v12 = vpop.permute.xlu0 %925 }
 0x13b   : > { %856 = vst.msk [vmem:[#allocation3 + $0xf8] sm:$0xff] %vm824_vm4, %v791_v1 }
 0x13c   : > { %1020 = vst.msk [vmem:[#allocation3 + $0x10] sm:$0xff] %vm1017_vm5, %v926_v12  ;;  %1700 = vrot.lane.b32.xlu1 %v3057_v27, %s2770_s13  ;;  %1923 = vrot.lane.b32.xlu0 %v3155_v8, %s2771_s14 }
 0x13e   : > { %v928_v3 = vpop.permute.xlu1 %927  ;;  %v930_v18 = vpop.permute.xlu0 %929 }
 0x13f   : > { %1021 = vst.msk [vmem:[#allocation3 + $0x18] sm:$0xff] %vm1017_vm5, %v928_v3  ;;  %1022 = vst.msk [vmem:[#allocation3 + $0x20] sm:$0xff] %vm1017_vm5, %v930_v18 }
 0x140   : > { %1925 = vrot.lane.b32.xlu1 %v3169_v13, %s2771_s14  ;;  %1891 = vrot.lane.b32.xlu0 %v3047_v24, %s2771_s14 }
 0x142   : > { %v932_v62 = vpop.permute.xlu1 %931  ;;  %v934_v63 = vpop.permute.xlu0 %933 }
 0x143   : > { %1023 = vst.msk [vmem:[#allocation3 + $0x28] sm:$0xff] %vm1017_vm5, %v932_v62  ;;  %1024 = vst.msk [vmem:[#allocation3 + $0x30] sm:$0xff] %vm1017_vm5, %v934_v63 }
 0x144   : > { %1893 = vrot.lane.b32.xlu1 %v3059_v28, %s2771_s14  ;;  %2116 = vrot.lane.b32.xlu0 %v3400_v0, %s2772_s15 }
 0x146   : > { %v936_v57 = vpop.permute.xlu1 %935  ;;  %v938_v58 = vpop.permute.xlu0 %937 }
 0x147   : > { %1025 = vst.msk [vmem:[#allocation3 + $0x38] sm:$0xff] %vm1017_vm5, %v936_v57  ;;  %1026 = vst.msk [vmem:[#allocation3 + $0x40] sm:$0xff] %vm1017_vm5, %v938_v58  ;;  %v1250_v57 = vld [vmem:[#allocation2 + $0x90] sm:$0xff] }
 0x148   : > { %2118 = vrot.lane.b32.xlu1 %v3408_v59, %s2772_s15  ;;  %2084 = vrot.lane.b32.xlu0 %v3245_v7, %s2772_s15 }
 0x14a   : > { %v940_v43 = vpop.permute.xlu1 %939  ;;  %v942_v46 = vpop.permute.xlu0 %941 }
 0x14b   : > { %1027 = vst.msk [vmem:[#allocation3 + $0x48] sm:$0xff] %vm1017_vm5, %v940_v43  ;;  %1028 = vst.msk [vmem:[#allocation3 + $0x50] sm:$0xff] %vm1017_vm5, %v942_v46 }
 0x14c   : > { %2086 = vrot.lane.b32.xlu1 %v3251_v9, %s2772_s15  ;;  %961 = vrot.lane.b32.xlu0 %v3324_v61, %s2766_s9 }
 0x14e   : > { %v944_v50 = vpop.permute.xlu1 %943  ;;  %v946_v51 = vpop.permute.xlu0 %945 }
 0x14f   : > { %1029 = vst.msk [vmem:[#allocation3 + $0x58] sm:$0xff] %vm1017_vm5, %v944_v50  ;;  %1030 = vst.msk [vmem:[#allocation3 + $0x60] sm:$0xff] %vm1017_vm5, %v946_v51 }
 0x150   : > { %963 = vrot.lane.b32.xlu1 %v3332_v47, %s2766_s9  ;;  %1154 = vrot.lane.b32.xlu0 %v3157_v10, %s2767_s10 }
 0x152   : > { %v948_v52 = vpop.permute.xlu1 %947  ;;  %v950_v53 = vpop.permute.xlu0 %949 }
 0x153   : > { %1031 = vst.msk [vmem:[#allocation3 + $0x68] sm:$0xff] %vm1017_vm5, %v948_v52  ;;  %1032 = vst.msk [vmem:[#allocation3 + $0x70] sm:$0xff] %vm1017_vm5, %v950_v53 }
 0x154   : > { %1156 = vrot.lane.b32.xlu1 %v3167_v11, %s2767_s10  ;;  %1122 = vrot.lane.b32.xlu0 %v3055_v26, %s2767_s10 }
 0x156   : > { %v952_v61 = vpop.permute.xlu1 %951  ;;  %v954_v56 = vpop.permute.xlu0 %953 }
 0x157   : > { %1033 = vst.msk [vmem:[#allocation3 + $0x78] sm:$0xff] %vm1017_vm5, %v952_v61  ;;  %1034 = vst.msk [vmem:[#allocation3 + $0x80] sm:$0xff] %vm1017_vm5, %v954_v56 }
 0x158   : > { %1124 = vrot.lane.b32.xlu1 %v3057_v27, %s2767_s10  ;;  %1347 = vrot.lane.b32.xlu0 %v3155_v8, %s2768_s11 }
 0x15a   : > { %v956_v10 = vpop.permute.xlu1 %955  ;;  %v958_v47 = vpop.permute.xlu0 %957 }
 0x15b   : > { %1035 = vst.msk [vmem:[#allocation3 + $0x88] sm:$0xff] %vm1017_vm5, %v956_v10  ;;  %1036 = vst.msk [vmem:[#allocation3 + $0x90] sm:$0xff] %vm1017_vm5, %v958_v47  ;;  %v1829_v47 = vld [vmem:[#allocation2 + $0xa8] sm:$0xff] }
 0x15c   : > { %1349 = vrot.lane.b32.xlu1 %v3169_v13, %s2768_s11  ;;  %1315 = vrot.lane.b32.xlu0 %v3047_v24, %s2768_s11 }
 0x15e   : > { %v960_v26 = vpop.permute.xlu1 %959  ;;  %v1147_v11 = vpop.permute.xlu0 %1146 }
 0x15f   : > { %1037 = vst.msk [vmem:[#allocation3 + $0x98] sm:$0xff] %vm1017_vm5, %v960_v26 }
 0x160   : > { %1227 = vst.msk [vmem:[#allocation3 + $0x80] sm:$0xff] %vm1210_vm6, %v1147_v11  ;;  %1317 = vrot.lane.b32.xlu1 %v3059_v28, %s2768_s11  ;;  %1540 = vrot.lane.b32.xlu0 %v3400_v0, %s2769_s12 }
 0x162   : > { %v1149_v27 = vpop.permute.xlu1 %1148  ;;  %v1115_v8 = vpop.permute.xlu0 %1114 }
 0x163   : > { %1228 = vst.msk [vmem:[#allocation3 + $0x88] sm:$0xff] %vm1210_vm6, %v1149_v27  ;;  %1211 = vst.msk [vmem:[#allocation3] sm:$0xff] %vm1210_vm6, %v1115_v8  ;;  %v1830_v27 = vld [vmem:[#allocation2 + $0xb0] sm:$0xff] }
 0x164   : > { %1542 = vrot.lane.b32.xlu1 %v3408_v59, %s2769_s12  ;;  %1508 = vrot.lane.b32.xlu0 %v3245_v7, %s2769_s12 }
 0x166   : > { %v1117_v24 = vpop.permute.xlu1 %1116  ;;  %v1340_v13 = vpop.permute.xlu0 %1339 }
 0x167   : > { %1212 = vst.msk [vmem:[#allocation3 + $0x8] sm:$0xff] %vm1210_vm6, %v1117_v24 }
 0x168   : > { %1420 = vst.msk [vmem:[#allocation3 + $0x80] sm:$0xff] %vm1403_vm7, %v1340_v13  ;;  %1510 = vrot.lane.b32.xlu1 %v3251_v9, %s2769_s12  ;;  %1734 = vrot.lane.b32.xlu0 %v3175_v25, %s2770_s13 }
 0x16a   : > { %v1342_v28 = vpop.permute.xlu1 %1341  ;;  %v1308_v14 = vpop.permute.xlu0 %1307 }
 0x16b   : > { %1421 = vst.msk [vmem:[#allocation3 + $0x88] sm:$0xff] %vm1403_vm7, %v1342_v28  ;;  %1404 = vst.msk [vmem:[#allocation3] sm:$0xff] %vm1403_vm7, %v1308_v14 }
 0x16c   : > { %1736 = vrot.lane.b32.xlu1 %v3185_v29, %s2770_s13  ;;  %1702 = vrot.lane.b32.xlu0 %v3073_v32, %s2770_s13 }
 0x16e   : > { %v1310_v7 = vpop.permute.xlu1 %1309  ;;  %v1533_v4 = vpop.permute.xlu0 %1532 }
 0x16f   : > { %1405 = vst.msk [vmem:[#allocation3 + $0x8] sm:$0xff] %vm1403_vm7, %v1310_v7 }
 0x170   : > { %1613 = vst.msk [vmem:[#allocation3 + $0x80] sm:$0xff] %vm1596_vm8, %v1533_v4  ;;  %1704 = vrot.lane.b32.xlu1 %v3075_v33, %s2770_s13  ;;  %1927 = vrot.lane.b32.xlu0 %v3173_v19, %s2771_s14 }
 0x172   : > { %v1535_v9 = vpop.permute.xlu1 %1534  ;;  %v1501_v21 = vpop.permute.xlu0 %1500 }
 0x173   : > { %1614 = vst.msk [vmem:[#allocation3 + $0x88] sm:$0xff] %vm1596_vm8, %v1535_v9  ;;  %1597 = vst.msk [vmem:[#allocation3] sm:$0xff] %vm1596_vm8, %v1501_v21  ;;  %v1267_v21 = vld [vmem:[#allocation2 + $0x1a8] sm:$0xff] }
 0x174   : > { %1929 = vrot.lane.b32.xlu1 %v3187_v31, %s2771_s14  ;;  %1895 = vrot.lane.b32.xlu0 %v3065_v30, %s2771_s14  ;;  %v3490_v30 = vld [vmem:[#allocation2 + $0x191] sm:$0xff] }
 0x176   : > { %v1503_v15 = vpop.permute.xlu1 %1502  ;;  %v1727_v5 = vpop.permute.xlu0 %1726 }
 0x177   : > { %1598 = vst.msk [vmem:[#allocation3 + $0x8] sm:$0xff] %vm1596_vm8, %v1503_v15 }
 0x178   : > { %1807 = vst.msk [vmem:[#allocation3 + $0x80] sm:$0xff] %vm1790_vm9, %v1727_v5  ;;  %1897 = vrot.lane.b32.xlu1 %v3077_v34, %s2771_s14  ;;  %2120 = vrot.lane.b32.xlu0 %v3482_v22, %s2772_s15 }
 0x17a   : > { %v1729_v2 = vpop.permute.xlu1 %1728  ;;  %v1695_v16 = vpop.permute.xlu0 %1694 }
 0x17b   : > { %1808 = vst.msk [vmem:[#allocation3 + $0x88] sm:$0xff] %vm1790_vm9, %v1729_v2  ;;  %1791 = vst.msk [vmem:[#allocation3] sm:$0xff] %vm1790_vm9, %v1695_v16 }
 0x17c   : > { %2122 = vrot.lane.b32.xlu1 %v3490_v30, %s2772_s15  ;;  %2088 = vrot.lane.b32.xlu0 %v3253_v17, %s2772_s15 }
 0x17e   : > { %v1697_v6 = vpop.permute.xlu1 %1696  ;;  %v1920_v34 = vpop.permute.xlu0 %1919 }
 0x17f   : > { %1792 = vst.msk [vmem:[#allocation3 + $0x8] sm:$0xff] %vm1790_vm9, %v1697_v6 }
 0x180   : > { %2000 = vst.msk [vmem:[#allocation3 + $0x80] sm:$0xff] %vm1983_vm10, %v1920_v34  ;;  %2090 = vrot.lane.b32.xlu1 %v3259_v23, %s2772_s15  ;;  %965 = vrot.lane.b32.xlu0 %v3400_v0, %s2766_s9 }
 0x182   : > { %v1922_v20 = vpop.permute.xlu1 %1921  ;;  %v1888_v60 = vpop.permute.xlu0 %1887 }
 0x183   : > { %2001 = vst.msk [vmem:[#allocation3 + $0x88] sm:$0xff] %vm1983_vm10, %v1922_v20  ;;  %1984 = vst.msk [vmem:[#allocation3] sm:$0xff] %vm1983_vm10, %v1888_v60  ;;  %v1444_v60 = vld [vmem:[#allocation2 + $0xa9] sm:$0xff] }
 0x184   : > { %967 = vrot.lane.b32.xlu1 %v3408_v59, %s2766_s9  ;;  %1158 = vrot.lane.b32.xlu0 %v3175_v25, %s2767_s10 }
 0x186   : > { %v1890_v1 = vpop.permute.xlu1 %1889  ;;  %v2113_v12 = vpop.permute.xlu0 %2112 }
 0x187   : > { %1985 = vst.msk [vmem:[#allocation3 + $0x8] sm:$0xff] %vm1983_vm10, %v1890_v1 }
 0x188   : > { %2193 = vst.msk [vmem:[#allocation3 + $0x80] sm:$0xff] %vm2176_vm11, %v2113_v12  ;;  %1160 = vrot.lane.b32.xlu1 %v3185_v29, %s2767_s10  ;;  %1126 = vrot.lane.b32.xlu0 %v3073_v32, %s2767_s10  ;;  %v1249_v29 = vld [vmem:[#allocation2 + $0x88] sm:$0xff] }
 0x18a   : > { %v2115_v3 = vpop.permute.xlu1 %2114  ;;  %v2081_v18 = vpop.permute.xlu0 %2080 }
 0x18b   : > { %2194 = vst.msk [vmem:[#allocation3 + $0x88] sm:$0xff] %vm2176_vm11, %v2115_v3  ;;  %2177 = vst.msk [vmem:[#allocation3] sm:$0xff] %vm2176_vm11, %v2081_v18  ;;  %v1445_v3 = vld [vmem:[#allocation2 + $0xb1] sm:$0xff] }
 0x18c   : > { %1128 = vrot.lane.b32.xlu1 %v3075_v33, %s2767_s10  ;;  %1351 = vrot.lane.b32.xlu0 %v3173_v19, %s2768_s11 }
 0x18e   : > { %v2083_v25 = vpop.permute.xlu1 %2082  ;;  %v1151_v62 = vpop.permute.xlu0 %1150 }
 0x18f   : > { %2178 = vst.msk [vmem:[#allocation3 + $0x8] sm:$0xff] %vm2176_vm11, %v2083_v25  ;;  %v2226_v0 = vld [vmem:[#allocation3 + $0x80] sm:$0xff] }
 0x190   : > { %1229 = vst.msk [vmem:[#allocation3 + $0x90] sm:$0xff] %vm1210_vm6, %v1151_v62  ;;  %1353 = vrot.lane.b32.xlu1 %v3187_v31, %s2768_s11  ;;  %1319 = vrot.lane.b32.xlu0 %v1249_v29, %s2768_s11 }
 0x192   : > { %v1153_v32 = vpop.permute.xlu1 %1152  ;;  %v1119_v63 = vpop.permute.xlu0 %1118  ;;  %v2227_v33 = vld [vmem:[#allocation3 + $0x88] sm:$0xff]  ;;  %v2210_v43 = vld [vmem:[#allocation3] sm:$0xff] }
 0x193   : > { %1230 = vst.msk [vmem:[#allocation3 + $0x98] sm:$0xff] %vm1210_vm6, %v1153_v32  ;;  %1213 = vst.msk [vmem:[#allocation3 + $0x10] sm:$0xff] %vm1210_vm6, %v1119_v63  ;;  %v2686_v58 = vpack.c.bf16 %v2227_v33, %v2226_v0  ;;  %v1847_v32 = vld [vmem:[#allocation2 + $0x1c8] sm:$0xff]  ;;  %v1848_v33 = vld [vmem:[#allocation2 + $0x1d0] sm:$0xff] }
 0x194   : > { %1321 = vrot.lane.b32.xlu1 %v1250_v57, %s2768_s11  ;;  %1544 = vrot.lane.b32.xlu0 %v3482_v22, %s2769_s12  ;;  %v1831_v57 = vld [vmem:[#allocation2 + $0xc8] sm:$0xff] }
 0x195   : > { %2688 = vmatprep.subr.msk.bf16.mxu0 %vm3527_vm13, %v2686_v58 }
 0x196   : > { %v1121_v31 = vpop.permute.xlu1 %1120  ;;  %v1344_v59 = vpop.permute.xlu0 %1343  ;;  %v2211_v46 = vld [vmem:[#allocation3 + $0x8] sm:$0xff] }
 0x197   : > { %1214 = vst.msk [vmem:[#allocation3 + $0x18] sm:$0xff] %vm1210_vm6, %v1121_v31  ;;  %v2689_v50 = vpack.c.bf16 %v2211_v46, %v2210_v43  ;;  %v3647_v43 = vld [vmem:[#allocation2 + $0x1c9] sm:$0xff] }
 0x198   : > { %1422 = vst.msk [vmem:[#allocation3 + $0x90] sm:$0xff] %vm1403_vm7, %v1344_v59  ;;  %1546 = vrot.lane.b32.xlu1 %v3490_v30, %s2769_s12  ;;  %1512 = vrot.lane.b32.xlu0 %v3253_v17, %s2769_s12  ;;  %v1832_v59 = vld [vmem:[#allocation2 + $0xd0] sm:$0xff] }
 0x199   : > { %2691 = vmatpush3.bf16.xpose.msk.msra.mxu0 %vm3527_vm13, %v2689_v50 }
 0x19a   : > { %v1346_v51 = vpop.permute.xlu1 %1345  ;;  %v1312_v52 = vpop.permute.xlu0 %1311 }
 0x19b   : > { %1423 = vst.msk [vmem:[#allocation3 + $0x98] sm:$0xff] %vm1403_vm7, %v1346_v51  ;;  %1406 = vst.msk [vmem:[#allocation3 + $0x10] sm:$0xff] %vm1403_vm7, %v1312_v52  ;;  %v3654_v51 = vld [vmem:[#allocation2 + $0x1d1] sm:$0xff]  ;;  %v2024_v52 = vld [vmem:[#allocation2 + $0xc9] sm:$0xff] }
 0x19c   : > { %1514 = vrot.lane.b32.xlu1 %v3259_v23, %s2769_s12  ;;  %1738 = vrot.lane.b32.xlu0 %v3193_v40, %s2770_s13 }
 0x19e   : > { %v1314_v53 = vpop.permute.xlu1 %1313  ;;  %v1537_v61 = vpop.permute.xlu0 %1536 }
 0x19f   : > { %1407 = vst.msk [vmem:[#allocation3 + $0x18] sm:$0xff] %vm1403_vm7, %v1314_v53 }
 0x1a0   : > { %1615 = vst.msk [vmem:[#allocation3 + $0x90] sm:$0xff] %vm1596_vm8, %v1537_v61  ;;  %1740 = vrot.lane.b32.xlu1 %v3203_v41, %s2770_s13  ;;  %1706 = vrot.lane.b32.xlu0 %v3088_v38, %s2770_s13 }
 0x1a2   : > { %v1539_v17 = vpop.permute.xlu1 %1538  ;;  %v1505_v56 = vpop.permute.xlu0 %1504 }
 0x1a3   : > { %1616 = vst.msk [vmem:[#allocation3 + $0x98] sm:$0xff] %vm1596_vm8, %v1539_v17  ;;  %1599 = vst.msk [vmem:[#allocation3 + $0x10] sm:$0xff] %vm1596_vm8, %v1505_v56  ;;  %v2025_v17 = vld [vmem:[#allocation2 + $0xd1] sm:$0xff] }
 0x1a4   : > { %1708 = vrot.lane.b32.xlu1 %v3090_v39, %s2770_s13  ;;  %1931 = vrot.lane.b32.xlu0 %v3191_v36, %s2771_s14  ;;  %v3571_v36 = vld [vmem:[#allocation2 + $0x1a9] sm:$0xff] }
 0x1a6   : > { %v1507_v23 = vpop.permute.xlu1 %1506  ;;  %v1731_v10 = vpop.permute.xlu0 %1730 }
 0x1a7   : > { %1600 = vst.msk [vmem:[#allocation3 + $0x18] sm:$0xff] %vm1596_vm8, %v1507_v23 }
 0x1a8   : > { %1809 = vst.msk [vmem:[#allocation3 + $0x90] sm:$0xff] %vm1790_vm9, %v1731_v10  ;;  %1933 = vrot.lane.b32.xlu1 %v3205_v42, %s2771_s14  ;;  %1899 = vrot.lane.b32.xlu0 %v1829_v47, %s2771_s14  ;;  %v3578_v42 = vld [vmem:[#allocation2 + $0x1b1] sm:$0xff] }
 0x1aa   : > { %v1733_v26 = vpop.permute.xlu1 %1732  ;;  %v1699_v11 = vpop.permute.xlu0 %1698 }
 0x1ab   : > { %1810 = vst.msk [vmem:[#allocation3 + $0x98] sm:$0xff] %vm1790_vm9, %v1733_v26  ;;  %1793 = vst.msk [vmem:[#allocation3 + $0x10] sm:$0xff] %vm1790_vm9, %v1699_v11 }
 0x1ac   : > { %1901 = vrot.lane.b32.xlu1 %v1830_v27, %s2771_s14  ;;  %2124 = vrot.lane.b32.xlu0 %v3571_v36, %s2772_s15 }
 0x1ae   : > { %v1701_v8 = vpop.permute.xlu1 %1700  ;;  %v1924_v24 = vpop.permute.xlu0 %1923 }
 0x1af   : > { %1794 = vst.msk [vmem:[#allocation3 + $0x18] sm:$0xff] %vm1790_vm9, %v1701_v8 }
 0x1b0   : > { %2002 = vst.msk [vmem:[#allocation3 + $0x90] sm:$0xff] %vm1983_vm10, %v1924_v24  ;;  %2126 = vrot.lane.b32.xlu1 %v3578_v42, %s2772_s15  ;;  %2092 = vrot.lane.b32.xlu0 %v3261_v35, %s2772_s15 }
 0x1b2   : > { %v1926_v13 = vpop.permute.xlu1 %1925  ;;  %v1892_v28 = vpop.permute.xlu0 %1891 }
 0x1b3   : > { %2003 = vst.msk [vmem:[#allocation3 + $0x98] sm:$0xff] %vm1983_vm10, %v1926_v13  ;;  %1986 = vst.msk [vmem:[#allocation3 + $0x10] sm:$0xff] %vm1983_vm10, %v1892_v28 }
 0x1b4   : > { %2094 = vrot.lane.b32.xlu1 %v3267_v37, %s2772_s15  ;;  %969 = vrot.lane.b32.xlu0 %v3482_v22, %s2766_s9 }
 0x1b6   : > { %v1894_v14 = vpop.permute.xlu1 %1893  ;;  %v2117_v7 = vpop.permute.xlu0 %2116 }
 0x1b7   : > { %1987 = vst.msk [vmem:[#allocation3 + $0x18] sm:$0xff] %vm1983_vm10, %v1894_v14 }
 0x1b8   : > { %2195 = vst.msk [vmem:[#allocation3 + $0x90] sm:$0xff] %vm2176_vm11, %v2117_v7  ;;  %971 = vrot.lane.b32.xlu1 %v3490_v30, %s2766_s9  ;;  %1162 = vrot.lane.b32.xlu0 %v3193_v40, %s2767_s10 }
 0x1ba   : > { %v2119_v35 = vpop.permute.xlu1 %2118  ;;  %v2085_v4 = vpop.permute.xlu0 %2084 }
 0x1bb   : > { %2196 = vst.msk [vmem:[#allocation3 + $0x98] sm:$0xff] %vm2176_vm11, %v2119_v35  ;;  %2179 = vst.msk [vmem:[#allocation3 + $0x10] sm:$0xff] %vm2176_vm11, %v2085_v4 }
 0x1bc   : > { %1164 = vrot.lane.b32.xlu1 %v3203_v41, %s2767_s10  ;;  %1130 = vrot.lane.b32.xlu0 %v3088_v38, %s2767_s10  ;;  %v1268_v38 = vld [vmem:[#allocation2 + $0x1b0] sm:$0xff] }
 0x1be   : > { %v2087_v37 = vpop.permute.xlu1 %2086  ;;  %v962_v9 = vpop.permute.xlu0 %961 }
 0x1bf   : > { %2180 = vst.msk [vmem:[#allocation3 + $0x18] sm:$0xff] %vm2176_vm11, %v2087_v37  ;;  %v2228_v5 = vld [vmem:[#allocation3 + $0x90] sm:$0xff] }
 0x1c0   : > { %1038 = vst.msk [vmem:[#allocation3 + $0xa0] sm:$0xff] %vm1017_vm5, %v962_v9  ;;  %1132 = vrot.lane.b32.xlu1 %v3090_v39, %s2767_s10  ;;  %1355 = vrot.lane.b32.xlu0 %v1267_v21, %s2768_s11  ;;  %v1640_v9 = vld [vmem:[#allocation2 + $0xe7] sm:$0xff] }
 0x1c2   : > { %v964_v40 = vpop.permute.xlu1 %963  ;;  %v1155_v15 = vpop.permute.xlu0 %1154  ;;  %v2229_v22 = vld [vmem:[#allocation3 + $0x98] sm:$0xff]  ;;  %v2212_v16 = vld [vmem:[#allocation3 + $0x10] sm:$0xff] }
 0x1c3   : > { %1039 = vst.msk [vmem:[#allocation3 + $0xa8] sm:$0xff] %vm1017_vm5, %v964_v40  ;;  %v2692_v41 = vpack.c.bf16 %v2229_v22, %v2228_v5  ;;  %v1849_v5 = vld [vmem:[#allocation2 + $0x1e8] sm:$0xff] }
 0x1c4   : > { %1231 = vst.msk [vmem:[#allocation3 + $0xa0] sm:$0xff] %vm1210_vm6, %v1155_v15  ;;  %1357 = vrot.lane.b32.xlu1 %v1268_v38, %s2768_s11  ;;  %1323 = vrot.lane.b32.xlu0 %v1829_v47, %s2768_s11  ;;  %v1641_v15 = vld [vmem:[#allocation2 + $0xef] sm:$0xff] }
 0x1c5   : > { %2694 = vmatprep.subr.msk.bf16.mxu0 %vm3527_vm13, %v2692_v41  ;;  %v1850_v41 = vld [vmem:[#allocation2 + $0x1f0] sm:$0xff] }
 0x1c6   : > { %v1157_v39 = vpop.permute.xlu1 %1156  ;;  %v1123_v2 = vpop.permute.xlu0 %1122  ;;  %v2213_v30 = vld [vmem:[#allocation3 + $0x18] sm:$0xff] }
 0x1c7   : > { %1232 = vst.msk [vmem:[#allocation3 + $0xa8] sm:$0xff] %vm1210_vm6, %v1157_v39  ;;  %1215 = vst.msk [vmem:[#allocation3 + $0x20] sm:$0xff] %vm1210_vm6, %v1123_v2  ;;  %v2695_v6 = vpack.c.bf16 %v2213_v30, %v2212_v16  ;;  %v1833_v39 = vld [vmem:[#allocation2 + $0xe8] sm:$0xff]  ;;  %v1834_v30 = vld [vmem:[#allocation2 + $0xf0] sm:$0xff] }
 0x1c8   : > { %1325 = vrot.lane.b32.xlu1 %v1830_v27, %s2768_s11  ;;  %1548 = vrot.lane.b32.xlu0 %v3571_v36, %s2769_s12 }
 0x1c9   : > { %2697 = vmatpush3.bf16.xpose.msk.msra.mxu0 %vm3527_vm13, %v2695_v6  ;;  %v3719_v6 = vld [vmem:[#allocation2 + $0x1e9] sm:$0xff] }
 0x1ca   : > { %v1125_v34 = vpop.permute.xlu1 %1124  ;;  %v1348_v20 = vpop.permute.xlu0 %1347 }
 0x1cb   : > { %1216 = vst.msk [vmem:[#allocation3 + $0x28] sm:$0xff] %vm1210_vm6, %v1125_v34 }
 0x1cc   : > { %1424 = vst.msk [vmem:[#allocation3 + $0xa0] sm:$0xff] %vm1403_vm7, %v1348_v20  ;;  %1550 = vrot.lane.b32.xlu1 %v3578_v42, %s2769_s12  ;;  %1516 = vrot.lane.b32.xlu0 %v1444_v60, %s2769_s12  ;;  %v3726_v60 = vld [vmem:[#allocation2 + $0x1f1] sm:$0xff] }
 0x1ce   : > { %v1350_v1 = vpop.permute.xlu1 %1349  ;;  %v1316_v12 = vpop.permute.xlu0 %1315 }
 0x1cf   : > { %1425 = vst.msk [vmem:[#allocation3 + $0xa8] sm:$0xff] %vm1403_vm7, %v1350_v1  ;;  %1408 = vst.msk [vmem:[#allocation3 + $0x20] sm:$0xff] %vm1403_vm7, %v1316_v12  ;;  %v2026_v1 = vld [vmem:[#allocation2 + $0xe9] sm:$0xff] }
 0x1d0   : > { %1518 = vrot.lane.b32.xlu1 %v1445_v3, %s2769_s12  ;;  %1742 = vrot.lane.b32.xlu0 %v3209_v48, %s2770_s13 }
 0x1d2   : > { %v1318_v18 = vpop.permute.xlu1 %1317  ;;  %v1541_v25 = vpop.permute.xlu0 %1540 }
 0x1d3   : > { %1409 = vst.msk [vmem:[#allocation3 + $0x28] sm:$0xff] %vm1403_vm7, %v1318_v18  ;;  %v2027_v18 = vld [vmem:[#allocation2 + $0xf1] sm:$0xff] }
 0x1d4   : > { %1617 = vst.msk [vmem:[#allocation3 + $0xa0] sm:$0xff] %vm1596_vm8, %v1541_v25  ;;  %1744 = vrot.lane.b32.xlu1 %v3218_v49, %s2770_s13  ;;  %1710 = vrot.lane.b32.xlu0 %v3100_v44, %s2770_s13 }
 0x1d6   : > { %v1543_v62 = vpop.permute.xlu1 %1542  ;;  %v1509_v29 = vpop.permute.xlu0 %1508 }
 0x1d7   : > { %1618 = vst.msk [vmem:[#allocation3 + $0xa8] sm:$0xff] %vm1596_vm8, %v1543_v62  ;;  %1601 = vst.msk [vmem:[#allocation3 + $0x20] sm:$0xff] %vm1596_vm8, %v1509_v29 }
 0x1d8   : > { %1712 = vrot.lane.b32.xlu1 %v3102_v45, %s2770_s13  ;;  %1935 = vrot.lane.b32.xlu0 %v1847_v32, %s2771_s14 }
 0x1da   : > { %v1511_v63 = vpop.permute.xlu1 %1510  ;;  %v1735_v0 = vpop.permute.xlu0 %1734 }
 0x1db   : > { %1602 = vst.msk [vmem:[#allocation3 + $0x28] sm:$0xff] %vm1596_vm8, %v1511_v63 }
 0x1dc   : > { %1811 = vst.msk [vmem:[#allocation3 + $0xa0] sm:$0xff] %vm1790_vm9, %v1735_v0  ;;  %1937 = vrot.lane.b32.xlu1 %v1848_v33, %s2771_s14  ;;  %1903 = vrot.lane.b32.xlu0 %v1831_v57, %s2771_s14 }
 0x1de   : > { %v1737_v58 = vpop.permute.xlu1 %1736  ;;  %v1703_v31 = vpop.permute.xlu0 %1702 }
 0x1df   : > { %1812 = vst.msk [vmem:[#allocation3 + $0xa8] sm:$0xff] %vm1790_vm9, %v1737_v58  ;;  %1795 = vst.msk [vmem:[#allocation3 + $0x20] sm:$0xff] %vm1790_vm9, %v1703_v31 }
 0x1e0   : > { %1905 = vrot.lane.b32.xlu1 %v1832_v59, %s2771_s14  ;;  %2128 = vrot.lane.b32.xlu0 %v3647_v43, %s2772_s15 }
 0x1e2   : > { %v1705_v46 = vpop.permute.xlu1 %1704  ;;  %v1928_v50 = vpop.permute.xlu0 %1927 }
 0x1e3   : > { %1796 = vst.msk [vmem:[#allocation3 + $0x28] sm:$0xff] %vm1790_vm9, %v1705_v46 }
 0x1e4   : > { %2004 = vst.msk [vmem:[#allocation3 + $0xa0] sm:$0xff] %vm1983_vm10, %v1928_v50  ;;  %2130 = vrot.lane.b32.xlu1 %v3654_v51, %s2772_s15  ;;  %2096 = vrot.lane.b32.xlu0 %v2024_v52, %s2772_s15 }
 0x1e6   : > { %v1930_v53 = vpop.permute.xlu1 %1929  ;;  %v1896_v61 = vpop.permute.xlu0 %1895 }
 0x1e7   : > { %2005 = vst.msk [vmem:[#allocation3 + $0xa8] sm:$0xff] %vm1983_vm10, %v1930_v53  ;;  %1988 = vst.msk [vmem:[#allocation3 + $0x20] sm:$0xff] %vm1983_vm10, %v1896_v61 }
 0x1e8   : > { %2098 = vrot.lane.b32.xlu1 %v2025_v17, %s2772_s15  ;;  %973 = vrot.lane.b32.xlu0 %v3571_v36, %s2766_s9 }
 0x1ea   : > { %v1898_v56 = vpop.permute.xlu1 %1897  ;;  %v2121_v23 = vpop.permute.xlu0 %2120 }
 0x1eb   : > { %1989 = vst.msk [vmem:[#allocation3 + $0x28] sm:$0xff] %vm1983_vm10, %v1898_v56 }
 0x1ec   : > { %2197 = vst.msk [vmem:[#allocation3 + $0xa0] sm:$0xff] %vm2176_vm11, %v2121_v23  ;;  %975 = vrot.lane.b32.xlu1 %v3578_v42, %s2766_s9  ;;  %1166 = vrot.lane.b32.xlu0 %v3209_v48, %s2767_s10 }
 0x1ee   : > { %v2123_v10 = vpop.permute.xlu1 %2122  ;;  %v2089_v47 = vpop.permute.xlu0 %2088 }
 0x1ef   : > { %2198 = vst.msk [vmem:[#allocation3 + $0xa8] sm:$0xff] %vm2176_vm11, %v2123_v10  ;;  %2181 = vst.msk [vmem:[#allocation3 + $0x20] sm:$0xff] %vm2176_vm11, %v2089_v47  ;;  %v1659_v10 = vld [vmem:[#allocation2 + $0x20f] sm:$0xff]  ;;  %v1642_v47 = vld [vmem:[#allocation2 + $0x107] sm:$0xff] }
 0x1f0   : > { %1168 = vrot.lane.b32.xlu1 %v3218_v49, %s2767_s10  ;;  %1134 = vrot.lane.b32.xlu0 %v3100_v44, %s2767_s10 }
 0x1f2   : > { %v2091_v26 = vpop.permute.xlu1 %2090  ;;  %v966_v11 = vpop.permute.xlu0 %965 }
 0x1f3   : > { %2182 = vst.msk [vmem:[#allocation3 + $0x28] sm:$0xff] %vm2176_vm11, %v2091_v26  ;;  %v2230_v36 = vld [vmem:[#allocation3 + $0xa0] sm:$0xff] }
 0x1f4   : > { %1040 = vst.msk [vmem:[#allocation3 + $0xb0] sm:$0xff] %vm1017_vm5, %v966_v11  ;;  %1136 = vrot.lane.b32.xlu1 %v3102_v45, %s2767_s10  ;;  %1359 = vrot.lane.b32.xlu0 %v1847_v32, %s2768_s11 }
 0x1f6   : > { %v968_v48 = vpop.permute.xlu1 %967  ;;  %v1159_v27 = vpop.permute.xlu0 %1158  ;;  %v2231_v8 = vld [vmem:[#allocation3 + $0xa8] sm:$0xff]  ;;  %v2214_v24 = vld [vmem:[#allocation3 + $0x20] sm:$0xff] }
 0x1f7   : > { %1041 = vst.msk [vmem:[#allocation3 + $0xb8] sm:$0xff] %vm1017_vm5, %v968_v48  ;;  %v2698_v44 = vpack.c.bf16 %v2231_v8, %v2230_v36  ;;  %v1643_v48 = vld [vmem:[#allocation2 + $0x10f] sm:$0xff] }
 0x1f8   : > { %1233 = vst.msk [vmem:[#allocation3 + $0xb0] sm:$0xff] %vm1210_vm6, %v1159_v27  ;;  %1361 = vrot.lane.b32.xlu1 %v1848_v33, %s2768_s11  ;;  %1327 = vrot.lane.b32.xlu0 %v1831_v57, %s2768_s11  ;;  %v1851_v27 = vld [vmem:[#allocation2 + $0x208] sm:$0xff] }
 0x1f9   : > { %2700 = vmatprep.subr.msk.bf16.mxu0 %vm3527_vm13, %v2698_v44  ;;  %v1852_v44 = vld [vmem:[#allocation2 + $0x210] sm:$0xff] }
 0x1fa   : > { %v1161_v49 = vpop.permute.xlu1 %1160  ;;  %v1127_v45 = vpop.permute.xlu0 %1126  ;;  %v2215_v42 = vld [vmem:[#allocation3 + $0x28] sm:$0xff] }
 0x1fb   : > { %1234 = vst.msk [vmem:[#allocation3 + $0xb8] sm:$0xff] %vm1210_vm6, %v1161_v49  ;;  %1217 = vst.msk [vmem:[#allocation3 + $0x30] sm:$0xff] %vm1210_vm6, %v1127_v45  ;;  %v2701_v13 = vpack.c.bf16 %v2215_v42, %v2214_v24  ;;  %v1835_v49 = vld [vmem:[#allocation2 + $0x108] sm:$0xff]  ;;  %v1836_v42 = vld [vmem:[#allocation2 + $0x110] sm:$0xff] }
 0x1fc   : > { %1329 = vrot.lane.b32.xlu1 %v1832_v59, %s2768_s11  ;;  %1552 = vrot.lane.b32.xlu0 %v3647_v43, %s2769_s12 }
 0x1fd   : > { %2703 = vmatpush3.bf16.xpose.msk.msra.mxu0 %vm3527_vm13, %v2701_v13  ;;  %v2044_v13 = vld [vmem:[#allocation2 + $0x209] sm:$0xff] }
 0x1fe   : > { %v1129_v28 = vpop.permute.xlu1 %1128  ;;  %v1352_v14 = vpop.permute.xlu0 %1351 }
 0x1ff   : > { %1218 = vst.msk [vmem:[#allocation3 + $0x38] sm:$0xff] %vm1210_vm6, %v1129_v28 }
 0x200   : > { %1426 = vst.msk [vmem:[#allocation3 + $0xb0] sm:$0xff] %vm1403_vm7, %v1352_v14  ;;  %1554 = vrot.lane.b32.xlu1 %v3654_v51, %s2769_s12  ;;  %1520 = vrot.lane.b32.xlu0 %v2024_v52, %s2769_s12 }
 0x202   : > { %v1354_v7 = vpop.permute.xlu1 %1353  ;;  %v1320_v35 = vpop.permute.xlu0 %1319 }
 0x203   : > { %1427 = vst.msk [vmem:[#allocation3 + $0xb8] sm:$0xff] %vm1403_vm7, %v1354_v7  ;;  %1410 = vst.msk [vmem:[#allocation3 + $0x30] sm:$0xff] %vm1403_vm7, %v1320_v35  ;;  %v2045_v7 = vld [vmem:[#allocation2 + $0x211] sm:$0xff]  ;;  %v2028_v35 = vld [vmem:[#allocation2 + $0x109] sm:$0xff] }
 0x204   : > { %1522 = vrot.lane.b32.xlu1 %v2025_v17, %s2769_s12  ;;  %1746 = vrot.lane.b32.xlu0 %v3222_v54, %s2770_s13  ;;  %v1658_v17 = vld [vmem:[#allocation2 + $0x207] sm:$0xff] }
 0x206   : > { %v1322_v4 = vpop.permute.xlu1 %1321  ;;  %v1545_v37 = vpop.permute.xlu0 %1544 }
 0x207   : > { %1411 = vst.msk [vmem:[#allocation3 + $0x38] sm:$0xff] %vm1403_vm7, %v1322_v4 }
 0x208   : > { %1619 = vst.msk [vmem:[#allocation3 + $0xb0] sm:$0xff] %vm1596_vm8, %v1545_v37  ;;  %1748 = vrot.lane.b32.xlu1 %v3230_v55, %s2770_s13  ;;  %1714 = vrot.lane.b32.xlu0 %v1640_v9, %s2770_s13 }
 0x20a   : > { %v1547_v21 = vpop.permute.xlu1 %1546  ;;  %v1513_v40 = vpop.permute.xlu0 %1512 }
 0x20b   : > { %1620 = vst.msk [vmem:[#allocation3 + $0xb8] sm:$0xff] %vm1596_vm8, %v1547_v21  ;;  %1603 = vst.msk [vmem:[#allocation3 + $0x30] sm:$0xff] %vm1596_vm8, %v1513_v40 }
 0x20c   : > { %1716 = vrot.lane.b32.xlu1 %v1641_v15, %s2770_s13  ;;  %1939 = vrot.lane.b32.xlu0 %v1849_v5, %s2771_s14 }
 0x20e   : > { %v1515_v22 = vpop.permute.xlu1 %1514  ;;  %v1739_v38 = vpop.permute.xlu0 %1738 }
 0x20f   : > { %1604 = vst.msk [vmem:[#allocation3 + $0x38] sm:$0xff] %vm1596_vm8, %v1515_v22 }
 0x210   : > { %1813 = vst.msk [vmem:[#allocation3 + $0xb0] sm:$0xff] %vm1790_vm9, %v1739_v38  ;;  %1941 = vrot.lane.b32.xlu1 %v1850_v41, %s2771_s14  ;;  %1907 = vrot.lane.b32.xlu0 %v1833_v39, %s2771_s14 }
 0x212   : > { %v1741_v2 = vpop.permute.xlu1 %1740  ;;  %v1707_v16 = vpop.permute.xlu0 %1706 }
 0x213   : > { %1814 = vst.msk [vmem:[#allocation3 + $0xb8] sm:$0xff] %vm1790_vm9, %v1741_v2  ;;  %1797 = vst.msk [vmem:[#allocation3 + $0x30] sm:$0xff] %vm1790_vm9, %v1707_v16 }
 0x214   : > { %1909 = vrot.lane.b32.xlu1 %v1834_v30, %s2771_s14  ;;  %2132 = vrot.lane.b32.xlu0 %v3719_v6, %s2772_s15 }
 0x216   : > { %v1709_v34 = vpop.permute.xlu1 %1708  ;;  %v1932_v20 = vpop.permute.xlu0 %1931 }
 0x217   : > { %1798 = vst.msk [vmem:[#allocation3 + $0x38] sm:$0xff] %vm1790_vm9, %v1709_v34 }
 0x218   : > { %2006 = vst.msk [vmem:[#allocation3 + $0xb0] sm:$0xff] %vm1983_vm10, %v1932_v20  ;;  %2134 = vrot.lane.b32.xlu1 %v3726_v60, %s2772_s15  ;;  %2100 = vrot.lane.b32.xlu0 %v2026_v1, %s2772_s15 }
 0x21a   : > { %v1934_v12 = vpop.permute.xlu1 %1933  ;;  %v1900_v3 = vpop.permute.xlu0 %1899 }
 0x21b   : > { %2007 = vst.msk [vmem:[#allocation3 + $0xb8] sm:$0xff] %vm1983_vm10, %v1934_v12  ;;  %1990 = vst.msk [vmem:[#allocation3 + $0x30] sm:$0xff] %vm1983_vm10, %v1900_v3 }
 0x21c   : > { %2102 = vrot.lane.b32.xlu1 %v2027_v18, %s2772_s15  ;;  %977 = vrot.lane.b32.xlu0 %v3647_v43, %s2766_s9 }
 0x21e   : > { %v1902_v25 = vpop.permute.xlu1 %1901  ;;  %v2125_v62 = vpop.permute.xlu0 %2124 }
 0x21f   : > { %1991 = vst.msk [vmem:[#allocation3 + $0x38] sm:$0xff] %vm1983_vm10, %v1902_v25 }
 0x220   : > { %2199 = vst.msk [vmem:[#allocation3 + $0xb0] sm:$0xff] %vm2176_vm11, %v2125_v62  ;;  %979 = vrot.lane.b32.xlu1 %v3654_v51, %s2766_s9  ;;  %1170 = vrot.lane.b32.xlu0 %v3222_v54, %s2767_s10 }
 0x222   : > { %v2127_v29 = vpop.permute.xlu1 %2126  ;;  %v2093_v32 = vpop.permute.xlu0 %2092 }
 0x223   : > { %2200 = vst.msk [vmem:[#allocation3 + $0xb8] sm:$0xff] %vm2176_vm11, %v2127_v29  ;;  %2183 = vst.msk [vmem:[#allocation3 + $0x30] sm:$0xff] %vm2176_vm11, %v2093_v32  ;;  %v1661_v29 = vld [vmem:[#allocation2 + $0x22f] sm:$0xff] }
 0x224   : > { %1172 = vrot.lane.b32.xlu1 %v3230_v55, %s2767_s10  ;;  %1138 = vrot.lane.b32.xlu0 %v1640_v9, %s2767_s10  ;;  %v2029_v9 = vld [vmem:[#allocation2 + $0x111] sm:$0xff] }
 0x226   : > { %v2095_v63 = vpop.permute.xlu1 %2094  ;;  %v970_v0 = vpop.permute.xlu0 %969 }
 0x227   : > { %2184 = vst.msk [vmem:[#allocation3 + $0x38] sm:$0xff] %vm2176_vm11, %v2095_v63  ;;  %v2232_v57 = vld [vmem:[#allocation3 + $0xb0] sm:$0xff] }
 0x228   : > { %1042 = vst.msk [vmem:[#allocation3 + $0xc0] sm:$0xff] %vm1017_vm5, %v970_v0  ;;  %1140 = vrot.lane.b32.xlu1 %v1641_v15, %s2767_s10  ;;  %1363 = vrot.lane.b32.xlu0 %v1849_v5, %s2768_s11  ;;  %v1644_v0 = vld [vmem:[#allocation2 + $0x127] sm:$0xff] }
 0x22a   : > { %v972_v54 = vpop.permute.xlu1 %971  ;;  %v1163_v33 = vpop.permute.xlu0 %1162  ;;  %v2233_v58 = vld [vmem:[#allocation3 + $0xb8] sm:$0xff]  ;;  %v2216_v43 = vld [vmem:[#allocation3 + $0x30] sm:$0xff] }
 0x22b   : > { %1043 = vst.msk [vmem:[#allocation3 + $0xc8] sm:$0xff] %vm1017_vm5, %v972_v54  ;;  %v2704_v55 = vpack.c.bf16 %v2233_v58, %v2232_v57  ;;  %v1853_v54 = vld [vmem:[#allocation2 + $0x228] sm:$0xff] }
 0x22c   : > { %1235 = vst.msk [vmem:[#allocation3 + $0xc0] sm:$0xff] %vm1210_vm6, %v1163_v33  ;;  %1365 = vrot.lane.b32.xlu1 %v1850_v41, %s2768_s11  ;;  %1331 = vrot.lane.b32.xlu0 %v1833_v39, %s2768_s11  ;;  %v1645_v58 = vld [vmem:[#allocation2 + $0x12f] sm:$0xff] }
 0x22d   : > { %2706 = vmatprep.subr.msk.bf16.mxu0 %vm3527_vm13, %v2704_v55  ;;  %v1854_v55 = vld [vmem:[#allocation2 + $0x230] sm:$0xff] }
 0x22e   : > { %v1165_v31 = vpop.permute.xlu1 %1164  ;;  %v1131_v59 = vpop.permute.xlu0 %1130  ;;  %v2217_v46 = vld [vmem:[#allocation3 + $0x38] sm:$0xff] }
 0x22f   : > { %1236 = vst.msk [vmem:[#allocation3 + $0xc8] sm:$0xff] %vm1210_vm6, %v1165_v31  ;;  %1219 = vst.msk [vmem:[#allocation3 + $0x40] sm:$0xff] %vm1210_vm6, %v1131_v59  ;;  %v2707_v50 = vpack.c.bf16 %v2217_v46, %v2216_v43  ;;  %v1837_v43 = vld [vmem:[#allocation2 + $0x128] sm:$0xff] }
 0x230   : > { %1333 = vrot.lane.b32.xlu1 %v1834_v30, %s2768_s11  ;;  %1556 = vrot.lane.b32.xlu0 %v3719_v6, %s2769_s12  ;;  %v2046_v46 = vld [vmem:[#allocation2 + $0x229] sm:$0xff] }
 0x231   : > { %2709 = vmatpush3.bf16.xpose.msk.msra.mxu0 %vm3527_vm13, %v2707_v50 }
 0x232   : > { %v1133_v51 = vpop.permute.xlu1 %1132  ;;  %v1356_v52 = vpop.permute.xlu0 %1355 }
 0x233   : > { %1220 = vst.msk [vmem:[#allocation3 + $0x48] sm:$0xff] %vm1210_vm6, %v1133_v51 }
 0x234   : > { %1428 = vst.msk [vmem:[#allocation3 + $0xc0] sm:$0xff] %vm1403_vm7, %v1356_v52  ;;  %1558 = vrot.lane.b32.xlu1 %v3726_v60, %s2769_s12  ;;  %1524 = vrot.lane.b32.xlu0 %v2026_v1, %s2769_s12  ;;  %v1838_v52 = vld [vmem:[#allocation2 + $0x130] sm:$0xff] }
 0x236   : > { %v1358_v53 = vpop.permute.xlu1 %1357  ;;  %v1324_v61 = vpop.permute.xlu0 %1323 }
 0x237   : > { %1429 = vst.msk [vmem:[#allocation3 + $0xc8] sm:$0xff] %vm1403_vm7, %v1358_v53  ;;  %1412 = vst.msk [vmem:[#allocation3 + $0x40] sm:$0xff] %vm1403_vm7, %v1324_v61  ;;  %v2047_v53 = vld [vmem:[#allocation2 + $0x231] sm:$0xff] }
 0x238   : > { %1526 = vrot.lane.b32.xlu1 %v2027_v18, %s2769_s12  ;;  %1750 = vrot.lane.b32.xlu0 %v1658_v17, %s2770_s13  ;;  %v1660_v18 = vld [vmem:[#allocation2 + $0x227] sm:$0xff] }
 0x23a   : > { %v1326_v56 = vpop.permute.xlu1 %1325  ;;  %v1549_v23 = vpop.permute.xlu0 %1548 }
 0x23b   : > { %1413 = vst.msk [vmem:[#allocation3 + $0x48] sm:$0xff] %vm1403_vm7, %v1326_v56  ;;  %v2030_v56 = vld [vmem:[#allocation2 + $0x129] sm:$0xff] }
 0x23c   : > { %1621 = vst.msk [vmem:[#allocation3 + $0xc0] sm:$0xff] %vm1596_vm8, %v1549_v23  ;;  %1752 = vrot.lane.b32.xlu1 %v1659_v10, %s2770_s13  ;;  %1718 = vrot.lane.b32.xlu0 %v1642_v47, %s2770_s13  ;;  %v3854_v23 = vld [vmem:[%s3951_s2] sm:$0xf] }
 0x23d   : > { %2684 = vmatprep.mubr.msk.f32.mxu0 %vm2248_vm12, %v3854_v23 }
 0x23e   : > { %v1551_v26 = vpop.permute.xlu1 %1550  ;;  %v1517_v11 = vpop.permute.xlu0 %1516 }
 0x23f   : > { %1622 = vst.msk [vmem:[#allocation3 + $0xc8] sm:$0xff] %vm1596_vm8, %v1551_v26  ;;  %1605 = vst.msk [vmem:[#allocation3 + $0x40] sm:$0xff] %vm1596_vm8, %v1517_v11  ;;  %v2031_v26 = vld [vmem:[#allocation2 + $0x131] sm:$0xff] }
 0x240   : > { %1720 = vrot.lane.b32.xlu1 %v1643_v48, %s2770_s13  ;;  %1943 = vrot.lane.b32.xlu0 %v1851_v27, %s2771_s14 }
 0x242   : > { %v1519_v36 = vpop.permute.xlu1 %1518  ;;  %v1743_v8 = vpop.permute.xlu0 %1742 }
 0x243   : > { %1606 = vst.msk [vmem:[#allocation3 + $0x48] sm:$0xff] %vm1596_vm8, %v1519_v36  ;;  %v2773_v36 = vmov 0  }
 0x244   : > { %1815 = vst.msk [vmem:[#allocation3 + $0xc0] sm:$0xff] %vm1790_vm9, %v1743_v8  ;;  %1945 = vrot.lane.b32.xlu1 %v1852_v44, %s2771_s14  ;;  %1911 = vrot.lane.b32.xlu0 %v1835_v49, %s2771_s14 }
 0x245   : > { %2754 = vset.pattern.permute.xlu0 %v2773_v36 }
 0x246   : > { %v1745_v45 = vpop.permute.xlu1 %1744  ;;  %v1711_v24 = vpop.permute.xlu0 %1710 }
 0x247   : > { %1816 = vst.msk [vmem:[#allocation3 + $0xc8] sm:$0xff] %vm1790_vm9, %v1745_v45  ;;  %1799 = vst.msk [vmem:[#allocation3 + $0x40] sm:$0xff] %vm1790_vm9, %v1711_v24 }
 0x248   : > { %1913 = vrot.lane.b32.xlu1 %v1836_v42, %s2771_s14  ;;  %2136 = vrot.lane.b32.xlu0 %v2044_v13, %s2772_s15 }
 0x24a   : > { %v1713_v28 = vpop.permute.xlu1 %1712  ;;  %v1936_v14 = vpop.permute.xlu0 %1935 }
 0x24b   : > { %1800 = vst.msk [vmem:[#allocation3 + $0x48] sm:$0xff] %vm1790_vm9, %v1713_v28 }
 0x24c   : > { %2008 = vst.msk [vmem:[#allocation3 + $0xc0] sm:$0xff] %vm1983_vm10, %v1936_v14  ;;  %2138 = vrot.lane.b32.xlu1 %v2045_v7, %s2772_s15  ;;  %2104 = vrot.lane.b32.xlu0 %v2028_v35, %s2772_s15 }
 0x24e   : > { %v1938_v4 = vpop.permute.xlu1 %1937  ;;  %v1904_v37 = vpop.permute.xlu0 %1903 }
 0x24f   : > { %2009 = vst.msk [vmem:[#allocation3 + $0xc8] sm:$0xff] %vm1983_vm10, %v1938_v4  ;;  %1992 = vst.msk [vmem:[#allocation3 + $0x40] sm:$0xff] %vm1983_vm10, %v1904_v37 }
 0x250   : > { %2106 = vrot.lane.b32.xlu1 %v2029_v9, %s2772_s15  ;;  %981 = vrot.lane.b32.xlu0 %v3719_v6, %s2766_s9 }
 0x252   : > { %v1906_v21 = vpop.permute.xlu1 %1905  ;;  %v2129_v40 = vpop.permute.xlu0 %2128 }
 0x253   : > { %1993 = vst.msk [vmem:[#allocation3 + $0x48] sm:$0xff] %vm1983_vm10, %v1906_v21 }
 0x254   : > { %2201 = vst.msk [vmem:[#allocation3 + $0xc0] sm:$0xff] %vm2176_vm11, %v2129_v40  ;;  %983 = vrot.lane.b32.xlu1 %v3726_v60, %s2766_s9  ;;  %1174 = vrot.lane.b32.xlu0 %v1658_v17, %s2767_s10 }
 0x256   : > { %v2131_v15 = vpop.permute.xlu1 %2130  ;;  %v2097_v5 = vpop.permute.xlu0 %2096 }
 0x257   : > { %2202 = vst.msk [vmem:[#allocation3 + $0xc8] sm:$0xff] %vm2176_vm11, %v2131_v15  ;;  %2185 = vst.msk [vmem:[#allocation3 + $0x40] sm:$0xff] %vm2176_vm11, %v2097_v5 }
 0x258   : > { %1176 = vrot.lane.b32.xlu1 %v1659_v10, %s2767_s10  ;;  %1142 = vrot.lane.b32.xlu0 %v1642_v47, %s2767_s10 }
 0x25a   : > { %v2099_v22 = vpop.permute.xlu1 %2098  ;;  %v974_v38 = vpop.permute.xlu0 %973 }
 0x25b   : > { %2186 = vst.msk [vmem:[#allocation3 + $0x48] sm:$0xff] %vm2176_vm11, %v2099_v22  ;;  %v2234_v2 = vld [vmem:[#allocation3 + $0xc0] sm:$0xff] }
 0x25c   : > { %1044 = vst.msk [vmem:[#allocation3 + $0xd0] sm:$0xff] %vm1017_vm5, %v974_v38  ;;  %1144 = vrot.lane.b32.xlu1 %v1643_v48, %s2767_s10  ;;  %1367 = vrot.lane.b32.xlu0 %v1851_v27, %s2768_s11  ;;  %v2242_v27 = vld [vmem:[%s3952_s3] sm:$0xf] }
 0x25e   : > { %v976_v41 = vpop.permute.xlu1 %975  ;;  %v1167_v39 = vpop.permute.xlu0 %1166  ;;  %v2235_v16 = vld [vmem:[#allocation3 + $0xc8] sm:$0xff]  ;;  %v2218_v20 = vld [vmem:[#allocation3 + $0x40] sm:$0xff] }
 0x25f   : > { %1045 = vst.msk [vmem:[#allocation3 + $0xd8] sm:$0xff] %vm1017_vm5, %v976_v41  ;;  %v2710_v30 = vpack.c.bf16 %v2235_v16, %v2234_v2 }
 0x260   : > { %1237 = vst.msk [vmem:[#allocation3 + $0xd0] sm:$0xff] %vm1210_vm6, %v1167_v39  ;;  %1369 = vrot.lane.b32.xlu1 %v1852_v44, %s2768_s11  ;;  %1335 = vrot.lane.b32.xlu0 %v1835_v49, %s2768_s11 }
 0x261   : > { %2712 = vmatprep.subr.msk.bf16.mxu0 %vm3527_vm13, %v2710_v30 }
 0x262   : > { %v1169_v6 = vpop.permute.xlu1 %1168  ;;  %v1135_v34 = vpop.permute.xlu0 %1134  ;;  %v2219_v60 = vld [vmem:[#allocation3 + $0x48] sm:$0xff] }
 0x263   : > { %1238 = vst.msk [vmem:[#allocation3 + $0xd8] sm:$0xff] %vm1210_vm6, %v1169_v6  ;;  %1221 = vst.msk [vmem:[#allocation3 + $0x50] sm:$0xff] %vm1210_vm6, %v1135_v34  ;;  %v2713_v1 = vpack.c.bf16 %v2219_v60, %v2218_v20 }
 0x264   : > { %1337 = vrot.lane.b32.xlu1 %v1836_v42, %s2768_s11  ;;  %1560 = vrot.lane.b32.xlu0 %v2044_v13, %s2769_s12 }
 0x265   : > { %2715 = vmatpush3.bf16.xpose.msk.msra.mxu0 %vm3527_vm13, %v2713_v1 }
 0x266   : > { %v1137_v12 = vpop.permute.xlu1 %1136  ;;  %v1360_v3 = vpop.permute.xlu0 %1359 }
 0x267   : > { %1222 = vst.msk [vmem:[#allocation3 + $0x58] sm:$0xff] %vm1210_vm6, %v1137_v12 }
 0x268   : > { %1430 = vst.msk [vmem:[#allocation3 + $0xd0] sm:$0xff] %vm1403_vm7, %v1360_v3  ;;  %1562 = vrot.lane.b32.xlu1 %v2045_v7, %s2769_s12  ;;  %1528 = vrot.lane.b32.xlu0 %v2028_v35, %s2769_s12 }
 0x26a   : > { %v1362_v25 = vpop.permute.xlu1 %1361  ;;  %v1328_v62 = vpop.permute.xlu0 %1327 }
 0x26b   : > { %1431 = vst.msk [vmem:[#allocation3 + $0xd8] sm:$0xff] %vm1403_vm7, %v1362_v25  ;;  %1414 = vst.msk [vmem:[#allocation3 + $0x50] sm:$0xff] %vm1403_vm7, %v1328_v62 }
 0x26c   : > { %1530 = vrot.lane.b32.xlu1 %v2029_v9, %s2769_s12  ;;  %1754 = vrot.lane.b32.xlu0 %v1660_v18, %s2770_s13 }
 0x26e   : > { %v1330_v32 = vpop.permute.xlu1 %1329  ;;  %v1553_v63 = vpop.permute.xlu0 %1552 }
 0x26f   : > { %1415 = vst.msk [vmem:[#allocation3 + $0x58] sm:$0xff] %vm1403_vm7, %v1330_v32 }
 0x270   : > { %1623 = vst.msk [vmem:[#allocation3 + $0xd0] sm:$0xff] %vm1596_vm8, %v1553_v63  ;;  %1756 = vrot.lane.b32.xlu1 %v1661_v29, %s2770_s13  ;;  %1722 = vrot.lane.b32.xlu0 %v1644_v0, %s2770_s13 }
 0x272   : > { %v1555_v33 = vpop.permute.xlu1 %1554  ;;  %v1521_v57 = vpop.permute.xlu0 %1520 }
 0x273   : > { %1624 = vst.msk [vmem:[#allocation3 + $0xd8] sm:$0xff] %vm1596_vm8, %v1555_v33  ;;  %1607 = vst.msk [vmem:[#allocation3 + $0x50] sm:$0xff] %vm1596_vm8, %v1521_v57 }
 0x274   : > { %1724 = vrot.lane.b32.xlu1 %v1645_v58, %s2770_s13  ;;  %1947 = vrot.lane.b32.xlu0 %v1853_v54, %s2771_s14 }
 0x276   : > { %v1523_v31 = vpop.permute.xlu1 %1522  ;;  %v1747_v59 = vpop.permute.xlu0 %1746 }
 0x277   : > { %1608 = vst.msk [vmem:[#allocation3 + $0x58] sm:$0xff] %vm1596_vm8, %v1523_v31 }
 0x278   : > { %1817 = vst.msk [vmem:[#allocation3 + $0xd0] sm:$0xff] %vm1790_vm9, %v1747_v59  ;;  %1949 = vrot.lane.b32.xlu1 %v1854_v55, %s2771_s14  ;;  %1915 = vrot.lane.b32.xlu0 %v1837_v43, %s2771_s14 }
 0x27a   : > { %v1749_v50 = vpop.permute.xlu1 %1748  ;;  %v1715_v51 = vpop.permute.xlu0 %1714 }
 0x27b   : > { %1818 = vst.msk [vmem:[#allocation3 + $0xd8] sm:$0xff] %vm1790_vm9, %v1749_v50  ;;  %1801 = vst.msk [vmem:[#allocation3 + $0x50] sm:$0xff] %vm1790_vm9, %v1715_v51 }
 0x27c   : > { %1917 = vrot.lane.b32.xlu1 %v1838_v52, %s2771_s14  ;;  %2140 = vrot.lane.b32.xlu0 %v2046_v46, %s2772_s15 }
 0x27e   : > { %v1717_v61 = vpop.permute.xlu1 %1716  ;;  %v1940_v17 = vpop.permute.xlu0 %1939 }
 0x27f   : > { %1802 = vst.msk [vmem:[#allocation3 + $0x58] sm:$0xff] %vm1790_vm9, %v1717_v61 }
 0x280   : > { %2010 = vst.msk [vmem:[#allocation3 + $0xd0] sm:$0xff] %vm1983_vm10, %v1940_v17  ;;  %2142 = vrot.lane.b32.xlu1 %v2047_v53, %s2772_s15  ;;  %2108 = vrot.lane.b32.xlu0 %v2030_v56, %s2772_s15 }
 0x282   : > { %v1942_v10 = vpop.permute.xlu1 %1941  ;;  %v1908_v47 = vpop.permute.xlu0 %1907 }
 0x283   : > { %2011 = vst.msk [vmem:[#allocation3 + $0xd8] sm:$0xff] %vm1983_vm10, %v1942_v10  ;;  %1994 = vst.msk [vmem:[#allocation3 + $0x50] sm:$0xff] %vm1983_vm10, %v1908_v47 }
 0x284   : > { %2110 = vrot.lane.b32.xlu1 %v2031_v26, %s2772_s15  ;;  %2245 = vperm.xlu0 %2754, %v2242_v27  }
 0x286   : > { %v1910_v11 = vpop.permute.xlu1 %1909  ;;  %v2133_v48 = vpop.permute.xlu0 %2132 }
 0x287   : > { %1995 = vst.msk [vmem:[#allocation3 + $0x58] sm:$0xff] %vm1983_vm10, %v1910_v11 }
 0x288   : > { %2203 = vst.msk [vmem:[#allocation3 + $0xd0] sm:$0xff] %vm2176_vm11, %v2133_v48 }
 0x28a   : > { %v2135_v8 = vpop.permute.xlu1 %2134  ;;  %v2101_v44 = vpop.permute.xlu0 %2100 }
 0x28b   : > { %2204 = vst.msk [vmem:[#allocation3 + $0xd8] sm:$0xff] %vm2176_vm11, %v2135_v8  ;;  %2187 = vst.msk [vmem:[#allocation3 + $0x50] sm:$0xff] %vm2176_vm11, %v2101_v44 }
 0x28e   : > { %v2103_v49 = vpop.permute.xlu1 %2102  ;;  %v978_v45 = vpop.permute.xlu0 %977 }
 0x28f   : > { %2188 = vst.msk [vmem:[#allocation3 + $0x58] sm:$0xff] %vm2176_vm11, %v2103_v49  ;;  %v2236_v13 = vld [vmem:[#allocation3 + $0xd0] sm:$0xff] }
 0x290   : > { %1046 = vst.msk [vmem:[#allocation3 + $0xe0] sm:$0xff] %vm1017_vm5, %v978_v45 }
 0x292   : > { %v980_v24 = vpop.permute.xlu1 %979  ;;  %v1171_v42 = vpop.permute.xlu0 %1170  ;;  %v2237_v28 = vld [vmem:[#allocation3 + $0xd8] sm:$0xff]  ;;  %v2220_v4 = vld [vmem:[#allocation3 + $0x50] sm:$0xff] }
 0x293   : > { %1047 = vst.msk [vmem:[#allocation3 + $0xe8] sm:$0xff] %vm1017_vm5, %v980_v24  ;;  %v2716_v14 = vpack.c.bf16 %v2237_v28, %v2236_v13 }
 0x294   : > { %1239 = vst.msk [vmem:[#allocation3 + $0xe0] sm:$0xff] %vm1210_vm6, %v1171_v42 }
 0x295   : > { %2718 = vmatprep.subr.msk.bf16.mxu0 %vm3527_vm13, %v2716_v14 }
 0x296   : > { %v1173_v7 = vpop.permute.xlu1 %1172  ;;  %v1139_v35 = vpop.permute.xlu0 %1138  ;;  %v2221_v37 = vld [vmem:[#allocation3 + $0x58] sm:$0xff] }
 0x297   : > { %1240 = vst.msk [vmem:[#allocation3 + $0xe8] sm:$0xff] %vm1210_vm6, %v1173_v7  ;;  %1223 = vst.msk [vmem:[#allocation3 + $0x60] sm:$0xff] %vm1210_vm6, %v1139_v35  ;;  %v2719_v9 = vpack.c.bf16 %v2221_v37, %v2220_v4 }
 0x299   : > { %2721 = vmatpush3.bf16.xpose.msk.msra.mxu0 %vm3527_vm13, %v2719_v9 }
 0x29a   : > { %v1141_v21 = vpop.permute.xlu1 %1140  ;;  %v1364_v40 = vpop.permute.xlu0 %1363 }
 0x29b   : > { %1224 = vst.msk [vmem:[#allocation3 + $0x68] sm:$0xff] %vm1210_vm6, %v1141_v21 }
 0x29c   : > { %1432 = vst.msk [vmem:[#allocation3 + $0xe0] sm:$0xff] %vm1403_vm7, %v1364_v40 }
 0x29e   : > { %v1366_v15 = vpop.permute.xlu1 %1365  ;;  %v1332_v5 = vpop.permute.xlu0 %1331 }
 0x29f   : > { %1433 = vst.msk [vmem:[#allocation3 + $0xe8] sm:$0xff] %vm1403_vm7, %v1366_v15  ;;  %1416 = vst.msk [vmem:[#allocation3 + $0x60] sm:$0xff] %vm1403_vm7, %v1332_v5 }
 0x2a2   : > { %v1334_v22 = vpop.permute.xlu1 %1333  ;;  %v1557_v38 = vpop.permute.xlu0 %1556 }
 0x2a3   : > { %1417 = vst.msk [vmem:[#allocation3 + $0x68] sm:$0xff] %vm1403_vm7, %v1334_v22 }
 0x2a4   : > { %1625 = vst.msk [vmem:[#allocation3 + $0xe0] sm:$0xff] %vm1596_vm8, %v1557_v38 }
 0x2a6   : > { %v1559_v41 = vpop.permute.xlu1 %1558  ;;  %v1525_v39 = vpop.permute.xlu0 %1524 }
 0x2a7   : > { %1626 = vst.msk [vmem:[#allocation3 + $0xe8] sm:$0xff] %vm1596_vm8, %v1559_v41  ;;  %1609 = vst.msk [vmem:[#allocation3 + $0x60] sm:$0xff] %vm1596_vm8, %v1525_v39 }
 0x2aa   : > { %v1527_v2 = vpop.permute.xlu1 %1526  ;;  %v1751_v16 = vpop.permute.xlu0 %1750 }
 0x2ab   : > { %1610 = vst.msk [vmem:[#allocation3 + $0x68] sm:$0xff] %vm1596_vm8, %v1527_v2 }
 0x2ac   : > { %1819 = vst.msk [vmem:[#allocation3 + $0xe0] sm:$0xff] %vm1790_vm9, %v1751_v16 }
 0x2ae   : > { %v1753_v30 = vpop.permute.xlu1 %1752  ;;  %v1719_v6 = vpop.permute.xlu0 %1718 }
 0x2af   : > { %1820 = vst.msk [vmem:[#allocation3 + $0xe8] sm:$0xff] %vm1790_vm9, %v1753_v30  ;;  %1803 = vst.msk [vmem:[#allocation3 + $0x60] sm:$0xff] %vm1790_vm9, %v1719_v6 }
 0x2b2   : > { %v1721_v34 = vpop.permute.xlu1 %1720  ;;  %v1944_v20 = vpop.permute.xlu0 %1943 }
 0x2b3   : > { %1804 = vst.msk [vmem:[#allocation3 + $0x68] sm:$0xff] %vm1790_vm9, %v1721_v34 }
 0x2b4   : > { %2012 = vst.msk [vmem:[#allocation3 + $0xe0] sm:$0xff] %vm1983_vm10, %v1944_v20 }
 0x2b6   : > { %v1946_v60 = vpop.permute.xlu1 %1945  ;;  %v1912_v1 = vpop.permute.xlu0 %1911 }
 0x2b7   : > { %2013 = vst.msk [vmem:[#allocation3 + $0xe8] sm:$0xff] %vm1983_vm10, %v1946_v60  ;;  %1996 = vst.msk [vmem:[#allocation3 + $0x60] sm:$0xff] %vm1983_vm10, %v1912_v1 }
 0x2ba   : > { %v1914_v12 = vpop.permute.xlu1 %1913  ;;  %v2137_v3 = vpop.permute.xlu0 %2136 }
 0x2bb   : > { %1997 = vst.msk [vmem:[#allocation3 + $0x68] sm:$0xff] %vm1983_vm10, %v1914_v12 }
 0x2bc   : > { %2205 = vst.msk [vmem:[#allocation3 + $0xe0] sm:$0xff] %vm2176_vm11, %v2137_v3 }
 0x2be   : > { %v2139_v18 = vpop.permute.xlu1 %2138  ;;  %v2105_v25 = vpop.permute.xlu0 %2104 }
 0x2bf   : > { %2206 = vst.msk [vmem:[#allocation3 + $0xe8] sm:$0xff] %vm2176_vm11, %v2139_v18  ;;  %2189 = vst.msk [vmem:[#allocation3 + $0x60] sm:$0xff] %vm2176_vm11, %v2105_v25 }
 0x2c2   : > { %v2107_v62 = vpop.permute.xlu1 %2106  ;;  %v982_v29 = vpop.permute.xlu0 %981 }
 0x2c3   : > { %2190 = vst.msk [vmem:[#allocation3 + $0x68] sm:$0xff] %vm2176_vm11, %v2107_v62  ;;  %v2238_v0 = vld [vmem:[#allocation3 + $0xe0] sm:$0xff] }
 0x2c4   : > { %1048 = vst.msk [vmem:[#allocation3 + $0xf0] sm:$0xff] %vm1017_vm5, %v982_v29 }
 0x2c6   : > { %v984_v32 = vpop.permute.xlu1 %983  ;;  %v1175_v63 = vpop.permute.xlu0 %1174  ;;  %v2239_v54 = vld [vmem:[#allocation3 + $0xe8] sm:$0xff]  ;;  %v2222_v55 = vld [vmem:[#allocation3 + $0x60] sm:$0xff] }
 0x2c7   : > { %1049 = vst.msk [vmem:[#allocation3 + $0xf8] sm:$0xff] %vm1017_vm5, %v984_v32  ;;  %v2722_v33 = vpack.c.bf16 %v2239_v54, %v2238_v0 }
 0x2c8   : > { %1241 = vst.msk [vmem:[#allocation3 + $0xf0] sm:$0xff] %vm1210_vm6, %v1175_v63 }
 0x2c9   : > { %2724 = vmatprep.subr.msk.bf16.mxu0 %vm3527_vm13, %v2722_v33 }
 0x2ca   : > { %v1177_v57 = vpop.permute.xlu1 %1176  ;;  %v1143_v58 = vpop.permute.xlu0 %1142  ;;  %v2223_v31 = vld [vmem:[#allocation3 + $0x68] sm:$0xff] }
 0x2cb   : > { %1242 = vst.msk [vmem:[#allocation3 + $0xf8] sm:$0xff] %vm1210_vm6, %v1177_v57  ;;  %1225 = vst.msk [vmem:[#allocation3 + $0x70] sm:$0xff] %vm1210_vm6, %v1143_v58  ;;  %v2725_v59 = vpack.c.bf16 %v2223_v31, %v2222_v55 }
 0x2cd   : > { %2727 = vmatpush3.bf16.xpose.msk.msra.mxu0 %vm3527_vm13, %v2725_v59 }
 0x2ce   : > { %v1145_v43 = vpop.permute.xlu1 %1144  ;;  %v1368_v46 = vpop.permute.xlu0 %1367 }
 0x2cf   : > { %1226 = vst.msk [vmem:[#allocation3 + $0x78] sm:$0xff] %vm1210_vm6, %v1145_v43 }
 0x2d0   : > { %1434 = vst.msk [vmem:[#allocation3 + $0xf0] sm:$0xff] %vm1403_vm7, %v1368_v46 }
 0x2d2   : > { %v1370_v50 = vpop.permute.xlu1 %1369  ;;  %v1336_v51 = vpop.permute.xlu0 %1335 }
 0x2d3   : > { %1435 = vst.msk [vmem:[#allocation3 + $0xf8] sm:$0xff] %vm1403_vm7, %v1370_v50  ;;  %1418 = vst.msk [vmem:[#allocation3 + $0x70] sm:$0xff] %vm1403_vm7, %v1336_v51 }
 0x2d6   : > { %v1338_v52 = vpop.permute.xlu1 %1337  ;;  %v1561_v53 = vpop.permute.xlu0 %1560 }
 0x2d7   : > { %1419 = vst.msk [vmem:[#allocation3 + $0x78] sm:$0xff] %vm1403_vm7, %v1338_v52 }
 0x2d8   : > { %1627 = vst.msk [vmem:[#allocation3 + $0xf0] sm:$0xff] %vm1596_vm8, %v1561_v53 }
 0x2da   : > { %v1563_v61 = vpop.permute.xlu1 %1562  ;;  %v1529_v17 = vpop.permute.xlu0 %1528 }
 0x2db   : > { %1628 = vst.msk [vmem:[#allocation3 + $0xf8] sm:$0xff] %vm1596_vm8, %v1563_v61  ;;  %1611 = vst.msk [vmem:[#allocation3 + $0x70] sm:$0xff] %vm1596_vm8, %v1529_v17 }
 0x2de   : > { %v1531_v56 = vpop.permute.xlu1 %1530  ;;  %v1755_v10 = vpop.permute.xlu0 %1754 }
 0x2df   : > { %1612 = vst.msk [vmem:[#allocation3 + $0x78] sm:$0xff] %vm1596_vm8, %v1531_v56 }
 0x2e0   : > { %1821 = vst.msk [vmem:[#allocation3 + $0xf0] sm:$0xff] %vm1790_vm9, %v1755_v10 }
 0x2e2   : > { %v1757_v47 = vpop.permute.xlu1 %1756  ;;  %v1723_v26 = vpop.permute.xlu0 %1722 }
 0x2e3   : > { %1822 = vst.msk [vmem:[#allocation3 + $0xf8] sm:$0xff] %vm1790_vm9, %v1757_v47  ;;  %1805 = vst.msk [vmem:[#allocation3 + $0x70] sm:$0xff] %vm1790_vm9, %v1723_v26 }
 0x2e6   : > { %v1725_v11 = vpop.permute.xlu1 %1724  ;;  %v1948_v48 = vpop.permute.xlu0 %1947 }
 0x2e7   : > { %1806 = vst.msk [vmem:[#allocation3 + $0x78] sm:$0xff] %vm1790_vm9, %v1725_v11 }
 0x2e8   : > { %2014 = vst.msk [vmem:[#allocation3 + $0xf0] sm:$0xff] %vm1983_vm10, %v1948_v48 }
 0x2ea   : > { %v1950_v27 = vpop.permute.xlu1 %1949  ;;  %v1916_v36 = vpop.permute.xlu0 %1915 }
 0x2eb   : > { %2015 = vst.msk [vmem:[#allocation3 + $0xf8] sm:$0xff] %vm1983_vm10, %v1950_v27  ;;  %1998 = vst.msk [vmem:[#allocation3 + $0x70] sm:$0xff] %vm1983_vm10, %v1916_v36 }
 0x2ee   : > { %v1918_v8 = vpop.permute.xlu1 %1917  ;;  %v2141_v44 = vpop.permute.xlu0 %2140 }
 0x2ef   : > { %1999 = vst.msk [vmem:[#allocation3 + $0x78] sm:$0xff] %vm1983_vm10, %v1918_v8 }
 0x2f0   : > { %2207 = vst.msk [vmem:[#allocation3 + $0xf0] sm:$0xff] %vm2176_vm11, %v2141_v44 }
 0x2f2   : > { %v2143_v49 = vpop.permute.xlu1 %2142  ;;  %v2109_v45 = vpop.permute.xlu0 %2108 }
 0x2f3   : > { %2208 = vst.msk [vmem:[#allocation3 + $0xf8] sm:$0xff] %vm2176_vm11, %v2143_v49  ;;  %2191 = vst.msk [vmem:[#allocation3 + $0x70] sm:$0xff] %vm2176_vm11, %v2109_v45 }
 0x2f6   : > { %v2111_v24 = vpop.permute.xlu1 %2110 }
 0x2f7   : > { %2192 = vst.msk [vmem:[#allocation3 + $0x78] sm:$0xff] %vm2176_vm11, %v2111_v24  ;;  %v2240_v42 = vld [vmem:[#allocation3 + $0xf0] sm:$0xff] }
 0x2fa   : > { %v2241_v13 = vld [vmem:[#allocation3 + $0xf8] sm:$0xff]  ;;  %v2224_v14 = vld [vmem:[#allocation3 + $0x70] sm:$0xff] }
 0x2fb   : > { %v2728_v28 = vpack.c.bf16 %v2241_v13, %v2240_v42 }
 0x2fd   : > { %2730 = vmatprep.subr.msk.bf16.mxu0 %vm3527_vm13, %v2728_v28 }
 0x2fe   : > { %v2225_v7 = vld [vmem:[#allocation3 + $0x78] sm:$0xff] }
 0x2ff   : > { %v2731_v35 = vpack.c.bf16 %v2225_v7, %v2224_v14 }
 0x301   : > { %2733 = vmatpush3.bf16.xpose.msk.msra.mxu0 %vm3527_vm13, %v2731_v35 }
 0x303   : > { %v2246_v4 = vpop.permute.xlu0 %2245 }
 0x308   : > { %2685 = vmatmul.mubr.msk.f32.vlgmr.msra.gmra.mrb[0].mxu0 %vm2248_vm12, %v3854_v23 }
 0x3db   : > { %v2414_v37 = vpop.f32.mrb[0].mxu0 }
 0x3dc   : > { %v2415_v9 = vadd.f32 %v2414_v37, %v2246_v4  ;;  %v2416_v21 = vpop.f32.mrb[1].mxu0 }
 0x3dd   : > { %v2417_v40 = vadd.f32 %v2416_v21, %v2246_v4 }
 0x3de   : > { %v2419_v15 = vmax.f32 %v2415_v9, 0.0 }
 0x3df   : > { %v2420_v5 = vmax.f32 %v2417_v40, 0.0 }
 0x3e0   : > { %v2434_v22 = vmul.f32 %v2419_v15, %v2419_v15  ;;  %v2427_v19 = vsel %vm2426_vm14, %v2419_v15, 0.0 }
 0x3e1   : > { %v2423_v38 = vcombine.low %v2419_v15, %v2420_v5  ;;  %v2435_v41 = vmul.f32 %v2420_v5, %v2420_v5  ;;  %v2428_v39 = vsel %vm2426_vm14, %v2420_v5, 0.0 }
 0x3e2   : > { %v2429_v23 = vadd.f32 %v2428_v39, %v2427_v19  ;;  %v2436_v2 = vsel %vm2426_vm14, %v2434_v22, 0.0 }
 0x3e3   : > { %2425 = vst [vmem:[%s284_s25] sm:$0xff] %v2423_v38  ;;  %v2437_v16 = vsel %vm2426_vm14, %v2435_v41, 0.0 }
 0x3e4   : > { %2430 = vadd.xlane.f32.xlu1 %v2429_v23  ;;  %v2438_v30 = vadd.f32 %v2437_v16, %v2436_v2 }
 0x3e6   : > { %2439 = vadd.xlane.f32.xlu0 %v2438_v30 }
 0x471   : > { %v2431_v6 = vpop.xlane.xlu1 %2430 }
 0x472   : > { %2433 = vst.msk [vmem:[%s288_s29] sm:$0xf] %vm2432_vm15, %v2431_v6 }
 0x473   : > { %v2440_v34 = vpop.xlane.xlu0 %2439 }
 0x474   : > { %2441 = vst.msk [vmem:[%s292_s8] sm:$0xf] %vm2432_vm15, %v2440_v34 }
 0x475 PF: > { %s17_s21 = sadd.s32 1, %s2761_s21  }
 0x476   : > { %p14_p4 = scmp.ge.s32.totalorder %s17_s21, 4  }
 0x478   :  { %16 = sbr.rel (!%p14_p4) target bundleno = 1 (0x1), region = 97 }

// kernel: up_layer_forward.6
= control target key start
LH: loop header
LB: loop body
LE: loop exit
PB: predicated region body
PF: predicated region fallthrough
CT: control target
= control target key end

     0   :  { %s2645_s24 = smov 0   ;;  %s3767_s0 = inlined_call_operand.vmem [shape: f32[2,4,256], index: 0, kind: input, shape index: {}]   ;;  %s3768_s1 = inlined_call_operand.vmem [shape: f32[4,1], index: 1, kind: input, shape index: {}]   ;;  %s3769_s2 = inlined_call_operand.vmem [shape: f32[4,1], index: 2, kind: input, shape index: {}]   ;;  %s3770_s3 = inlined_call_operand.vmem [shape: f32[4,36], index: 3, kind: input, shape index: {}]   ;;  %s3771_s4 = inlined_call_operand.vmem [shape: f32[4,1], index: 4, kind: input, shape index: {}]   ;;  %s3772_s5 = inlined_call_operand.vmem [shape: f32[2,4,256], index: 5, kind: output, shape index: {0}]   ;;  %s3773_s6 = inlined_call_operand.vmem [shape: f32[2,4,1], index: 6, kind: output, shape index: {1}]   ;;  %s3774_s7 = inlined_call_operand.vmem [shape: f32[2,4,1], index: 7, kind: output, shape index: {2}]  }
   0x1 LB: > { %s2435_s25 = sadd.s32 4294967295, %s2592_s24   ;;  %p2439_p0 = scmp.ge.s32.totalorder %s2592_s24, 1  ;;  %s2592_s24 = sphi %s2645_s24, %s18_s24  }
   0x2   : > { %p242_p1 = scmp.lt.s32.totalorder %s2592_s24, 3 }
   0x4   : > { %p243_p2 = pnand %p2439_p0, %p242_p1 }
   0x6   : > { %246 = sbr.rel (%p243_p2) target bundleno = 1410 (0x582), region = 40 }
   0xd   : > { %v301_v0 = vld [vmem:[%s3768_s1] sm:$0xf]  ;;  %v2594_v1 = vmov 0   ;;  %vm396_vm0 = vcmask 31744   ;;  %v2595_v3 = vmov 0.0   ;;  %s2596_s30 = smov 4   ;;  %v309_v8 = vlaneseq }
   0xe   : > { %2584 = vset.pattern.permute.xlu0 %v2594_v1  ;;  %v315_v2 = vld [vmem:[%s3769_s2] sm:$0xf]  ;;  %398 = vst.msk [vmem:[#allocation2 + $0x8] sm:$0xff] %vm396_vm0, %v2595_v3  ;;  %397 = vst.msk [vmem:[#allocation2] sm:$0xff] %vm396_vm0, %v2595_v3  ;;  %p282_p3 = scmp.lt.s32.totalorder %s2435_s25, 1  ;;  %vm400_vm1 = vcmask 24576  }
   0xf   : > { %304 = vperm.xlu0 %2584, %v301_v0   ;;  %399 = vst.msk [vmem:[#allocation2 + $0x10] sm:$0xff] %vm396_vm0, %v2595_v3  ;;  %403 = vst.msk [vmem:[#allocation2 + $0x220] sm:$0xff] %vm396_vm0, %v2595_v3  ;;  %v2597_v6 = vmov 839922192   ;;  %v310_v10 = vshrl.u32 %v309_v8, 7  ;;  %s2598_s12 = smov 8  }
  0x10   : > { %404 = vst.msk [vmem:[#allocation2 + $0x228] sm:$0xff] %vm396_vm0, %v2595_v3  ;;  %405 = vst.msk [vmem:[#allocation2 + $0x230] sm:$0xff] %vm396_vm0, %v2595_v3  ;;  %v307_v7 = vunpack.c.l.s4 %v2597_v6  ;;  %s3782_s25 = smov (!%p282_p3, %s2435_s25), 1  ;;  %vm700_vm2 = vcmask 64544   ;;  %vm893_vm3 = vcmask 97344   ;;  %s2599_s13 = smov 12  }
  0x11   : > { %s2481_s8 = sshll.u32 %s3782_s25, 3  ;;  %401 = vst.msk [vmem:[#allocation2 + $0x18] sm:$0x1] %vm400_vm1, %v2595_v3  ;;  %406 = vst.msk [vmem:[#allocation2 + $0x238] sm:$0x1] %vm400_vm1, %v2595_v3  ;;  %s2600_s14 = smov 16  }
  0x12   : > { %v308_v9 = vunpack.c.0.s8 %v307_v7  ;;  %s286_s11 = scalar_lea.vmem %s3767_s0, %s2481_s8  ;;  %407 = vst.msk [vmem:[#allocation2 + $0x7] sm:$0x1] %vm400_vm1, %v2595_v3  ;;  %408 = vst.msk [vmem:[#allocation2 + $0x27] sm:$0x1] %vm400_vm1, %v2595_v3  ;;  %s2601_s15 = smov 20   ;;  %vm1086_vm4 = vcmask 130144  }
  0x13   : > { %318 = vperm.xlu0 %2584, %v315_v2   ;;  %v300_v14 = vld [vmem:[%s286_s11] sm:$0xff]  ;;  %409 = vst.msk [vmem:[#allocation2 + $0x47] sm:$0x1] %vm400_vm1, %v2595_v3  ;;  %410 = vst.msk [vmem:[#allocation2 + $0x67] sm:$0x1] %vm400_vm1, %v2595_v3  ;;  %s2602_s16 = smov 24   ;;  %s291_s27 = scalar_lea.vmem %s3772_s5, %s2481_s8 }
  0x14   : > { %v311_v11 = vsub.s32 %v308_v9, %v310_v10  ;;  %411 = vst.msk [vmem:[#allocation2 + $0x87] sm:$0x1] %vm400_vm1, %v2595_v3  ;;  %412 = vst.msk [vmem:[#allocation2 + $0xa7] sm:$0x1] %vm400_vm1, %v2595_v3  ;;  %s2603_s17 = smov 28   ;;  %s2604_s18 = smov 32  }
  0x15   : > { %v540_v4 = vld [vmem:[#allocation2 + $0x8] sm:$0xff]  ;;  %413 = vst.msk [vmem:[#allocation2 + $0xc7] sm:$0x1] %vm400_vm1, %v2595_v3  ;;  %414 = vst.msk [vmem:[#allocation2 + $0xe7] sm:$0x1] %vm400_vm1, %v2595_v3  ;;  %vm1279_vm5 = vcmask 162944  }
  0x16   : > { %v541_v5 = vld [vmem:[#allocation2 + $0x10] sm:$0xff]  ;;  %415 = vst.msk [vmem:[#allocation2 + $0x107] sm:$0x1] %vm400_vm1, %v2595_v3  ;;  %416 = vst.msk [vmem:[#allocation2 + $0x127] sm:$0x1] %vm400_vm1, %v2595_v3  ;;  %vm1472_vm6 = vcmask 195744  }
  0x17   : > { %604 = vrot.lane.b32.xlu0 %v540_v4, %s2596_s30  ;;  %417 = vst.msk [vmem:[#allocation2 + $0x147] sm:$0x1] %vm400_vm1, %v2595_v3  ;;  %418 = vst.msk [vmem:[#allocation2 + $0x167] sm:$0x1] %vm400_vm1, %v2595_v3  ;;  %v733_v19 = vld [vmem:[#allocation2 + $0x9] sm:$0xff]  ;;  %vm1666_vm7 = vcmask 228544  }
  0x18   : > { %419 = vst.msk [vmem:[#allocation2 + $0x187] sm:$0x1] %vm400_vm1, %v2595_v3  ;;  %420 = vst.msk [vmem:[#allocation2 + $0x1a7] sm:$0x1] %vm400_vm1, %v2595_v3  ;;  %v477_v24 = vld [vmem:[#allocation2 + $0xf] sm:$0xff]  ;;  %vm1859_vm8 = vcmask 261344  }
  0x19   : > { %421 = vst.msk [vmem:[#allocation2 + $0x1c7] sm:$0x1] %vm400_vm1, %v2595_v3  ;;  %422 = vst.msk [vmem:[#allocation2 + $0x1e7] sm:$0x1] %vm400_vm1, %v2595_v3  ;;  %v476_v22 = vld [vmem:[#allocation2 + $0x7] sm:$0xff]  ;;  %vm2052_vm9 = vcmask 294144  }
  0x1a   : > { %423 = vst.msk [vmem:[#allocation2 + $0x207] sm:$0x1] %vm400_vm1, %v2595_v3  ;;  %424 = vst.msk [vmem:[#allocation2 + $0x227] sm:$0x1] %vm400_vm1, %v2595_v3  ;;  %vm2124_vm10 = vcmask 293888   ;;  %vm2302_vm12 = vcmask 1043456  }
  0x1b   : > { %606 = vrot.lane.b32.xlu0 %v541_v5, %s2596_s30  ;;  %426 = vst.msk [vmem:[#allocation2 + $0x38] sm:$0x1] %vm400_vm1, %v2595_v3  ;;  %427 = vst.msk [vmem:[#allocation2 + $0x58] sm:$0x1] %vm400_vm1, %v2595_v3  ;;  %s2444_s28 = sshll.u32 %s3782_s25, 2  ;;  %vm2308_vm13 = vcmask 3072  }
  0x1c   : > { %428 = vst.msk [vmem:[#allocation2 + $0x78] sm:$0x1] %vm400_vm1, %v2595_v3  ;;  %429 = vst.msk [vmem:[#allocation2 + $0x98] sm:$0x1] %vm400_vm1, %v2595_v3  ;;  %s295_s9 = scalar_lea.vmem %s3773_s6, %s2444_s28  ;;  %s299_s11 = scalar_lea.vmem %s3774_s7, %s2444_s28 }
  0x1d   : > { %430 = vst.msk [vmem:[#allocation2 + $0xb8] sm:$0x1] %vm400_vm1, %v2595_v3  ;;  %431 = vst.msk [vmem:[#allocation2 + $0xd8] sm:$0x1] %vm400_vm1, %v2595_v3 }
  0x1e   : > { %432 = vst.msk [vmem:[#allocation2 + $0xf8] sm:$0x1] %vm400_vm1, %v2595_v3  ;;  %433 = vst.msk [vmem:[#allocation2 + $0x118] sm:$0x1] %vm400_vm1, %v2595_v3 }
  0x1f   : > { %434 = vst.msk [vmem:[#allocation2 + $0x138] sm:$0x1] %vm400_vm1, %v2595_v3  ;;  %435 = vst.msk [vmem:[#allocation2 + $0x158] sm:$0x1] %vm400_vm1, %v2595_v3  ;;  %797 = vrot.lane.b32.xlu0 %v733_v19, %s2598_s12 }
  0x20   : > { %436 = vst.msk [vmem:[#allocation2 + $0x178] sm:$0x1] %vm400_vm1, %v2595_v3  ;;  %437 = vst.msk [vmem:[#allocation2 + $0x198] sm:$0x1] %vm400_vm1, %v2595_v3 }
  0x21   : > { %438 = vst.msk [vmem:[#allocation2 + $0x1b8] sm:$0x1] %vm400_vm1, %v2595_v3  ;;  %439 = vst.msk [vmem:[#allocation2 + $0x1d8] sm:$0x1] %vm400_vm1, %v2595_v3 }
  0x22   : > { %440 = vst.msk [vmem:[#allocation2 + $0x1f8] sm:$0x1] %vm400_vm1, %v2595_v3  ;;  %441 = vst.msk [vmem:[#allocation2 + $0x218] sm:$0x1] %vm400_vm1, %v2595_v3 }
  0x23   : > { %425 = vst.msk [vmem:[#allocation2 + $0x18] sm:$0x1] %vm400_vm1, %v2595_v3  ;;  %442 = vst.msk [vmem:[#allocation2 + $0x238] sm:$0x1] %vm400_vm1, %v2595_v3 }
  0x24   : > { %508 = vst.msk [vmem:[#allocation3] sm:$0xff] %vm396_vm0, %v476_v22  ;;  %509 = vst.msk [vmem:[#allocation3 + $0x8] sm:$0xff] %vm396_vm0, %v477_v24 }
  0x25   : > { %vm3490_vm11 = vmpackc.low %vm2124_vm10, %vm2124_vm10 }
  0x2a   : > { %v734_v20 = vld [vmem:[#allocation2 + $0x11] sm:$0xff] }
  0x2b   : > { %799 = vrot.lane.b32.xlu0 %v734_v20, %s2598_s12 }
  0x8e   : > { %v305_v12 = vpop.permute.xlu0 %304 }
  0x8f   : > { %v312_v13 = vrot.slane %v305_v12, %v311_v11 }
  0x91   : > { %v314_v17 = vmul.f32 %v312_v13, %v300_v14 }
  0x92   : > { %v319_v15 = vpop.permute.xlu0 %318 }
  0x93   : > { %v326_v16 = vrot.slane %v319_v15, %v311_v11 }
  0x95   : > { %v328_v18 = vadd.f32 %v326_v16, %v314_v17 }
  0x96   : > { %v605_v23 = vpop.permute.xlu0 %604 }
  0x97   : > { %332 = vxpose.xlu1.b32.start.end [1/1] (short) %v328_v18, 128  ;;  %v330_v21 = vcombine.high %v328_v18, %v328_v18  ;;  %701 = vst.msk [vmem:[#allocation3] sm:$0xff] %vm700_vm2, %v605_v23 }
  0x9a   : > { %v607_v25 = vpop.permute.xlu0 %606 }
  0x9b   : > { %702 = vst.msk [vmem:[#allocation3 + $0x8] sm:$0xff] %vm700_vm2, %v607_v25 }
  0x9e   : > { %v798_v26 = vpop.permute.xlu0 %797 }
  0x9f   : > { %894 = vst.msk [vmem:[#allocation3] sm:$0xff] %vm893_vm3, %v798_v26 }
  0xa2   : > { %v800_v27 = vpop.permute.xlu0 %799 }
  0xa3   : > { %895 = vst.msk [vmem:[#allocation3 + $0x8] sm:$0xff] %vm893_vm3, %v800_v27 }
  0xd4   : > { %364 = vxpose.xlu1.b32.start.end [1/1] (short) %v330_v21, 128 }
  0xf2   : > { %2585 = vset.pattern.permute.xlu1 %v2594_v1 }
 0x117   : > { %v348_v28 = vpop.trf.xlu1 }
 0x118   : > { %444 = vst.msk [vmem:[#allocation2 + $0x28] sm:$0xff] %vm396_vm0, %v348_v28 }
 0x11b   : > { %v349_v29 = vpop.trf.xlu1 }
 0x11c   : > { %445 = vst.msk [vmem:[#allocation2 + $0x30] sm:$0xff] %vm396_vm0, %v349_v29 }
 0x11f   : > { %v350_v30 = vpop.trf.xlu1  ;;  %v542_v31 = vld [vmem:[#allocation2 + $0x28] sm:$0xff] }
 0x120   : > { %v926_v32 = vld [vmem:[#allocation2 + $0x27] sm:$0xff]  ;;  %446 = vst.msk [vmem:[#allocation2 + $0x48] sm:$0xff] %vm396_vm0, %v350_v30  ;;  %608 = vrot.lane.b32.xlu0 %v542_v31, %s2596_s30 }
 0x121   : > { %510 = vst.msk [vmem:[#allocation3 + $0x10] sm:$0xff] %vm396_vm0, %v926_v32 }
 0x123   : > { %v351_v33 = vpop.trf.xlu1  ;;  %v2773_v34 = vld [vmem:[#allocation2 + $0x2f] sm:$0xff] }
 0x124   : > { %447 = vst.msk [vmem:[#allocation2 + $0x50] sm:$0xff] %vm396_vm0, %v351_v33  ;;  %511 = vst.msk [vmem:[#allocation3 + $0x18] sm:$0xff] %vm396_vm0, %v2773_v34  ;;  %v543_v2 = vld [vmem:[#allocation2 + $0x30] sm:$0xff] }
 0x125   : > { %v1312_v5 = vld [vmem:[#allocation2 + $0x29] sm:$0xff]  ;;  %v736_v8 = vld [vmem:[#allocation2 + $0x31] sm:$0xff] }
 0x127   : > { %v352_v35 = vpop.trf.xlu1  ;;  %v2777_v36 = vld [vmem:[#allocation2 + $0x47] sm:$0xff] }
 0x128   : > { %448 = vst.msk [vmem:[#allocation2 + $0x68] sm:$0xff] %vm396_vm0, %v352_v35  ;;  %512 = vst.msk [vmem:[#allocation3 + $0x20] sm:$0xff] %vm396_vm0, %v2777_v36  ;;  %v1699_v16 = vld [vmem:[#allocation2 + $0x48] sm:$0xff] }
 0x12b   : > { %v353_v37 = vpop.trf.xlu1  ;;  %v2783_v38 = vld [vmem:[#allocation2 + $0x4f] sm:$0xff] }
 0x12c   : > { %449 = vst.msk [vmem:[#allocation2 + $0x70] sm:$0xff] %vm396_vm0, %v353_v37  ;;  %513 = vst.msk [vmem:[#allocation3 + $0x28] sm:$0xff] %vm396_vm0, %v2783_v38  ;;  %v1892_v30 = vld [vmem:[#allocation2 + $0x49] sm:$0xff] }
 0x12e   : > { %990 = vrot.lane.b32.xlu1 %v926_v32, %s2599_s13 }
 0x12f   : > { %v354_v39 = vpop.trf.xlu1  ;;  %v2788_v40 = vld [vmem:[#allocation2 + $0x67] sm:$0xff] }
 0x130   : > { %450 = vst.msk [vmem:[#allocation2 + $0x88] sm:$0xff] %vm396_vm0, %v354_v39  ;;  %514 = vst.msk [vmem:[#allocation3 + $0x30] sm:$0xff] %vm396_vm0, %v2788_v40 }
 0x132   : > { %1183 = vrot.lane.b32.xlu1 %v542_v31, %s2600_s14 }
 0x133   : > { %v355_v41 = vpop.trf.xlu1  ;;  %v2795_v42 = vld [vmem:[#allocation2 + $0x6f] sm:$0xff] }
 0x134   : > { %451 = vst.msk [vmem:[#allocation2 + $0x90] sm:$0xff] %vm396_vm0, %v355_v41  ;;  %515 = vst.msk [vmem:[#allocation3 + $0x38] sm:$0xff] %vm396_vm0, %v2795_v42  ;;  %v2939_v41 = vld [vmem:[#allocation2 + $0x68] sm:$0xff] }
 0x137   : > { %v356_v43 = vpop.trf.xlu1  ;;  %v2799_v44 = vld [vmem:[#allocation2 + $0x87] sm:$0xff] }
 0x138   : > { %452 = vst.msk [vmem:[#allocation2 + $0xa8] sm:$0xff] %vm396_vm0, %v356_v43  ;;  %516 = vst.msk [vmem:[#allocation3 + $0x40] sm:$0xff] %vm396_vm0, %v2799_v44 }
 0x13b   : > { %v357_v45 = vpop.trf.xlu1  ;;  %v2805_v46 = vld [vmem:[#allocation2 + $0x8f] sm:$0xff] }
 0x13c   : > { %453 = vst.msk [vmem:[#allocation2 + $0xb0] sm:$0xff] %vm396_vm0, %v357_v45  ;;  %517 = vst.msk [vmem:[#allocation3 + $0x48] sm:$0xff] %vm396_vm0, %v2805_v46 }
 0x13f   : > { %v358_v47 = vpop.trf.xlu1  ;;  %v2809_v48 = vld [vmem:[#allocation2 + $0xa7] sm:$0xff] }
 0x140   : > { %454 = vst.msk [vmem:[#allocation2 + $0xc8] sm:$0xff] %vm396_vm0, %v358_v47  ;;  %518 = vst.msk [vmem:[#allocation3 + $0x50] sm:$0xff] %vm396_vm0, %v2809_v48 }
 0x143   : > { %v359_v49 = vpop.trf.xlu1  ;;  %v2815_v50 = vld [vmem:[#allocation2 + $0xaf] sm:$0xff] }
 0x144   : > { %455 = vst.msk [vmem:[#allocation2 + $0xd0] sm:$0xff] %vm396_vm0, %v359_v49  ;;  %519 = vst.msk [vmem:[#allocation3 + $0x58] sm:$0xff] %vm396_vm0, %v2815_v50  ;;  %v2958_v49 = vld [vmem:[#allocation2 + $0x69] sm:$0xff] }
 0x147   : > { %v360_v51 = vpop.trf.xlu1  ;;  %v2819_v52 = vld [vmem:[#allocation2 + $0xc7] sm:$0xff] }
 0x148   : > { %456 = vst.msk [vmem:[#allocation2 + $0xe8] sm:$0xff] %vm396_vm0, %v360_v51  ;;  %520 = vst.msk [vmem:[#allocation3 + $0x60] sm:$0xff] %vm396_vm0, %v2819_v52  ;;  %v2963_v51 = vld [vmem:[#allocation2 + $0x89] sm:$0xff] }
 0x14b   : > { %v361_v53 = vpop.trf.xlu1  ;;  %v2825_v54 = vld [vmem:[#allocation2 + $0xcf] sm:$0xff] }
 0x14c   : > { %457 = vst.msk [vmem:[#allocation2 + $0xf0] sm:$0xff] %vm396_vm0, %v361_v53  ;;  %521 = vst.msk [vmem:[#allocation3 + $0x68] sm:$0xff] %vm396_vm0, %v2825_v54 }
 0x14f   : > { %v362_v55 = vpop.trf.xlu1  ;;  %v2829_v56 = vld [vmem:[#allocation2 + $0xe7] sm:$0xff] }
 0x150   : > { %458 = vst.msk [vmem:[#allocation2 + $0x108] sm:$0xff] %vm396_vm0, %v362_v55  ;;  %522 = vst.msk [vmem:[#allocation3 + $0x70] sm:$0xff] %vm396_vm0, %v2829_v56  ;;  %v2968_v55 = vld [vmem:[#allocation2 + $0xa9] sm:$0xff] }
 0x153   : > { %v363_v57 = vpop.trf.xlu1  ;;  %v491_v58 = vld [vmem:[#allocation2 + $0xef] sm:$0xff] }
 0x154   : > { %459 = vst.msk [vmem:[#allocation2 + $0x110] sm:$0xff] %vm396_vm0, %v363_v57  ;;  %523 = vst.msk [vmem:[#allocation3 + $0x78] sm:$0xff] %vm396_vm0, %v491_v58  ;;  %v2981_v58 = vld [vmem:[#allocation2 + $0xc9] sm:$0xff] }
 0x157   : > { %v380_v59 = vpop.trf.xlu1  ;;  %v2836_v60 = vld [vmem:[#allocation2 + $0x107] sm:$0xff] }
 0x158   : > { %460 = vst.msk [vmem:[#allocation2 + $0x128] sm:$0xff] %vm396_vm0, %v380_v59  ;;  %524 = vst.msk [vmem:[#allocation3 + $0x80] sm:$0xff] %vm396_vm0, %v2836_v60  ;;  %v555_v59 = vld [vmem:[#allocation2 + $0xf0] sm:$0xff] }
 0x15b   : > { %v381_v61 = vpop.trf.xlu1  ;;  %v2842_v62 = vld [vmem:[#allocation2 + $0x10f] sm:$0xff] }
 0x15c   : > { %461 = vst.msk [vmem:[#allocation2 + $0x130] sm:$0xff] %vm396_vm0, %v381_v61  ;;  %3777 = vst [vmem:[#allocation4_spill] sm:$0xff] %v2842_v62 }
 0x15d   : > { %525 = vst.msk [vmem:[#allocation3 + $0x88] sm:$0xff] %vm396_vm0, %v2842_v62 }
 0x15f   : > { %v942_v63 = vld [vmem:[#allocation2 + $0x127] sm:$0xff]  ;;  %v382_v1 = vpop.trf.xlu1 }
 0x160   : > { %v558_v0 = vld [vmem:[#allocation2 + $0x128] sm:$0xff]  ;;  %1022 = vrot.lane.b32.xlu1 %v942_v63, %s2599_s13  ;;  %462 = vst.msk [vmem:[#allocation2 + $0x148] sm:$0xff] %vm396_vm0, %v382_v1  ;;  %526 = vst.msk [vmem:[#allocation3 + $0x90] sm:$0xff] %vm396_vm0, %v942_v63 }
 0x161   : > { %640 = vrot.lane.b32.xlu0 %v558_v0, %s2596_s30  ;;  %v2991_v63 = vld [vmem:[#allocation2 + $0xe9] sm:$0xff] }
 0x162   : > { %v749_v1 = vld [vmem:[#allocation2 + $0x109] sm:$0xff] }
 0x163   : > { %v383_v3 = vpop.trf.xlu1  ;;  %v943_v4 = vld [vmem:[#allocation2 + $0x12f] sm:$0xff] }
 0x164   : > { %1215 = vrot.lane.b32.xlu1 %v558_v0, %s2600_s14  ;;  %463 = vst.msk [vmem:[#allocation2 + $0x150] sm:$0xff] %vm396_vm0, %v383_v3  ;;  %527 = vst.msk [vmem:[#allocation3 + $0x98] sm:$0xff] %vm396_vm0, %v943_v4  ;;  %v751_v9 = vld [vmem:[#allocation2 + $0x129] sm:$0xff]  ;;  %v752_v21 = vld [vmem:[#allocation2 + $0x131] sm:$0xff] }
 0x165   : > { %610 = vrot.lane.b32.xlu0 %v543_v2, %s2596_s30  ;;  %v559_v19 = vld [vmem:[#allocation2 + $0x130] sm:$0xff] }
 0x167   : > { %v384_v6 = vpop.trf.xlu1  ;;  %v1522_v7 = vld [vmem:[#allocation2 + $0x147] sm:$0xff] }
 0x168   : > { %1376 = vrot.lane.b32.xlu1 %v1312_v5, %s2601_s15  ;;  %464 = vst.msk [vmem:[#allocation2 + $0x168] sm:$0xff] %vm396_vm0, %v384_v6  ;;  %528 = vst.msk [vmem:[#allocation3 + $0xa0] sm:$0xff] %vm396_vm0, %v1522_v7  ;;  %v1715_v25 = vld [vmem:[#allocation2 + $0x148] sm:$0xff] }
 0x169   : > { %801 = vrot.lane.b32.xlu0 %v1312_v5, %s2598_s12 }
 0x16b   : > { %v385_v10 = vpop.trf.xlu1  ;;  %v2858_v11 = vld [vmem:[#allocation2 + $0x14f] sm:$0xff] }
 0x16c   : > { %833 = vrot.lane.b32.xlu1 %v751_v9, %s2598_s12  ;;  %465 = vst.msk [vmem:[#allocation2 + $0x170] sm:$0xff] %vm396_vm0, %v385_v10  ;;  %529 = vst.msk [vmem:[#allocation3 + $0xa8] sm:$0xff] %vm396_vm0, %v2858_v11  ;;  %v2925_v35 = vld [vmem:[#allocation2 + $0x149] sm:$0xff]  ;;  %v2989_v61 = vld [vmem:[#allocation2 + $0x151] sm:$0xff] }
 0x16d   : > { %803 = vrot.lane.b32.xlu0 %v736_v8, %s2598_s12  ;;  %v561_v53 = vld [vmem:[#allocation2 + $0x150] sm:$0xff] }
 0x16e   : > { %v3026_v10 = vld [vmem:[#allocation2 + $0x70] sm:$0xff] }
 0x16f   : > { %v386_v12 = vpop.trf.xlu1  ;;  %v2865_v13 = vld [vmem:[#allocation2 + $0x167] sm:$0xff] }
 0x170   : > { %1408 = vrot.lane.b32.xlu1 %v751_v9, %s2601_s15  ;;  %466 = vst.msk [vmem:[#allocation2 + $0x188] sm:$0xff] %vm396_vm0, %v386_v12  ;;  %530 = vst.msk [vmem:[#allocation3 + $0xb0] sm:$0xff] %vm396_vm0, %v2865_v13  ;;  %v1717_v47 = vld [vmem:[#allocation2 + $0x168] sm:$0xff] }
 0x171   : > { %992 = vrot.lane.b32.xlu0 %v2773_v34, %s2599_s13  ;;  %v545_v34 = vld [vmem:[#allocation2 + $0x50] sm:$0xff] }
 0x173   : > { %v387_v14 = vpop.trf.xlu1  ;;  %v2873_v15 = vld [vmem:[#allocation2 + $0x16f] sm:$0xff] }
 0x174   : > { %1570 = vrot.lane.b32.xlu1 %v2777_v36, %s2602_s16  ;;  %467 = vst.msk [vmem:[#allocation2 + $0x190] sm:$0xff] %vm396_vm0, %v387_v14  ;;  %531 = vst.msk [vmem:[#allocation3 + $0xb8] sm:$0xff] %vm396_vm0, %v2873_v15  ;;  %v2997_v0 = vld [vmem:[#allocation2 + $0x169] sm:$0xff] }
 0x175   : > { %1185 = vrot.lane.b32.xlu0 %v543_v2, %s2600_s14 }
 0x177   : > { %v388_v17 = vpop.trf.xlu1  ;;  %v2881_v18 = vld [vmem:[#allocation2 + $0x187] sm:$0xff] }
 0x178   : > { %1763 = vrot.lane.b32.xlu1 %v1699_v16, %s2603_s17  ;;  %468 = vst.msk [vmem:[#allocation2 + $0x1a8] sm:$0xff] %vm396_vm0, %v388_v17  ;;  %532 = vst.msk [vmem:[#allocation3 + $0xc0] sm:$0xff] %vm396_vm0, %v2881_v18 }
 0x179   : > { %1378 = vrot.lane.b32.xlu0 %v736_v8, %s2601_s15 }
 0x17b   : > { %v389_v20 = vpop.trf.xlu1  ;;  %v2895_v23 = vld [vmem:[#allocation2 + $0x18f] sm:$0xff] }
 0x17c   : > { %994 = vrot.lane.b32.xlu1 %v2777_v36, %s2599_s13  ;;  %469 = vst.msk [vmem:[#allocation2 + $0x1b0] sm:$0xff] %vm396_vm0, %v389_v20  ;;  %533 = vst.msk [vmem:[#allocation3 + $0xc8] sm:$0xff] %vm396_vm0, %v2895_v23  ;;  %v738_v36 = vld [vmem:[#allocation2 + $0x51] sm:$0xff] }
 0x17d   : > { %642 = vrot.lane.b32.xlu0 %v559_v19, %s2596_s30 }
 0x17f   : > { %v390_v22 = vpop.trf.xlu1  ;;  %v2915_v32 = vld [vmem:[#allocation2 + $0x1a7] sm:$0xff] }
 0x180   : > { %1187 = vrot.lane.b32.xlu1 %v1699_v16, %s2600_s14  ;;  %470 = vst.msk [vmem:[#allocation2 + $0x1c8] sm:$0xff] %vm396_vm0, %v390_v22  ;;  %534 = vst.msk [vmem:[#allocation3 + $0xd0] sm:$0xff] %vm396_vm0, %v2915_v32 }
 0x181   : > { %835 = vrot.lane.b32.xlu0 %v752_v21, %s2598_s12 }
 0x183   : > { %v391_v24 = vpop.trf.xlu1  ;;  %v2917_v33 = vld [vmem:[#allocation2 + $0x1af] sm:$0xff] }
 0x184   : > { %1602 = vrot.lane.b32.xlu1 %v1522_v7, %s2602_s16  ;;  %471 = vst.msk [vmem:[#allocation2 + $0x1d0] sm:$0xff] %vm396_vm0, %v391_v24  ;;  %535 = vst.msk [vmem:[#allocation3 + $0xd8] sm:$0xff] %vm396_vm0, %v2917_v33 }
 0x185   : > { %1024 = vrot.lane.b32.xlu0 %v943_v4, %s2599_s13 }
 0x187   : > { %v392_v26 = vpop.trf.xlu1  ;;  %v2944_v43 = vld [vmem:[#allocation2 + $0x1c7] sm:$0xff] }
 0x188   : > { %1795 = vrot.lane.b32.xlu1 %v1715_v25, %s2603_s17  ;;  %472 = vst.msk [vmem:[#allocation2 + $0x1e8] sm:$0xff] %vm396_vm0, %v392_v26  ;;  %536 = vst.msk [vmem:[#allocation3 + $0xe0] sm:$0xff] %vm396_vm0, %v2944_v43 }
 0x189   : > { %1217 = vrot.lane.b32.xlu0 %v559_v19, %s2600_s14  ;;  %v3052_v19 = vld [vmem:[#allocation2 + $0x170] sm:$0xff] }
 0x18b   : > { %v393_v27 = vpop.trf.xlu1  ;;  %v2946_v45 = vld [vmem:[#allocation2 + $0x1cf] sm:$0xff] }
 0x18c   : > { %1026 = vrot.lane.b32.xlu1 %v1522_v7, %s2599_s13  ;;  %473 = vst.msk [vmem:[#allocation2 + $0x1f0] sm:$0xff] %vm396_vm0, %v393_v27  ;;  %537 = vst.msk [vmem:[#allocation3 + $0xe8] sm:$0xff] %vm396_vm0, %v2946_v45  ;;  %v1719_v27 = vld [vmem:[#allocation2 + $0x188] sm:$0xff] }
 0x18d   : > { %1410 = vrot.lane.b32.xlu0 %v752_v21, %s2601_s15 }
 0x18f   : > { %v394_v28 = vpop.trf.xlu1 }
 0x190   : > { %1219 = vrot.lane.b32.xlu1 %v1715_v25, %s2600_s14  ;;  %474 = vst.msk [vmem:[#allocation2 + $0x208] sm:$0xff] %vm396_vm0, %v394_v28 }
 0x191   : > { %612 = vrot.lane.b32.xlu0 %v1699_v16, %s2596_s30 }
 0x192   : > { %v609_v29 = vpop.permute.xlu0 %608 }
 0x193   : > { %703 = vst.msk [vmem:[#allocation3 + $0x10] sm:$0xff] %vm700_vm2, %v609_v29  ;;  %v395_v31 = vpop.trf.xlu1  ;;  %v2975_v57 = vld [vmem:[#allocation2 + $0x1ef] sm:$0xff] }
 0x194   : > { %1956 = vrot.lane.b32.xlu1 %v1892_v30, %s2604_s18  ;;  %475 = vst.msk [vmem:[#allocation2 + $0x210] sm:$0xff] %vm396_vm0, %v395_v31  ;;  %539 = vst.msk [vmem:[#allocation3 + $0xf8] sm:$0xff] %vm396_vm0, %v2975_v57 }
 0x195   : > { %644 = vrot.lane.b32.xlu0 %v1715_v25, %s2596_s30 }
 0x198   : > { %1380 = vrot.lane.b32.xlu1 %v1892_v30, %s2601_s15 }
 0x199   : > { %614 = vrot.lane.b32.xlu0 %v545_v34, %s2596_s30 }
 0x19c   : > { %1988 = vrot.lane.b32.xlu1 %v2925_v35, %s2604_s18 }
 0x19d   : > { %805 = vrot.lane.b32.xlu0 %v1892_v30, %s2598_s12  ;;  %v548_v30 = vld [vmem:[#allocation2 + $0x88] sm:$0xff] }
 0x1a0   : > { %1412 = vrot.lane.b32.xlu1 %v2925_v35, %s2601_s15  ;;  %v991_v37 = vpop.permute.xlu1 %990 }
 0x1a1   : > { %807 = vrot.lane.b32.xlu0 %v738_v36, %s2598_s12  ;;  %1087 = vst.msk [vmem:[#allocation3] sm:$0xff] %vm1086_vm4, %v991_v37  ;;  %v3087_v37 = vld [vmem:[#allocation2 + $0x90] sm:$0xff] }
 0x1a4   : > { %1574 = vrot.lane.b32.xlu1 %v2788_v40, %s2602_s16  ;;  %v1184_v39 = vpop.permute.xlu1 %1183 }
 0x1a5   : > { %1572 = vrot.lane.b32.xlu0 %v2783_v38, %s2602_s16  ;;  %1280 = vst.msk [vmem:[#allocation3] sm:$0xff] %vm1279_vm5, %v1184_v39  ;;  %v3089_v39 = vld [vmem:[#allocation2 + $0x189] sm:$0xff] }
 0x1a8   : > { %1767 = vrot.lane.b32.xlu1 %v2939_v41, %s2603_s17 }
 0x1a9   : > { %1765 = vrot.lane.b32.xlu0 %v545_v34, %s2603_s17 }
 0x1ac   : > { %1606 = vrot.lane.b32.xlu1 %v2865_v13, %s2602_s16 }
 0x1ad   : > { %1958 = vrot.lane.b32.xlu0 %v738_v36, %s2604_s18 }
 0x1b0   : > { %1799 = vrot.lane.b32.xlu1 %v1717_v47, %s2603_s17 }
 0x1b1   : > { %996 = vrot.lane.b32.xlu0 %v2783_v38, %s2599_s13  ;;  %v2973_v38 = vld [vmem:[#allocation2 + $0x1e7] sm:$0xff] }
 0x1b2   : > { %538 = vst.msk [vmem:[#allocation3 + $0xf0] sm:$0xff] %vm396_vm0, %v2973_v38 }
 0x1b4   : > { %809 = vrot.lane.b32.xlu1 %v2958_v49, %s2598_s12 }
 0x1b5   : > { %1189 = vrot.lane.b32.xlu0 %v545_v34, %s2600_s14 }
 0x1b8   : > { %813 = vrot.lane.b32.xlu1 %v2963_v51, %s2598_s12 }
 0x1b9   : > { %1382 = vrot.lane.b32.xlu0 %v738_v36, %s2601_s15 }
 0x1bc   : > { %817 = vrot.lane.b32.xlu1 %v2968_v55, %s2598_s12 }
 0x1bd   : > { %646 = vrot.lane.b32.xlu0 %v561_v53, %s2596_s30 }
 0x1c0   : > { %821 = vrot.lane.b32.xlu1 %v2981_v58, %s2598_s12 }
 0x1c1   : > { %1604 = vrot.lane.b32.xlu0 %v2858_v11, %s2602_s16 }
 0x1c4   : > { %634 = vrot.lane.b32.xlu1 %v555_v59, %s2596_s30 }
 0x1c5   : > { %1797 = vrot.lane.b32.xlu0 %v561_v53, %s2603_s17 }
 0x1c8   : > { %825 = vrot.lane.b32.xlu1 %v2991_v63, %s2598_s12 }
 0x1c9   : > { %1990 = vrot.lane.b32.xlu0 %v2989_v61, %s2604_s18 }
 0x1cc   : > { %1992 = vrot.lane.b32.xlu1 %v2997_v0, %s2604_s18 }
 0x1cd   : > { %1028 = vrot.lane.b32.xlu0 %v2858_v11, %s2599_s13 }
 0x1d0   : > { %829 = vrot.lane.b32.xlu1 %v749_v1, %s2598_s12 }
 0x1d1   : > { %1221 = vrot.lane.b32.xlu0 %v561_v53, %s2600_s14  ;;  %v3103_v53 = vld [vmem:[#allocation2 + $0x190] sm:$0xff] }
 0x1d2   : > { %v3005_v3 = vpop.permute.xlu1 %1022 }
 0x1d3   : > { %v641_v2 = vpop.permute.xlu0 %640 }
 0x1d4   : > { %719 = vst.msk [vmem:[#allocation3 + $0x90] sm:$0xff] %vm700_vm2, %v641_v2  ;;  %1960 = vrot.lane.b32.xlu1 %v2958_v49, %s2604_s18 }
 0x1d5   : > { %1414 = vrot.lane.b32.xlu0 %v2989_v61, %s2601_s15 }
 0x1d6   : > { %v3012_v5 = vpop.permute.xlu1 %1215 }
 0x1d7   : > { %v611_v4 = vpop.permute.xlu0 %610 }
 0x1d8   : > { %704 = vst.msk [vmem:[#allocation3 + $0x18] sm:$0xff] %vm700_vm2, %v611_v4  ;;  %837 = vrot.lane.b32.xlu1 %v2925_v35, %s2598_s12 }
 0x1d9   : > { %616 = vrot.lane.b32.xlu0 %v2939_v41, %s2596_s30 }
 0x1da   : > { %v1377_v7 = vpop.permute.xlu1 %1376 }
 0x1db   : > { %v802_v6 = vpop.permute.xlu0 %801  ;;  %1473 = vst.msk [vmem:[#allocation3] sm:$0xff] %vm1472_vm6, %v1377_v7  ;;  %v3120_v7 = vld [vmem:[#allocation2 + $0x1a8] sm:$0xff] }
 0x1dc   : > { %896 = vst.msk [vmem:[#allocation3 + $0x10] sm:$0xff] %vm893_vm3, %v802_v6  ;;  %1030 = vrot.lane.b32.xlu1 %v2865_v13, %s2599_s13  ;;  %v3035_v13 = vld [vmem:[#allocation2 + $0x71] sm:$0xff]  ;;  %v3114_v6 = vld [vmem:[#allocation2 + $0xa8] sm:$0xff] }
 0x1dd   : > { %648 = vrot.lane.b32.xlu0 %v1717_v47, %s2596_s30 }
 0x1de   : > { %v834_v9 = vpop.permute.xlu1 %833 }
 0x1df   : > { %v804_v8 = vpop.permute.xlu0 %803  ;;  %912 = vst.msk [vmem:[#allocation3 + $0x90] sm:$0xff] %vm893_vm3, %v834_v9 }
 0x1e0   : > { %897 = vst.msk [vmem:[#allocation3 + $0x18] sm:$0xff] %vm893_vm3, %v804_v8  ;;  %998 = vrot.lane.b32.xlu1 %v2788_v40, %s2599_s13 }
 0x1e1   : > { %618 = vrot.lane.b32.xlu0 %v3026_v10, %s2596_s30 }
 0x1e2   : > { %v3032_v12 = vpop.permute.xlu1 %1408 }
 0x1e3   : > { %v993_v11 = vpop.permute.xlu0 %992 }
 0x1e4   : > { %1088 = vst.msk [vmem:[#allocation3 + $0x8] sm:$0xff] %vm1086_vm4, %v993_v11  ;;  %1223 = vrot.lane.b32.xlu1 %v1717_v47, %s2600_s14 }
 0x1e5   : > { %811 = vrot.lane.b32.xlu0 %v3035_v13, %s2598_s12 }
 0x1e6   : > { %v1571_v16 = vpop.permute.xlu1 %1570 }
 0x1e7   : > { %v1186_v14 = vpop.permute.xlu0 %1185  ;;  %1667 = vst.msk [vmem:[#allocation3] sm:$0xff] %vm1666_vm7, %v1571_v16 }
 0x1e8   : > { %1281 = vst.msk [vmem:[#allocation3 + $0x8] sm:$0xff] %vm1279_vm5, %v1186_v14  ;;  %1191 = vrot.lane.b32.xlu1 %v2939_v41, %s2600_s14 }
 0x1e9   : > { %1576 = vrot.lane.b32.xlu0 %v2795_v42, %s2602_s16 }
 0x1ea   : > { %v1764_v17 = vpop.permute.xlu1 %1763 }
 0x1eb   : > { %v1379_v40 = vpop.permute.xlu0 %1378  ;;  %1860 = vst.msk [vmem:[#allocation3] sm:$0xff] %vm1859_vm8, %v1764_v17 }
 0x1ec   : > { %1474 = vst.msk [vmem:[#allocation3 + $0x8] sm:$0xff] %vm1472_vm6, %v1379_v40  ;;  %1416 = vrot.lane.b32.xlu1 %v2997_v0, %s2601_s15  ;;  %v3142_v40 = vld [vmem:[#allocation2 + $0x1b0] sm:$0xff] }
 0x1ed   : > { %1769 = vrot.lane.b32.xlu0 %v3026_v10, %s2603_s17 }
 0x1ee   : > { %v995_v21 = vpop.permute.xlu1 %994 }
 0x1ef   : > { %v643_v20 = vpop.permute.xlu0 %642  ;;  %1089 = vst.msk [vmem:[#allocation3 + $0x10] sm:$0xff] %vm1086_vm4, %v995_v21 }
 0x1f0   : > { %720 = vst.msk [vmem:[#allocation3 + $0x98] sm:$0xff] %vm700_vm2, %v643_v20  ;;  %1384 = vrot.lane.b32.xlu1 %v2958_v49, %s2601_s15  ;;  %v3097_v49 = vld [vmem:[#allocation2 + $0x91] sm:$0xff] }
 0x1f1   : > { %650 = vrot.lane.b32.xlu0 %v3052_v19, %s2596_s30 }
 0x1f2   : > { %v1188_v24 = vpop.permute.xlu1 %1187 }
 0x1f3   : > { %v836_v22 = vpop.permute.xlu0 %835  ;;  %1282 = vst.msk [vmem:[#allocation3 + $0x10] sm:$0xff] %vm1279_vm5, %v1188_v24  ;;  %v3152_v24 = vld [vmem:[#allocation2 + $0xc8] sm:$0xff] }
 0x1f4   : > { %913 = vst.msk [vmem:[#allocation3 + $0x98] sm:$0xff] %vm893_vm3, %v836_v22  ;;  %1610 = vrot.lane.b32.xlu1 %v2881_v18, %s2602_s16 }
 0x1f5   : > { %1608 = vrot.lane.b32.xlu0 %v2873_v15, %s2602_s16 }
 0x1f6   : > { %v3068_v26 = vpop.permute.xlu1 %1602 }
 0x1f7   : > { %v3066_v25 = vpop.permute.xlu0 %1024 }
 0x1f8   : > { %1578 = vrot.lane.b32.xlu1 %v2799_v44, %s2602_s16 }
 0x1f9   : > { %1801 = vrot.lane.b32.xlu0 %v3052_v19, %s2603_s17 }
 0x1fa   : > { %v3076_v29 = vpop.permute.xlu1 %1795 }
 0x1fb   : > { %v3074_v28 = vpop.permute.xlu0 %1217 }
 0x1fc   : > { %1803 = vrot.lane.b32.xlu1 %v1719_v27, %s2603_s17 }
 0x1fd   : > { %620 = vrot.lane.b32.xlu0 %v548_v30, %s2596_s30 }
 0x1fe   : > { %v1027_v34 = vpop.permute.xlu1 %1026 }
 0x1ff   : > { %v3080_v31 = vpop.permute.xlu0 %1410  ;;  %1105 = vst.msk [vmem:[#allocation3 + $0x90] sm:$0xff] %vm1086_vm4, %v1027_v34 }
 0x200   : > { %1771 = vrot.lane.b32.xlu1 %v548_v30, %s2603_s17 }
 0x201   : > { %652 = vrot.lane.b32.xlu0 %v1719_v27, %s2596_s30 }
 0x202   : > { %v1220_v36 = vpop.permute.xlu1 %1219 }
 0x203   : > { %v613_v35 = vpop.permute.xlu0 %612  ;;  %1298 = vst.msk [vmem:[#allocation3 + $0x90] sm:$0xff] %vm1279_vm5, %v1220_v36 }
 0x204   : > { %705 = vst.msk [vmem:[#allocation3 + $0x20] sm:$0xff] %vm700_vm2, %v613_v35  ;;  %1996 = vrot.lane.b32.xlu1 %v3089_v39, %s2604_s18 }
 0x205   : > { %622 = vrot.lane.b32.xlu0 %v3087_v37, %s2596_s30 }
 0x206   : > { %v1957_v47 = vpop.permute.xlu1 %1956 }
 0x207   : > { %v645_v41 = vpop.permute.xlu0 %644  ;;  %2053 = vst.msk [vmem:[#allocation3] sm:$0xff] %vm2052_vm9, %v1957_v47 }
 0x208   : > { %721 = vst.msk [vmem:[#allocation3 + $0xa0] sm:$0xff] %vm700_vm2, %v645_v41  ;;  %1964 = vrot.lane.b32.xlu1 %v2963_v51, %s2604_s18  ;;  %v3168_v41 = vld [vmem:[#allocation2 + $0xd0] sm:$0xff] }
 0x209   : > { %815 = vrot.lane.b32.xlu0 %v3097_v49, %s2598_s12 }
 0x20a   : > { %v1381_v1 = vpop.permute.xlu1 %1380 }
 0x20b   : > { %v615_v59 = vpop.permute.xlu0 %614  ;;  %1475 = vst.msk [vmem:[#allocation3 + $0x10] sm:$0xff] %vm1472_vm6, %v1381_v1  ;;  %v3183_v1 = vld [vmem:[#allocation2 + $0x1d0] sm:$0xff] }
 0x20c   : > { %706 = vst.msk [vmem:[#allocation3 + $0x28] sm:$0xff] %vm700_vm2, %v615_v59  ;;  %841 = vrot.lane.b32.xlu1 %v2997_v0, %s2598_s12  ;;  %v3177_v59 = vld [vmem:[#allocation2 + $0xd1] sm:$0xff] }
 0x20d   : > { %654 = vrot.lane.b32.xlu0 %v3103_v53, %s2596_s30 }
 0x20e   : > { %v3111_v4 = vpop.permute.xlu1 %1988 }
 0x20f   : > { %v806_v2 = vpop.permute.xlu0 %805 }
 0x210   : > { %898 = vst.msk [vmem:[#allocation3 + $0x20] sm:$0xff] %vm893_vm3, %v806_v2  ;;  %1034 = vrot.lane.b32.xlu1 %v2881_v18, %s2599_s13  ;;  %v3130_v18 = vld [vmem:[#allocation2 + $0xb0] sm:$0xff] }
 0x211   : > { %624 = vrot.lane.b32.xlu0 %v3114_v6, %s2596_s30 }
 0x212   : > { %v1413_v9 = vpop.permute.xlu1 %1412 }
 0x213   : > { %v808_v8 = vpop.permute.xlu0 %807  ;;  %1491 = vst.msk [vmem:[#allocation3 + $0x90] sm:$0xff] %vm1472_vm6, %v1413_v9 }
 0x214   : > { %899 = vst.msk [vmem:[#allocation3 + $0x28] sm:$0xff] %vm893_vm3, %v808_v8  ;;  %1002 = vrot.lane.b32.xlu1 %v2799_v44, %s2599_s13  ;;  %v3137_v44 = vld [vmem:[#allocation2 + $0xb1] sm:$0xff] }
 0x215   : > { %656 = vrot.lane.b32.xlu0 %v3120_v7, %s2596_s30 }
 0x216   : > { %v1575_v11 = vpop.permute.xlu1 %1574 }
 0x217   : > { %v1573_v0 = vpop.permute.xlu0 %1572  ;;  %1669 = vst.msk [vmem:[#allocation3 + $0x10] sm:$0xff] %vm1666_vm7, %v1575_v11  ;;  %v3196_v11 = vld [vmem:[#allocation2 + $0xe8] sm:$0xff] }
 0x218   : > { %1668 = vst.msk [vmem:[#allocation3 + $0x8] sm:$0xff] %vm1666_vm7, %v1573_v0  ;;  %1227 = vrot.lane.b32.xlu1 %v1719_v27, %s2600_s14  ;;  %v3158_v27 = vld [vmem:[#allocation2 + $0x1c8] sm:$0xff] }
 0x219   : > { %626 = vrot.lane.b32.xlu0 %v3130_v18, %s2596_s30 }
 0x21a   : > { %v1768_v16 = vpop.permute.xlu1 %1767 }
 0x21b   : > { %v1766_v14 = vpop.permute.xlu0 %1765  ;;  %1862 = vst.msk [vmem:[#allocation3 + $0x10] sm:$0xff] %vm1859_vm8, %v1768_v16  ;;  %v3204_v16 = vld [vmem:[#allocation2 + $0x1e8] sm:$0xff] }
 0x21c   : > { %1861 = vst.msk [vmem:[#allocation3 + $0x8] sm:$0xff] %vm1859_vm8, %v1766_v14  ;;  %1195 = vrot.lane.b32.xlu1 %v548_v30, %s2600_s14  ;;  %v3198_v14 = vld [vmem:[#allocation2 + $0x1a9] sm:$0xff] }
 0x21d   : > { %819 = vrot.lane.b32.xlu0 %v3137_v44, %s2598_s12 }
 0x21e   : > { %v1607_v20 = vpop.permute.xlu1 %1606 }
 0x21f   : > { %v1959_v17 = vpop.permute.xlu0 %1958  ;;  %1685 = vst.msk [vmem:[#allocation3 + $0x90] sm:$0xff] %vm1666_vm7, %v1607_v20 }
 0x220   : > { %2054 = vst.msk [vmem:[#allocation3 + $0x8] sm:$0xff] %vm2052_vm9, %v1959_v17  ;;  %1420 = vrot.lane.b32.xlu1 %v3089_v39, %s2601_s15 }
 0x221   : > { %658 = vrot.lane.b32.xlu0 %v3142_v40, %s2596_s30 }
 0x222   : > { %v1800_v22 = vpop.permute.xlu1 %1799 }
 0x223   : > { %v997_v21 = vpop.permute.xlu0 %996  ;;  %1878 = vst.msk [vmem:[#allocation3 + $0x90] sm:$0xff] %vm1859_vm8, %v1800_v22 }
 0x224   : > { %1090 = vst.msk [vmem:[#allocation3 + $0x18] sm:$0xff] %vm1086_vm4, %v997_v21  ;;  %1388 = vrot.lane.b32.xlu1 %v2963_v51, %s2601_s15 }
 0x225   : > { %628 = vrot.lane.b32.xlu0 %v3152_v24, %s2596_s30 }
 0x226   : > { %v810_v34 = vpop.permute.xlu1 %809 }
 0x227   : > { %v1190_v30 = vpop.permute.xlu0 %1189 }
 0x228   : > { %1283 = vst.msk [vmem:[#allocation3 + $0x18] sm:$0xff] %vm1279_vm5, %v1190_v30  ;;  %1614 = vrot.lane.b32.xlu1 %v2915_v32, %s2602_s16  ;;  %v3216_v30 = vld [vmem:[#allocation2 + $0x171] sm:$0xff] }
 0x229   : > { %660 = vrot.lane.b32.xlu0 %v3158_v27, %s2596_s30 }
 0x22a   : > { %v3165_v36 = vpop.permute.xlu1 %813 }
 0x22b   : > { %v1383_v35 = vpop.permute.xlu0 %1382 }
 0x22c   : > { %1476 = vst.msk [vmem:[#allocation3 + $0x18] sm:$0xff] %vm1472_vm6, %v1383_v35  ;;  %1582 = vrot.lane.b32.xlu1 %v2809_v48, %s2602_s16 }
 0x22d   : > { %630 = vrot.lane.b32.xlu0 %v3168_v41, %s2596_s30 }
 0x22e   : > { %v3174_v47 = vpop.permute.xlu1 %817 }
 0x22f   : > { %v647_v51 = vpop.permute.xlu0 %646 }
 0x230   : > { %722 = vst.msk [vmem:[#allocation3 + $0xa8] sm:$0xff] %vm700_vm2, %v647_v51  ;;  %1807 = vrot.lane.b32.xlu1 %v3120_v7, %s2603_s17 }
 0x231   : > { %823 = vrot.lane.b32.xlu0 %v3177_v59, %s2598_s12 }
 0x232   : > { %v3187_v8 = vpop.permute.xlu1 %821 }
 0x233   : > { %v3185_v2 = vpop.permute.xlu0 %1604 }
 0x234   : > { %1775 = vrot.lane.b32.xlu1 %v3114_v6, %s2603_s17 }
 0x235   : > { %662 = vrot.lane.b32.xlu0 %v3183_v1, %s2596_s30 }
 0x236   : > { %v635_v0 = vpop.permute.xlu1 %634 }
 0x237   : > { %v3193_v9 = vpop.permute.xlu0 %1797  ;;  %716 = vst.msk [vmem:[#allocation3 + $0x78] sm:$0xff] %vm700_vm2, %v635_v0  ;;  %v748_v0 = vld [vmem:[#allocation2 + $0xf1] sm:$0xff] }
 0x238   : > { %2000 = vrot.lane.b32.xlu1 %v3198_v14, %s2604_s18 }
 0x239   : > { %632 = vrot.lane.b32.xlu0 %v3196_v11, %s2596_s30 }
 0x23a   : > { %v3208_v20 = vpop.permute.xlu1 %825 }
 0x23b   : > { %v3206_v17 = vpop.permute.xlu0 %1990 }
 0x23c   : > { %1968 = vrot.lane.b32.xlu1 %v2968_v55, %s2604_s18 }
 0x23d   : > { %664 = vrot.lane.b32.xlu0 %v3204_v16, %s2596_s30 }
 0x23e   : > { %v1993_v22 = vpop.permute.xlu1 %1992 }
 0x23f   : > { %v1029_v21 = vpop.permute.xlu0 %1028  ;;  %2071 = vst.msk [vmem:[#allocation3 + $0x90] sm:$0xff] %vm2052_vm9, %v1993_v22 }
 0x240   : > { %1106 = vst.msk [vmem:[#allocation3 + $0x98] sm:$0xff] %vm1086_vm4, %v1029_v21  ;;  %845 = vrot.lane.b32.xlu1 %v3089_v39, %s2598_s12  ;;  %v3228_v21 = vld [vmem:[#allocation2 + $0x1f0] sm:$0xff] }
 0x241   : > { %1994 = vrot.lane.b32.xlu0 %v3216_v30, %s2604_s18 }
 0x242   : > { %v3222_v51 = vpop.permute.xlu1 %829 }
 0x243   : > { %v1222_v35 = vpop.permute.xlu0 %1221 }
 0x244   : > { %1299 = vst.msk [vmem:[#allocation3 + $0x98] sm:$0xff] %vm1279_vm5, %v1222_v35  ;;  %1038 = vrot.lane.b32.xlu1 %v2915_v32, %s2599_s13  ;;  %v3238_v32 = vld [vmem:[#allocation2 + $0x108] sm:$0xff] }
 0x245   : > { %827 = vrot.lane.b32.xlu0 %v748_v0, %s2598_s12 }
 0x246   : > { %v1961_v62 = vpop.permute.xlu1 %1960 }
 0x247   : > { %v1415_v22 = vpop.permute.xlu0 %1414  ;;  %2055 = vst.msk [vmem:[#allocation3 + $0x10] sm:$0xff] %vm2052_vm9, %v1961_v62 }
 0x248   : > { %1492 = vst.msk [vmem:[#allocation3 + $0x98] sm:$0xff] %vm1472_vm6, %v1415_v22  ;;  %1006 = vrot.lane.b32.xlu1 %v2809_v48, %s2599_s13  ;;  %v557_v48 = vld [vmem:[#allocation2 + $0x110] sm:$0xff] }
 0x249   : > { %666 = vrot.lane.b32.xlu0 %v3228_v21, %s2596_s30 }
 0x24a   : > { %v838_v35 = vpop.permute.xlu1 %837 }
 0x24b   : > { %v617_v39 = vpop.permute.xlu0 %616  ;;  %914 = vst.msk [vmem:[#allocation3 + $0xa0] sm:$0xff] %vm893_vm3, %v838_v35 }
 0x24c   : > { %707 = vst.msk [vmem:[#allocation3 + $0x30] sm:$0xff] %vm700_vm2, %v617_v39  ;;  %1231 = vrot.lane.b32.xlu1 %v3120_v7, %s2600_s14  ;;  %v750_v39 = vld [vmem:[#allocation2 + $0x111] sm:$0xff] }
 0x24d   : > { %900 = vst.msk [vmem:[#allocation3 + $0x30] sm:$0xff] %vm893_vm3, %v810_v34  ;;  %636 = vrot.lane.b32.xlu0 %v3238_v32, %s2596_s30 }
 0x24e   : > { %v1031_v0 = vpop.permute.xlu1 %1030 }
 0x24f   : > { %v649_v62 = vpop.permute.xlu0 %648  ;;  %1107 = vst.msk [vmem:[#allocation3 + $0xa0] sm:$0xff] %vm1086_vm4, %v1031_v0 }
 0x250   : > { %723 = vst.msk [vmem:[#allocation3 + $0xb0] sm:$0xff] %vm700_vm2, %v649_v62  ;;  %1199 = vrot.lane.b32.xlu1 %v3114_v6, %s2600_s14 }
 0x251   : > { %638 = vrot.lane.b32.xlu0 %v557_v48, %s2596_s30 }
 0x252   : > { %v999_v34 = vpop.permute.xlu1 %998 }
 0x253   : > { %v619_v22 = vpop.permute.xlu0 %618  ;;  %1091 = vst.msk [vmem:[#allocation3 + $0x20] sm:$0xff] %vm1086_vm4, %v999_v34 }
 0x254   : > { %708 = vst.msk [vmem:[#allocation3 + $0x38] sm:$0xff] %vm700_vm2, %v619_v22  ;;  %1424 = vrot.lane.b32.xlu1 %v3198_v14, %s2601_s15 }
 0x255   : > { %831 = vrot.lane.b32.xlu0 %v750_v39, %s2598_s12 }
 0x256   : > { %v1224_v35 = vpop.permute.xlu1 %1223 }
 0x257   : > { %v812_v7 = vpop.permute.xlu0 %811  ;;  %1300 = vst.msk [vmem:[#allocation3 + $0xa0] sm:$0xff] %vm1279_vm5, %v1224_v35 }
 0x258   : > { %901 = vst.msk [vmem:[#allocation3 + $0x38] sm:$0xff] %vm893_vm3, %v812_v7  ;;  %1392 = vrot.lane.b32.xlu1 %v2968_v55, %s2601_s15 }
 0x259   : > { %1962 = vrot.lane.b32.xlu0 %v3035_v13, %s2604_s18 }
 0x25a   : > { %v1192_v62 = vpop.permute.xlu1 %1191 }
 0x25b   : > { %v1577_v6 = vpop.permute.xlu0 %1576  ;;  %1284 = vst.msk [vmem:[#allocation3 + $0x20] sm:$0xff] %vm1279_vm5, %v1192_v62 }
 0x25c   : > { %1670 = vst.msk [vmem:[#allocation3 + $0x18] sm:$0xff] %vm1666_vm7, %v1577_v6  ;;  %1618 = vrot.lane.b32.xlu1 %v2944_v43, %s2602_s16 }
 0x25d   : > { %839 = vrot.lane.b32.xlu0 %v2989_v61, %s2598_s12 }
 0x25e   : > { %v1417_v48 = vpop.permute.xlu1 %1416 }
 0x25f   : > { %v1770_v0 = vpop.permute.xlu0 %1769  ;;  %1493 = vst.msk [vmem:[#allocation3 + $0xa0] sm:$0xff] %vm1472_vm6, %v1417_v48 }
 0x260   : > { %1863 = vst.msk [vmem:[#allocation3 + $0x18] sm:$0xff] %vm1859_vm8, %v1770_v0  ;;  %1586 = vrot.lane.b32.xlu1 %v2819_v52, %s2602_s16 }
 0x261   : > { %1032 = vrot.lane.b32.xlu0 %v2873_v15, %s2599_s13 }
 0x262   : > { %v1385_v22 = vpop.permute.xlu1 %1384 }
 0x263   : > { %v651_v55 = vpop.permute.xlu0 %650  ;;  %1477 = vst.msk [vmem:[#allocation3 + $0x20] sm:$0xff] %vm1472_vm6, %v1385_v22 }
 0x264   : > { %724 = vst.msk [vmem:[#allocation3 + $0xb8] sm:$0xff] %vm700_vm2, %v651_v55  ;;  %1811 = vrot.lane.b32.xlu1 %v3158_v27, %s2603_s17 }
 0x265   : > { %1000 = vrot.lane.b32.xlu0 %v2795_v42, %s2599_s13  ;;  %v3287_v42 = vld [vmem:[#allocation2 + $0x1c9] sm:$0xff] }
 0x266   : > { %v1611_v34 = vpop.permute.xlu1 %1610 }
 0x267   : > { %v1609_v61 = vpop.permute.xlu0 %1608  ;;  %1687 = vst.msk [vmem:[#allocation3 + $0xa0] sm:$0xff] %vm1666_vm7, %v1611_v34 }
 0x268   : > { %1686 = vst.msk [vmem:[#allocation3 + $0x98] sm:$0xff] %vm1666_vm7, %v1609_v61  ;;  %1779 = vrot.lane.b32.xlu1 %v3152_v24, %s2603_s17 }
 0x269   : > { %1225 = vrot.lane.b32.xlu0 %v3052_v19, %s2600_s14 }
 0x26a   : > { %v1579_v39 = vpop.permute.xlu1 %1578 }
 0x26b   : > { %v1802_v15 = vpop.permute.xlu0 %1801  ;;  %1671 = vst.msk [vmem:[#allocation3 + $0x20] sm:$0xff] %vm1666_vm7, %v1579_v39 }
 0x26c   : > { %1879 = vst.msk [vmem:[#allocation3 + $0x98] sm:$0xff] %vm1859_vm8, %v1802_v15  ;;  %2004 = vrot.lane.b32.xlu1 %v3287_v42, %s2604_s18 }
 0x26d   : > { %1193 = vrot.lane.b32.xlu0 %v3026_v10, %s2600_s14 }
 0x26e   : > { %v1804_v35 = vpop.permute.xlu1 %1803 }
 0x26f   : > { %v621_v7 = vpop.permute.xlu0 %620  ;;  %1880 = vst.msk [vmem:[#allocation3 + $0xa0] sm:$0xff] %vm1859_vm8, %v1804_v35 }
 0x270   : > { %709 = vst.msk [vmem:[#allocation3 + $0x40] sm:$0xff] %vm700_vm2, %v621_v7  ;;  %1972 = vrot.lane.b32.xlu1 %v2981_v58, %s2604_s18 }
 0x271   : > { %902 = vst.msk [vmem:[#allocation3 + $0x40] sm:$0xff] %vm893_vm3, %v3165_v36  ;;  %1418 = vrot.lane.b32.xlu0 %v3216_v30, %s2601_s15 }
 0x272   : > { %v1772_v10 = vpop.permute.xlu1 %1771 }
 0x273   : > { %v653_v19 = vpop.permute.xlu0 %652  ;;  %1864 = vst.msk [vmem:[#allocation3 + $0x20] sm:$0xff] %vm1859_vm8, %v1772_v10 }
 0x274   : > { %725 = vst.msk [vmem:[#allocation3 + $0xc0] sm:$0xff] %vm700_vm2, %v653_v19  ;;  %849 = vrot.lane.b32.xlu1 %v3198_v14, %s2598_s12 }
 0x275   : > { %1386 = vrot.lane.b32.xlu0 %v3035_v13, %s2601_s15 }
 0x276   : > { %v1997_v36 = vpop.permute.xlu1 %1996 }
 0x277   : > { %v623_v6 = vpop.permute.xlu0 %622  ;;  %2073 = vst.msk [vmem:[#allocation3 + $0xa0] sm:$0xff] %vm2052_vm9, %v1997_v36 }
 0x278   : > { %710 = vst.msk [vmem:[#allocation3 + $0x48] sm:$0xff] %vm700_vm2, %v623_v6  ;;  %1042 = vrot.lane.b32.xlu1 %v2944_v43, %s2599_s13 }
 0x279   : > { %1612 = vrot.lane.b32.xlu0 %v2895_v23, %s2602_s16 }
 0x27a   : > { %v1965_v0 = vpop.permute.xlu1 %1964 }
 0x27b   : > { %v816_v62 = vpop.permute.xlu0 %815  ;;  %2057 = vst.msk [vmem:[#allocation3 + $0x20] sm:$0xff] %vm2052_vm9, %v1965_v0  ;;  %v3421_v0 = vld [vmem:[#allocation2 + $0x1b1] sm:$0xff] }
 0x27c   : > { %903 = vst.msk [vmem:[#allocation3 + $0x48] sm:$0xff] %vm893_vm3, %v816_v62  ;;  %1010 = vrot.lane.b32.xlu1 %v2819_v52, %s2599_s13 }
 0x27d   : > { %1580 = vrot.lane.b32.xlu0 %v2805_v46, %s2602_s16 }
 0x27e   : > { %v842_v14 = vpop.permute.xlu1 %841 }
 0x27f   : > { %v655_v13 = vpop.permute.xlu0 %654  ;;  %916 = vst.msk [vmem:[#allocation3 + $0xb0] sm:$0xff] %vm893_vm3, %v842_v14 }
 0x280   : > { %726 = vst.msk [vmem:[#allocation3 + $0xc8] sm:$0xff] %vm700_vm2, %v655_v13  ;;  %1235 = vrot.lane.b32.xlu1 %v3158_v27, %s2600_s14  ;;  %v3335_v27 = vld [vmem:[#allocation2 + $0x191] sm:$0xff] }
 0x281   : > { %1805 = vrot.lane.b32.xlu0 %v3103_v53, %s2603_s17 }
 0x282   : > { %v1035_v48 = vpop.permute.xlu1 %1034 }
 0x283   : > { %v625_v43 = vpop.permute.xlu0 %624  ;;  %1109 = vst.msk [vmem:[#allocation3 + $0xb0] sm:$0xff] %vm1086_vm4, %v1035_v48 }
 0x284   : > { %711 = vst.msk [vmem:[#allocation3 + $0x50] sm:$0xff] %vm700_vm2, %v625_v43  ;;  %1203 = vrot.lane.b32.xlu1 %v3152_v24, %s2600_s14 }
 0x285   : > { %904 = vst.msk [vmem:[#allocation3 + $0x50] sm:$0xff] %vm893_vm3, %v3174_v47  ;;  %1773 = vrot.lane.b32.xlu0 %v3087_v37, %s2603_s17 }
 0x286   : > { %v1003_v55 = vpop.permute.xlu1 %1002 }
 0x287   : > { %v657_v52 = vpop.permute.xlu0 %656  ;;  %1093 = vst.msk [vmem:[#allocation3 + $0x30] sm:$0xff] %vm1086_vm4, %v1003_v55 }
 0x288   : > { %727 = vst.msk [vmem:[#allocation3 + $0xd0] sm:$0xff] %vm700_vm2, %v657_v52  ;;  %1428 = vrot.lane.b32.xlu1 %v3287_v42, %s2601_s15  ;;  %v2086_v52 = vld [vmem:[#allocation3] sm:$0xff] }
 0x289   : > { %1998 = vrot.lane.b32.xlu0 %v3335_v27, %s2604_s18 }
 0x28a   : > { %v1228_v22 = vpop.permute.xlu1 %1227 }
 0x28b   : > { %v627_v47 = vpop.permute.xlu0 %626  ;;  %1302 = vst.msk [vmem:[#allocation3 + $0xb0] sm:$0xff] %vm1279_vm5, %v1228_v22  ;;  %v2104_v22 = vld [vmem:[#allocation3 + $0x90] sm:$0xff] }
 0x28c   : > { %712 = vst.msk [vmem:[#allocation3 + $0x58] sm:$0xff] %vm700_vm2, %v627_v47  ;;  %1396 = vrot.lane.b32.xlu1 %v2981_v58, %s2601_s15 }
 0x28d   : > { %1966 = vrot.lane.b32.xlu0 %v3097_v49, %s2604_s18 }
 0x28e   : > { %v1196_v61 = vpop.permute.xlu1 %1195 }
 0x28f   : > { %v820_v24 = vpop.permute.xlu0 %819  ;;  %1286 = vst.msk [vmem:[#allocation3 + $0x30] sm:$0xff] %vm1279_vm5, %v1196_v61 }
 0x290   : > { %905 = vst.msk [vmem:[#allocation3 + $0x58] sm:$0xff] %vm893_vm3, %v820_v24  ;;  %1622 = vrot.lane.b32.xlu1 %v2973_v38, %s2602_s16 }
 0x291   : > { %843 = vrot.lane.b32.xlu0 %v3216_v30, %s2598_s12 }
 0x292   : > { %v1421_v15 = vpop.permute.xlu1 %1420 }
 0x293   : > { %v659_v34 = vpop.permute.xlu0 %658  ;;  %1495 = vst.msk [vmem:[#allocation3 + $0xb0] sm:$0xff] %vm1472_vm6, %v1421_v15 }
 0x294   : > { %728 = vst.msk [vmem:[#allocation3 + $0xd8] sm:$0xff] %vm700_vm2, %v659_v34  ;;  %1590 = vrot.lane.b32.xlu1 %v2829_v56, %s2602_s16 }
 0x295   : > { %1036 = vrot.lane.b32.xlu0 %v2895_v23, %s2599_s13 }
 0x296   : > { %v1389_v39 = vpop.permute.xlu1 %1388 }
 0x297   : > { %v629_v58 = vpop.permute.xlu0 %628  ;;  %1479 = vst.msk [vmem:[#allocation3 + $0x30] sm:$0xff] %vm1472_vm6, %v1389_v39 }
 0x298   : > { %713 = vst.msk [vmem:[#allocation3 + $0x60] sm:$0xff] %vm700_vm2, %v629_v58  ;;  %1815 = vrot.lane.b32.xlu1 %v3204_v16, %s2603_s17  ;;  %v2088_v58 = vld [vmem:[#allocation3 + $0x10] sm:$0xff] }
 0x299   : > { %906 = vst.msk [vmem:[#allocation3 + $0x60] sm:$0xff] %vm893_vm3, %v3187_v8  ;;  %1004 = vrot.lane.b32.xlu0 %v2805_v46, %s2599_s13  ;;  %v3375_v46 = vld [vmem:[#allocation2 + $0x1e9] sm:$0xff] }
 0x29a   : > { %v1615_v23 = vpop.permute.xlu1 %1614 }
 0x29b   : > { %v661_v30 = vpop.permute.xlu0 %660  ;;  %1689 = vst.msk [vmem:[#allocation3 + $0xb0] sm:$0xff] %vm1666_vm7, %v1615_v23 }
 0x29c   : > { %729 = vst.msk [vmem:[#allocation3 + $0xe0] sm:$0xff] %vm700_vm2, %v661_v30  ;;  %1783 = vrot.lane.b32.xlu1 %v3196_v11, %s2603_s17 }
 0x29d   : > { %1229 = vrot.lane.b32.xlu0 %v3103_v53, %s2600_s14 }
 0x29e   : > { %v1583_v8 = vpop.permute.xlu1 %1582 }
 0x29f   : > { %v631_v7 = vpop.permute.xlu0 %630  ;;  %1673 = vst.msk [vmem:[#allocation3 + $0x30] sm:$0xff] %vm1666_vm7, %v1583_v8 }
 0x2a0   : > { %714 = vst.msk [vmem:[#allocation3 + $0x68] sm:$0xff] %vm700_vm2, %v631_v7  ;;  %2008 = vrot.lane.b32.xlu1 %v3375_v46, %s2604_s18 }
 0x2a1   : > { %1197 = vrot.lane.b32.xlu0 %v3087_v37, %s2600_s14 }
 0x2a2   : > { %v1808_v19 = vpop.permute.xlu1 %1807 }
 0x2a3   : > { %v824_v35 = vpop.permute.xlu0 %823  ;;  %1882 = vst.msk [vmem:[#allocation3 + $0xb0] sm:$0xff] %vm1859_vm8, %v1808_v19 }
 0x2a4   : > { %907 = vst.msk [vmem:[#allocation3 + $0x68] sm:$0xff] %vm893_vm3, %v824_v35  ;;  %1976 = vrot.lane.b32.xlu1 %v2991_v63, %s2604_s18 }
 0x2a5   : > { %1422 = vrot.lane.b32.xlu0 %v3335_v27, %s2601_s15 }
 0x2a6   : > { %v1776_v10 = vpop.permute.xlu1 %1775 }
 0x2a7   : > { %v663_v53 = vpop.permute.xlu0 %662  ;;  %1866 = vst.msk [vmem:[#allocation3 + $0x30] sm:$0xff] %vm1859_vm8, %v1776_v10  ;;  %v3542_v10 = vld [vmem:[#allocation2 + $0x1d1] sm:$0xff] }
 0x2a8   : > { %730 = vst.msk [vmem:[#allocation3 + $0xe8] sm:$0xff] %vm700_vm2, %v663_v53  ;;  %853 = vrot.lane.b32.xlu1 %v3287_v42, %s2598_s12 }
 0x2a9   : > { %1390 = vrot.lane.b32.xlu0 %v3097_v49, %s2601_s15 }
 0x2aa   : > { %v2001_v6 = vpop.permute.xlu1 %2000 }
 0x2ab   : > { %v633_v37 = vpop.permute.xlu0 %632  ;;  %2075 = vst.msk [vmem:[#allocation3 + $0xb0] sm:$0xff] %vm2052_vm9, %v2001_v6 }
 0x2ac   : > { %715 = vst.msk [vmem:[#allocation3 + $0x70] sm:$0xff] %vm700_vm2, %v633_v37  ;;  %1046 = vrot.lane.b32.xlu1 %v2973_v38, %s2599_s13 }
 0x2ad   : > { %908 = vst.msk [vmem:[#allocation3 + $0x70] sm:$0xff] %vm893_vm3, %v3208_v20  ;;  %1616 = vrot.lane.b32.xlu0 %v2917_v33, %s2602_s16 }
 0x2ae   : > { %v1969_v49 = vpop.permute.xlu1 %1968 }
 0x2af   : > { %v665_v63 = vpop.permute.xlu0 %664  ;;  %2059 = vst.msk [vmem:[#allocation3 + $0x30] sm:$0xff] %vm2052_vm9, %v1969_v49 }
 0x2b0   : > { %731 = vst.msk [vmem:[#allocation3 + $0xf0] sm:$0xff] %vm700_vm2, %v665_v63  ;;  %1014 = vrot.lane.b32.xlu1 %v2829_v56, %s2599_s13  ;;  %v1536_v63 = vld [vmem:[#allocation2 + $0x227] sm:$0xff] }
 0x2b1   : > { %1584 = vrot.lane.b32.xlu0 %v2815_v50, %s2602_s16 }
 0x2b2   : > { %v846_v20 = vpop.permute.xlu1 %845 }
 0x2b3   : > { %v1995_v42 = vpop.permute.xlu0 %1994  ;;  %918 = vst.msk [vmem:[#allocation3 + $0xc0] sm:$0xff] %vm893_vm3, %v846_v20 }
 0x2b4   : > { %2072 = vst.msk [vmem:[#allocation3 + $0x98] sm:$0xff] %vm2052_vm9, %v1995_v42  ;;  %1239 = vrot.lane.b32.xlu1 %v3204_v16, %s2600_s14 }
 0x2b5   : > { %1809 = vrot.lane.b32.xlu0 %v3142_v40, %s2603_s17 }
 0x2b6   : > { %v1039_v36 = vpop.permute.xlu1 %1038 }
 0x2b7   : > { %v828_v38 = vpop.permute.xlu0 %827  ;;  %1111 = vst.msk [vmem:[#allocation3 + $0xc0] sm:$0xff] %vm1086_vm4, %v1039_v36  ;;  %v1729_v36 = vld [vmem:[#allocation2 + $0x228] sm:$0xff] }
 0x2b8   : > { %909 = vst.msk [vmem:[#allocation3 + $0x78] sm:$0xff] %vm893_vm3, %v828_v38  ;;  %1207 = vrot.lane.b32.xlu1 %v3196_v11, %s2600_s14  ;;  %v1324_v11 = vld [vmem:[#allocation2 + $0xe9] sm:$0xff] }
 0x2b9   : > { %1777 = vrot.lane.b32.xlu0 %v3130_v18, %s2603_s17 }
 0x2ba   : > { %v1007_v62 = vpop.permute.xlu1 %1006 }
 0x2bb   : > { %v667_v56 = vpop.permute.xlu0 %666  ;;  %1095 = vst.msk [vmem:[#allocation3 + $0x40] sm:$0xff] %vm1086_vm4, %v1007_v62 }
 0x2bc   : > { %732 = vst.msk [vmem:[#allocation3 + $0xf8] sm:$0xff] %vm700_vm2, %v667_v56  ;;  %1432 = vrot.lane.b32.xlu1 %v3375_v46, %s2601_s15 }
 0x2bd   : > { %2002 = vrot.lane.b32.xlu0 %v3421_v0, %s2604_s18 }
 0x2be   : > { %v1232_v13 = vpop.permute.xlu1 %1231 }
 0x2bf   : > { %v637_v16 = vpop.permute.xlu0 %636  ;;  %1304 = vst.msk [vmem:[#allocation3 + $0xc0] sm:$0xff] %vm1279_vm5, %v1232_v13  ;;  %v1713_v13 = vld [vmem:[#allocation2 + $0x128] sm:$0xff] }
 0x2c0   : > { %717 = vst.msk [vmem:[#allocation3 + $0x80] sm:$0xff] %vm700_vm2, %v637_v16  ;;  %1400 = vrot.lane.b32.xlu1 %v1324_v11, %s2601_s15 }
 0x2c1   : > { %910 = vst.msk [vmem:[#allocation3 + $0x80] sm:$0xff] %vm893_vm3, %v3222_v51  ;;  %1970 = vrot.lane.b32.xlu0 %v3137_v44, %s2604_s18  ;;  %v3442_v51 = vld [vmem:[#allocation2 + $0x207] sm:$0xff] }
 0x2c2   : > { %1103 = vst.msk [vmem:[#allocation3 + $0x80] sm:$0xff] %vm1086_vm4, %v3005_v3  ;;  %v1200_v43 = vpop.permute.xlu1 %1199 }
 0x2c3   : > { %1296 = vst.msk [vmem:[#allocation3 + $0x80] sm:$0xff] %vm1279_vm5, %v3012_v5  ;;  %v639_v14 = vpop.permute.xlu0 %638  ;;  %1288 = vst.msk [vmem:[#allocation3 + $0x40] sm:$0xff] %vm1279_vm5, %v1200_v43  ;;  %v2090_v43 = vld [vmem:[#allocation3 + $0x20] sm:$0xff] }
 0x2c4   : > { %1489 = vst.msk [vmem:[#allocation3 + $0x80] sm:$0xff] %vm1472_vm6, %v3032_v12  ;;  %1626 = vrot.lane.b32.xlu1 %v3442_v51, %s2602_s16 }
 0x2c5   : > { %718 = vst.msk [vmem:[#allocation3 + $0x88] sm:$0xff] %vm700_vm2, %v639_v14  ;;  %847 = vrot.lane.b32.xlu0 %v3335_v27, %s2598_s12  ;;  %v1922_v14 = vld [vmem:[#allocation2 + $0x229] sm:$0xff] }
 0x2c6   : > { %1683 = vst.msk [vmem:[#allocation3 + $0x80] sm:$0xff] %vm1666_vm7, %v3068_v26  ;;  %v1425_v5 = vpop.permute.xlu1 %1424 }
 0x2c7   : > { %1876 = vst.msk [vmem:[#allocation3 + $0x80] sm:$0xff] %vm1859_vm8, %v3076_v29  ;;  %v832_v3 = vpop.permute.xlu0 %831 }
 0x2c8   : > { %2069 = vst.msk [vmem:[#allocation3 + $0x80] sm:$0xff] %vm2052_vm9, %v3111_v4  ;;  %1594 = vrot.lane.b32.xlu1 %v2836_v60, %s2602_s16 }
 0x2c9   : > { %911 = vst.msk [vmem:[#allocation3 + $0x88] sm:$0xff] %vm893_vm3, %v832_v3  ;;  %1040 = vrot.lane.b32.xlu0 %v2917_v33, %s2599_s13  ;;  %v1130_v3 = vld [vmem:[#allocation2 + $0xd0] sm:$0xff] }
 0x2ca   : > { %1497 = vst.msk [vmem:[#allocation3 + $0xc0] sm:$0xff] %vm1472_vm6, %v1425_v5  ;;  %v1393_v26 = vpop.permute.xlu1 %1392 }
 0x2cb   : > { %1104 = vst.msk [vmem:[#allocation3 + $0x88] sm:$0xff] %vm1086_vm4, %v3066_v25  ;;  %v1963_v12 = vpop.permute.xlu0 %1962  ;;  %v3470_v25 = vld [vmem:[#allocation2 + $0x208] sm:$0xff] }
 0x2cc   : > { %1297 = vst.msk [vmem:[#allocation3 + $0x88] sm:$0xff] %vm1279_vm5, %v3074_v28  ;;  %1819 = vrot.lane.b32.xlu1 %v3470_v25, %s2603_s17 }
 0x2cd   : > { %1490 = vst.msk [vmem:[#allocation3 + $0x88] sm:$0xff] %vm1472_vm6, %v3080_v31  ;;  %1481 = vst.msk [vmem:[#allocation3 + $0x40] sm:$0xff] %vm1472_vm6, %v1393_v26  ;;  %1008 = vrot.lane.b32.xlu0 %v2815_v50, %s2599_s13  ;;  %v1920_v31 = vld [vmem:[#allocation2 + $0x209] sm:$0xff] }
 0x2ce   : > { %1684 = vst.msk [vmem:[#allocation3 + $0x88] sm:$0xff] %vm1666_vm7, %v3185_v2  ;;  %v1619_v28 = vpop.permute.xlu1 %1618  ;;  %v2087_v2 = vld [vmem:[#allocation3 + $0x8] sm:$0xff] }
 0x2cf   : > { %2056 = vst.msk [vmem:[#allocation3 + $0x18] sm:$0xff] %vm2052_vm9, %v1963_v12  ;;  %v840_v33 = vpop.permute.xlu0 %839  ;;  %v2520_v47 = vpack.c.bf16 %v2087_v2, %v2086_v52  ;;  %v1906_v26 = vld [vmem:[#allocation2 + $0x129] sm:$0xff] }
 0x2d0   : > { %1877 = vst.msk [vmem:[#allocation3 + $0x88] sm:$0xff] %vm1859_vm8, %v3193_v9  ;;  %1787 = vrot.lane.b32.xlu1 %v3238_v32, %s2603_s17 }
 0x2d1   : > { %2070 = vst.msk [vmem:[#allocation3 + $0x88] sm:$0xff] %vm2052_vm9, %v3206_v17  ;;  %1233 = vrot.lane.b32.xlu0 %v3142_v40, %s2600_s14  ;;  %v2102_v40 = vld [vmem:[#allocation3 + $0x80] sm:$0xff]  ;;  %v2105_v17 = vld [vmem:[#allocation3 + $0x98] sm:$0xff] }
 0x2d2   : > { %915 = vst.msk [vmem:[#allocation3 + $0xa8] sm:$0xff] %vm893_vm3, %v840_v33  ;;  %v1587_v29 = vpop.permute.xlu1 %1586  ;;  %v2523_v24 = vpack.c.bf16 %v2105_v17, %v2104_v22  ;;  %v3604_v22 = vld [vmem:[#allocation2 + $0x1f1] sm:$0xff] }
 0x2d3   : > { %1691 = vst.msk [vmem:[#allocation3 + $0xc0] sm:$0xff] %vm1666_vm7, %v1619_v28  ;;  %v1033_v50 = vpop.permute.xlu0 %1032  ;;  %1675 = vst.msk [vmem:[#allocation3 + $0x40] sm:$0xff] %vm1666_vm7, %v1587_v29  ;;  %v1323_v28 = vld [vmem:[#allocation2 + $0xd1] sm:$0xff] }
 0x2d4   : > { %1108 = vst.msk [vmem:[#allocation3 + $0xa8] sm:$0xff] %vm1086_vm4, %v1033_v50  ;;  %2012 = vrot.lane.b32.xlu1 %v1920_v31, %s2604_s18 }
 0x2d5   : > { %1201 = vrot.lane.b32.xlu0 %v3130_v18, %s2600_s14  ;;  %v1904_v18 = vld [vmem:[#allocation2 + $0x109] sm:$0xff] }
 0x2d6   : > { %v1812_v27 = vpop.permute.xlu1 %1811  ;;  %v2089_v15 = vld [vmem:[#allocation3 + $0x18] sm:$0xff] }
 0x2d7   : > { %v1001_v55 = vpop.permute.xlu0 %1000  ;;  %1884 = vst.msk [vmem:[#allocation3 + $0xc0] sm:$0xff] %vm1859_vm8, %v1812_v27  ;;  %v2526_v23 = vpack.c.bf16 %v2089_v15, %v2088_v58 }
 0x2d8   : > { %v2103_v9 = vld [vmem:[#allocation3 + $0x88] sm:$0xff]  ;;  %1092 = vst.msk [vmem:[#allocation3 + $0x28] sm:$0xff] %vm1086_vm4, %v1001_v55  ;;  %1980 = vrot.lane.b32.xlu1 %v1904_v18, %s2604_s18  ;;  %v1710_v55 = vld [vmem:[#allocation2 + $0xf0] sm:$0xff] }
 0x2d9   : > { %v2517_v48 = vpack.c.bf16 %v2103_v9, %v2102_v40  ;;  %1426 = vrot.lane.b32.xlu0 %v3421_v0, %s2601_s15  ;;  %v1517_v40 = vld [vmem:[#allocation2 + $0xef] sm:$0xff] }
 0x2da   : > { %v1780_v34 = vpop.permute.xlu1 %1779 }
 0x2db   : > { %2519 = vmatprep.subr.msk.bf16.mxu0 %vm3490_vm11, %v2517_v48  ;;  %v1226_v61 = vpop.permute.xlu0 %1225  ;;  %1868 = vst.msk [vmem:[#allocation3 + $0x40] sm:$0xff] %vm1859_vm8, %v1780_v34 }
 0x2dc   : > { %2522 = vmatpush3.bf16.xpose.msk.msra.mxu0 %vm3490_vm11, %v2520_v47  ;;  %1301 = vst.msk [vmem:[#allocation3 + $0xa8] sm:$0xff] %vm1279_vm5, %v1226_v61  ;;  %857 = vrot.lane.b32.xlu1 %v3375_v46, %s2598_s12 }
 0x2dd   : > { %2525 = vmatprep.subr.msk.bf16.mxu0 %vm3490_vm11, %v2523_v24  ;;  %1394 = vrot.lane.b32.xlu0 %v3137_v44, %s2601_s15 }
 0x2de   : > { %v2005_v30 = vpop.permute.xlu1 %2004 }
 0x2df   : > { %v1194_v39 = vpop.permute.xlu0 %1193  ;;  %2077 = vst.msk [vmem:[#allocation3 + $0xc0] sm:$0xff] %vm2052_vm9, %v2005_v30 }
 0x2e0   : > { %1285 = vst.msk [vmem:[#allocation3 + $0x28] sm:$0xff] %vm1279_vm5, %v1194_v39  ;;  %1050 = vrot.lane.b32.xlu1 %v3442_v51, %s2599_s13 }
 0x2e1   : > { %1620 = vrot.lane.b32.xlu0 %v2946_v45, %s2602_s16 }
 0x2e2   : > { %v1973_v7 = vpop.permute.xlu1 %1972 }
 0x2e3   : > { %v1419_v44 = vpop.permute.xlu0 %1418  ;;  %2061 = vst.msk [vmem:[#allocation3 + $0x40] sm:$0xff] %vm2052_vm9, %v1973_v7  ;;  %v2108_v7 = vld [vmem:[#allocation3 + $0xb0] sm:$0xff] }
 0x2e4   : > { %2528 = vmatpush3.bf16.xpose.msk.msra.mxu0 %vm3490_vm11, %v2526_v23  ;;  %1494 = vst.msk [vmem:[#allocation3 + $0xa8] sm:$0xff] %vm1472_vm6, %v1419_v44  ;;  %1018 = vrot.lane.b32.xlu1 %v2836_v60, %s2599_s13 }
 0x2e5   : > { %1588 = vrot.lane.b32.xlu0 %v2825_v54, %s2602_s16 }
 0x2e6   : > { %v850_v46 = vpop.permute.xlu1 %849 }
 0x2e7   : > { %v1387_v8 = vpop.permute.xlu0 %1386  ;;  %920 = vst.msk [vmem:[#allocation3 + $0xd0] sm:$0xff] %vm893_vm3, %v850_v46  ;;  %v1148_v46 = vld [vmem:[#allocation2 + $0x1f0] sm:$0xff] }
 0x2e8   : > { %1478 = vst.msk [vmem:[#allocation3 + $0x28] sm:$0xff] %vm1472_vm6, %v1387_v8  ;;  %1243 = vrot.lane.b32.xlu1 %v3470_v25, %s2600_s14 }
 0x2e9   : > { %1813 = vrot.lane.b32.xlu0 %v3183_v1, %s2603_s17 }
 0x2ea   : > { %v1043_v19 = vpop.permute.xlu1 %1042 }
 0x2eb   : > { %v1613_v35 = vpop.permute.xlu0 %1612  ;;  %1113 = vst.msk [vmem:[#allocation3 + $0xd0] sm:$0xff] %vm1086_vm4, %v1043_v19 }
 0x2ec   : > { %1688 = vst.msk [vmem:[#allocation3 + $0xa8] sm:$0xff] %vm1666_vm7, %v1613_v35  ;;  %1211 = vrot.lane.b32.xlu1 %v3238_v32, %s2600_s14 }
 0x2ed   : > { %1781 = vrot.lane.b32.xlu0 %v3168_v41, %s2603_s17 }
 0x2ee   : > { %v1011_v53 = vpop.permute.xlu1 %1010 }
 0x2ef   : > { %v1581_v60 = vpop.permute.xlu0 %1580  ;;  %1097 = vst.msk [vmem:[#allocation3 + $0x50] sm:$0xff] %vm1086_vm4, %v1011_v53 }
 0x2f0   : > { %1672 = vst.msk [vmem:[#allocation3 + $0x28] sm:$0xff] %vm1666_vm7, %v1581_v60  ;;  %1436 = vrot.lane.b32.xlu1 %v1920_v31, %s2601_s15  ;;  %v2092_v60 = vld [vmem:[#allocation3 + $0x30] sm:$0xff] }
 0x2f1   : > { %2006 = vrot.lane.b32.xlu0 %v3542_v10, %s2604_s18 }
 0x2f2   : > { %v1236_v6 = vpop.permute.xlu1 %1235 }
 0x2f3   : > { %v1806_v37 = vpop.permute.xlu0 %1805  ;;  %1306 = vst.msk [vmem:[#allocation3 + $0xd0] sm:$0xff] %vm1279_vm5, %v1236_v6 }
 0x2f4   : > { %1881 = vst.msk [vmem:[#allocation3 + $0xa8] sm:$0xff] %vm1859_vm8, %v1806_v37  ;;  %1404 = vrot.lane.b32.xlu1 %v1904_v18, %s2601_s15  ;;  %v1903_v18 = vld [vmem:[#allocation2 + $0xf1] sm:$0xff] }
 0x2f5   : > { %1974 = vrot.lane.b32.xlu0 %v3177_v59, %s2604_s18  ;;  %v1520_v59 = vld [vmem:[#allocation2 + $0x127] sm:$0xff] }
 0x2f6   : > { %v1204_v32 = vpop.permute.xlu1 %1203 }
 0x2f7   : > { %v1774_v41 = vpop.permute.xlu0 %1773  ;;  %1290 = vst.msk [vmem:[#allocation3 + $0x50] sm:$0xff] %vm1279_vm5, %v1204_v32 }
 0x2f8   : > { %1865 = vst.msk [vmem:[#allocation3 + $0x28] sm:$0xff] %vm1859_vm8, %v1774_v41  ;;  %1630 = vrot.lane.b32.xlu1 %v1536_v63, %s2602_s16 }
 0x2f9   : > { %851 = vrot.lane.b32.xlu0 %v3421_v0, %s2598_s12  ;;  %v2106_v0 = vld [vmem:[#allocation3 + $0xa0] sm:$0xff] }
 0x2fa   : > { %v1429_v42 = vpop.permute.xlu1 %1428 }
 0x2fb   : > { %v1999_v49 = vpop.permute.xlu0 %1998  ;;  %1499 = vst.msk [vmem:[#allocation3 + $0xd0] sm:$0xff] %vm1472_vm6, %v1429_v42  ;;  %v1535_v42 = vld [vmem:[#allocation2 + $0x20f] sm:$0xff] }
 0x2fc   : > { %2074 = vst.msk [vmem:[#allocation3 + $0xa8] sm:$0xff] %vm2052_vm9, %v1999_v49  ;;  %1598 = vrot.lane.b32.xlu1 %v1520_v59, %s2602_s16 }
 0x2fd   : > { %1044 = vrot.lane.b32.xlu0 %v2946_v45, %s2599_s13 }
 0x2fe   : > { %v1397_v38 = vpop.permute.xlu1 %1396 }
 0x2ff   : > { %v1967_v20 = vpop.permute.xlu0 %1966  ;;  %1483 = vst.msk [vmem:[#allocation3 + $0x50] sm:$0xff] %vm1472_vm6, %v1397_v38  ;;  %v3780_v38 = vld [vmem:[#allocation4_spill] sm:$0xff] }
 0x300   : > { %2058 = vst.msk [vmem:[#allocation3 + $0x28] sm:$0xff] %vm2052_vm9, %v1967_v20  ;;  %1823 = vrot.lane.b32.xlu1 %v1729_v36, %s2603_s17 }
 0x301   : > { %1012 = vrot.lane.b32.xlu0 %v2825_v54, %s2599_s13 }
 0x302   : > { %v1623_v62 = vpop.permute.xlu1 %1622 }
 0x303   : > { %v844_v56 = vpop.permute.xlu0 %843  ;;  %v2107_v16 = vld [vmem:[#allocation3 + $0xa8] sm:$0xff]  ;;  %1693 = vst.msk [vmem:[#allocation3 + $0xd0] sm:$0xff] %vm1666_vm7, %v1623_v62  ;;  %v1728_v62 = vld [vmem:[#allocation2 + $0x210] sm:$0xff] }
 0x304   : > { %917 = vst.msk [vmem:[#allocation3 + $0xb8] sm:$0xff] %vm893_vm3, %v844_v56  ;;  %v2529_v45 = vpack.c.bf16 %v2107_v16, %v2106_v0  ;;  %1791 = vrot.lane.b32.xlu1 %v1713_v13, %s2603_s17 }
 0x305   : > { %1237 = vrot.lane.b32.xlu0 %v3183_v1, %s2600_s14 }
 0x306   : > { %2531 = vmatprep.subr.msk.bf16.mxu0 %vm3490_vm11, %v2529_v45  ;;  %v1591_v11 = vpop.permute.xlu1 %1590  ;;  %v1712_v45 = vld [vmem:[#allocation2 + $0x110] sm:$0xff] }
 0x307   : > { %v1037_v54 = vpop.permute.xlu0 %1036  ;;  %v2091_v51 = vld [vmem:[#allocation3 + $0x28] sm:$0xff]  ;;  %1677 = vst.msk [vmem:[#allocation3 + $0x50] sm:$0xff] %vm1666_vm7, %v1591_v11  ;;  %v1921_v11 = vld [vmem:[#allocation2 + $0x211] sm:$0xff] }
 0x308   : > { %1110 = vst.msk [vmem:[#allocation3 + $0xb8] sm:$0xff] %vm1086_vm4, %v1037_v54  ;;  %v2532_v5 = vpack.c.bf16 %v2091_v51, %v2090_v43  ;;  %2016 = vrot.lane.b32.xlu1 %v1922_v14, %s2604_s18  ;;  %v1905_v51 = vld [vmem:[#allocation2 + $0x111] sm:$0xff] }
 0x309   : > { %1205 = vrot.lane.b32.xlu0 %v1130_v3, %s2600_s14 }
 0x30a   : > { %2534 = vmatpush3.bf16.xpose.msk.msra.mxu0 %vm3490_vm11, %v2532_v5  ;;  %v1816_v12 = vpop.permute.xlu1 %1815 }
 0x30b   : > { %v1005_v1 = vpop.permute.xlu0 %1004  ;;  %1886 = vst.msk [vmem:[#allocation3 + $0xd0] sm:$0xff] %vm1859_vm8, %v1816_v12 }
 0x30c   : > { %1094 = vst.msk [vmem:[#allocation3 + $0x38] sm:$0xff] %vm1086_vm4, %v1005_v1  ;;  %1984 = vrot.lane.b32.xlu1 %v1906_v26, %s2604_s18 }
 0x30d   : > { %1430 = vrot.lane.b32.xlu0 %v3542_v10, %s2601_s15 }
 0x30e   : > { %v1784_v33 = vpop.permute.xlu1 %1783 }
 0x30f   : > { %v1230_v25 = vpop.permute.xlu0 %1229  ;;  %1870 = vst.msk [vmem:[#allocation3 + $0x50] sm:$0xff] %vm1859_vm8, %v1784_v33 }
 0x310   : > { %1303 = vst.msk [vmem:[#allocation3 + $0xb8] sm:$0xff] %vm1279_vm5, %v1230_v25 }
 0x311   : > { %1398 = vrot.lane.b32.xlu0 %v1323_v28, %s2601_s15  ;;  %v2110_v28 = vld [vmem:[#allocation3 + $0xc0] sm:$0xff] }
 0x312   : > { %v2009_v29 = vpop.permute.xlu1 %2008 }
 0x313   : > { %v1198_v50 = vpop.permute.xlu0 %1197  ;;  %2079 = vst.msk [vmem:[#allocation3 + $0xd0] sm:$0xff] %vm2052_vm9, %v2009_v29 }
 0x314   : > { %1287 = vst.msk [vmem:[#allocation3 + $0x38] sm:$0xff] %vm1279_vm5, %v1198_v50 }
 0x315   : > { %1624 = vrot.lane.b32.xlu0 %v2975_v57, %s2602_s16 }
 0x316   : > { %v1977_v2 = vpop.permute.xlu1 %1976 }
 0x317   : > { %v1423_v31 = vpop.permute.xlu0 %1422  ;;  %2063 = vst.msk [vmem:[#allocation3 + $0x50] sm:$0xff] %vm2052_vm9, %v1977_v2 }
 0x318   : > { %1496 = vst.msk [vmem:[#allocation3 + $0xb8] sm:$0xff] %vm1472_vm6, %v1423_v31 }
 0x319   : > { %1592 = vrot.lane.b32.xlu0 %v1517_v40, %s2602_s16 }
 0x31a   : > { %v854_v17 = vpop.permute.xlu1 %853 }
 0x31b   : > { %v1391_v9 = vpop.permute.xlu0 %1390  ;;  %922 = vst.msk [vmem:[#allocation3 + $0xe0] sm:$0xff] %vm893_vm3, %v854_v17 }
 0x31c   : > { %1480 = vst.msk [vmem:[#allocation3 + $0x38] sm:$0xff] %vm1472_vm6, %v1391_v9 }
 0x31d   : > { %1817 = vrot.lane.b32.xlu0 %v3228_v21, %s2603_s17 }
 0x31e   : > { %v1047_v52 = vpop.permute.xlu1 %1046 }
 0x31f   : > { %v1617_v48 = vpop.permute.xlu0 %1616  ;;  %1115 = vst.msk [vmem:[#allocation3 + $0xe0] sm:$0xff] %vm1086_vm4, %v1047_v52 }
 0x320   : > { %1690 = vst.msk [vmem:[#allocation3 + $0xb8] sm:$0xff] %vm1666_vm7, %v1617_v48 }
 0x321   : > { %1785 = vrot.lane.b32.xlu0 %v1710_v55, %s2603_s17 }
 0x322   : > { %v1015_v47 = vpop.permute.xlu1 %1014 }
 0x323   : > { %v1585_v27 = vpop.permute.xlu0 %1584  ;;  %1099 = vst.msk [vmem:[#allocation3 + $0x60] sm:$0xff] %vm1086_vm4, %v1015_v47 }
 0x324   : > { %1674 = vst.msk [vmem:[#allocation3 + $0x38] sm:$0xff] %vm1666_vm7, %v1585_v27 }
 0x325   : > { %2010 = vrot.lane.b32.xlu0 %v3604_v22, %s2604_s18 }
 0x326   : > { %v1240_v24 = vpop.permute.xlu1 %1239 }
 0x327   : > { %v1810_v21 = vpop.permute.xlu0 %1809  ;;  %1308 = vst.msk [vmem:[#allocation3 + $0xe0] sm:$0xff] %vm1279_vm5, %v1240_v24 }
 0x328   : > { %1883 = vst.msk [vmem:[#allocation3 + $0xb8] sm:$0xff] %vm1859_vm8, %v1810_v21 }
 0x329   : > { %1978 = vrot.lane.b32.xlu0 %v1903_v18, %s2604_s18 }
 0x32a   : > { %v1208_v34 = vpop.permute.xlu1 %1207 }
 0x32b   : > { %v1778_v61 = vpop.permute.xlu0 %1777  ;;  %1292 = vst.msk [vmem:[#allocation3 + $0x60] sm:$0xff] %vm1279_vm5, %v1208_v34  ;;  %v1521_v34 = vld [vmem:[#allocation2 + $0x12f] sm:$0xff] }
 0x32c   : > { %1867 = vst.msk [vmem:[#allocation3 + $0x38] sm:$0xff] %vm1859_vm8, %v1778_v61 }
 0x32d   : > { %855 = vrot.lane.b32.xlu0 %v3542_v10, %s2598_s12 }
 0x32e   : > { %v1433_v58 = vpop.permute.xlu1 %1432 }
 0x32f   : > { %v2003_v15 = vpop.permute.xlu0 %2002  ;;  %1501 = vst.msk [vmem:[#allocation3 + $0xe0] sm:$0xff] %vm1472_vm6, %v1433_v58 }
 0x330   : > { %2076 = vst.msk [vmem:[#allocation3 + $0xb8] sm:$0xff] %vm2052_vm9, %v2003_v15  ;;  %v1730_v15 = vld [vmem:[#allocation2 + $0x230] sm:$0xff] }
 0x331   : > { %1048 = vrot.lane.b32.xlu0 %v2975_v57, %s2599_s13 }
 0x332   : > { %v1401_v30 = vpop.permute.xlu1 %1400 }
 0x333   : > { %v1971_v39 = vpop.permute.xlu0 %1970  ;;  %1485 = vst.msk [vmem:[#allocation3 + $0x60] sm:$0xff] %vm1472_vm6, %v1401_v30  ;;  %v1714_v30 = vld [vmem:[#allocation2 + $0x130] sm:$0xff] }
 0x334   : > { %2060 = vst.msk [vmem:[#allocation3 + $0x38] sm:$0xff] %vm2052_vm9, %v1971_v39 }
 0x335   : > { %1016 = vrot.lane.b32.xlu0 %v1517_v40, %s2599_s13  ;;  %v2094_v40 = vld [vmem:[#allocation3 + $0x40] sm:$0xff] }
 0x336   : > { %v1627_v44 = vpop.permute.xlu1 %1626 }
 0x337   : > { %v848_v23 = vpop.permute.xlu0 %847  ;;  %v2109_v8 = vld [vmem:[#allocation3 + $0xb8] sm:$0xff]  ;;  %1695 = vst.msk [vmem:[#allocation3 + $0xe0] sm:$0xff] %vm1666_vm7, %v1627_v44 }
 0x338   : > { %919 = vst.msk [vmem:[#allocation3 + $0xc8] sm:$0xff] %vm893_vm3, %v848_v23  ;;  %v2535_v35 = vpack.c.bf16 %v2109_v8, %v2108_v7  ;;  %v1923_v23 = vld [vmem:[#allocation2 + $0x231] sm:$0xff]  ;;  %v3700_v7 = vld [vmem:[%s3770_s3] sm:$0xf] }
 0x339   : > { %1241 = vrot.lane.b32.xlu0 %v1148_v46, %s2600_s14  ;;  %2515 = vmatprep.mubr.msk.f32.mxu0 %vm2124_vm10, %v3700_v7  ;;  %v1907_v46 = vld [vmem:[#allocation2 + $0x131] sm:$0xff] }
 0x33a   : > { %2537 = vmatprep.subr.msk.bf16.mxu0 %vm3490_vm11, %v2535_v35  ;;  %v1595_v19 = vpop.permute.xlu1 %1594 }
 0x33b   : > { %v1041_v57 = vpop.permute.xlu0 %1040  ;;  %v2093_v53 = vld [vmem:[#allocation3 + $0x38] sm:$0xff]  ;;  %1679 = vst.msk [vmem:[#allocation3 + $0x60] sm:$0xff] %vm1666_vm7, %v1595_v19 }
 0x33c   : > { %1112 = vst.msk [vmem:[#allocation3 + $0xc8] sm:$0xff] %vm1086_vm4, %v1041_v57  ;;  %v2538_v10 = vpack.c.bf16 %v2093_v53, %v2092_v60  ;;  %v2118_v57 = vld [vmem:[%s3771_s4] sm:$0xf] }
 0x33d   : > { %1209 = vrot.lane.b32.xlu0 %v1710_v55, %s2600_s14  ;;  %2121 = vperm.xlu1 %2585, %v2118_v57  }
 0x33e   : > { %2540 = vmatpush3.bf16.xpose.msk.msra.mxu0 %vm3490_vm11, %v2538_v10  ;;  %v1820_v6 = vpop.permute.xlu1 %1819  ;;  %v2112_v10 = vld [vmem:[#allocation3 + $0xd0] sm:$0xff] }
 0x33f   : > { %v1009_v37 = vpop.permute.xlu0 %1008  ;;  %1888 = vst.msk [vmem:[#allocation3 + $0xe0] sm:$0xff] %vm1859_vm8, %v1820_v6 }
 0x340   : > { %1096 = vst.msk [vmem:[#allocation3 + $0x48] sm:$0xff] %vm1086_vm4, %v1009_v37 }
 0x341   : > { %1434 = vrot.lane.b32.xlu0 %v3604_v22, %s2601_s15 }
 0x342   : > { %v1788_v32 = vpop.permute.xlu1 %1787 }
 0x343   : > { %v1234_v41 = vpop.permute.xlu0 %1233  ;;  %1872 = vst.msk [vmem:[#allocation3 + $0x60] sm:$0xff] %vm1859_vm8, %v1788_v32  ;;  %v2096_v32 = vld [vmem:[#allocation3 + $0x50] sm:$0xff] }
 0x344   : > { %1305 = vst.msk [vmem:[#allocation3 + $0xc8] sm:$0xff] %vm1279_vm5, %v1234_v41 }
 0x345   : > { %1402 = vrot.lane.b32.xlu0 %v1903_v18, %s2601_s15 }
 0x346   : > { %v2013_v49 = vpop.permute.xlu1 %2012 }
 0x347   : > { %v1202_v63 = vpop.permute.xlu0 %1201  ;;  %2081 = vst.msk [vmem:[#allocation3 + $0xe0] sm:$0xff] %vm2052_vm9, %v2013_v49 }
 0x348   : > { %1289 = vst.msk [vmem:[#allocation3 + $0x48] sm:$0xff] %vm1279_vm5, %v1202_v63 }
 0x349   : > { %1628 = vrot.lane.b32.xlu0 %v1535_v42, %s2602_s16 }
 0x34a   : > { %v1981_v20 = vpop.permute.xlu1 %1980 }
 0x34b   : > { %v1427_v59 = vpop.permute.xlu0 %1426  ;;  %2065 = vst.msk [vmem:[#allocation3 + $0x60] sm:$0xff] %vm2052_vm9, %v1981_v20 }
 0x34c   : > { %1498 = vst.msk [vmem:[#allocation3 + $0xc8] sm:$0xff] %vm1472_vm6, %v1427_v59 }
 0x34d   : > { %1596 = vrot.lane.b32.xlu0 %v3780_v38, %s2602_s16 }
 0x34e   : > { %v858_v56 = vpop.permute.xlu1 %857 }
 0x34f   : > { %v1395_v36 = vpop.permute.xlu0 %1394  ;;  %924 = vst.msk [vmem:[#allocation3 + $0xf0] sm:$0xff] %vm893_vm3, %v858_v56 }
 0x350   : > { %1482 = vst.msk [vmem:[#allocation3 + $0x48] sm:$0xff] %vm1472_vm6, %v1395_v36 }
 0x351   : > { %1821 = vrot.lane.b32.xlu0 %v1728_v62, %s2603_s17 }
 0x352   : > { %v1051_v16 = vpop.permute.xlu1 %1050 }
 0x353   : > { %v1621_v0 = vpop.permute.xlu0 %1620  ;;  %1117 = vst.msk [vmem:[#allocation3 + $0xf0] sm:$0xff] %vm1086_vm4, %v1051_v16 }
 0x354   : > { %1692 = vst.msk [vmem:[#allocation3 + $0xc8] sm:$0xff] %vm1666_vm7, %v1621_v0 }
 0x355   : > { %1789 = vrot.lane.b32.xlu0 %v1712_v45, %s2603_s17 }
 0x356   : > { %v1019_v54 = vpop.permute.xlu1 %1018 }
 0x357   : > { %v1589_v13 = vpop.permute.xlu0 %1588  ;;  %1101 = vst.msk [vmem:[#allocation3 + $0x70] sm:$0xff] %vm1086_vm4, %v1019_v54 }
 0x358   : > { %1676 = vst.msk [vmem:[#allocation3 + $0x48] sm:$0xff] %vm1666_vm7, %v1589_v13 }
 0x359   : > { %2014 = vrot.lane.b32.xlu0 %v1921_v11, %s2604_s18 }
 0x35a   : > { %v1244_v43 = vpop.permute.xlu1 %1243 }
 0x35b   : > { %v1814_v14 = vpop.permute.xlu0 %1813  ;;  %1310 = vst.msk [vmem:[#allocation3 + $0xf0] sm:$0xff] %vm1279_vm5, %v1244_v43 }
 0x35c   : > { %1885 = vst.msk [vmem:[#allocation3 + $0xc8] sm:$0xff] %vm1859_vm8, %v1814_v14 }
 0x35d   : > { %1982 = vrot.lane.b32.xlu0 %v1905_v51, %s2604_s18 }
 0x35e   : > { %v1212_v5 = vpop.permute.xlu1 %1211 }
 0x35f   : > { %v1782_v3 = vpop.permute.xlu0 %1781  ;;  %1294 = vst.msk [vmem:[#allocation3 + $0x70] sm:$0xff] %vm1279_vm5, %v1212_v5 }
 0x360   : > { %1869 = vst.msk [vmem:[#allocation3 + $0x48] sm:$0xff] %vm1859_vm8, %v1782_v3  ;;  %v2098_v3 = vld [vmem:[#allocation3 + $0x60] sm:$0xff] }
 0x361   : > { %859 = vrot.lane.b32.xlu0 %v3604_v22, %s2598_s12  ;;  %v1537_v22 = vld [vmem:[#allocation2 + $0x22f] sm:$0xff] }
 0x362   : > { %v1437_v12 = vpop.permute.xlu1 %1436 }
 0x363   : > { %v2007_v1 = vpop.permute.xlu0 %2006  ;;  %1503 = vst.msk [vmem:[#allocation3 + $0xf0] sm:$0xff] %vm1472_vm6, %v1437_v12 }
 0x364   : > { %2078 = vst.msk [vmem:[#allocation3 + $0xc8] sm:$0xff] %vm2052_vm9, %v2007_v1 }
 0x365   : > { %1052 = vrot.lane.b32.xlu0 %v1535_v42, %s2599_s13 }
 0x366   : > { %v1405_v25 = vpop.permute.xlu1 %1404 }
 0x367   : > { %v1975_v26 = vpop.permute.xlu0 %1974  ;;  %1487 = vst.msk [vmem:[#allocation3 + $0x70] sm:$0xff] %vm1472_vm6, %v1405_v25 }
 0x368   : > { %2062 = vst.msk [vmem:[#allocation3 + $0x48] sm:$0xff] %vm2052_vm9, %v1975_v26 }
 0x369   : > { %1020 = vrot.lane.b32.xlu0 %v3780_v38, %s2599_s13 }
 0x36a   : > { %v1631_v29 = vpop.permute.xlu1 %1630 }
 0x36b   : > { %v852_v33 = vpop.permute.xlu0 %851  ;;  %v2111_v50 = vld [vmem:[#allocation3 + $0xc8] sm:$0xff]  ;;  %1697 = vst.msk [vmem:[#allocation3 + $0xf0] sm:$0xff] %vm1666_vm7, %v1631_v29 }
 0x36c   : > { %921 = vst.msk [vmem:[#allocation3 + $0xd8] sm:$0xff] %vm893_vm3, %v852_v33  ;;  %v2541_v31 = vpack.c.bf16 %v2111_v50, %v2110_v28 }
 0x36d   : > { %1245 = vrot.lane.b32.xlu0 %v1728_v62, %s2600_s14 }
 0x36e   : > { %2543 = vmatprep.subr.msk.bf16.mxu0 %vm3490_vm11, %v2541_v31  ;;  %v1599_v17 = vpop.permute.xlu1 %1598 }
 0x36f   : > { %v1045_v2 = vpop.permute.xlu0 %1044  ;;  %v2095_v9 = vld [vmem:[#allocation3 + $0x48] sm:$0xff]  ;;  %1681 = vst.msk [vmem:[#allocation3 + $0x70] sm:$0xff] %vm1666_vm7, %v1599_v17 }
 0x370   : > { %1114 = vst.msk [vmem:[#allocation3 + $0xd8] sm:$0xff] %vm1086_vm4, %v1045_v2  ;;  %v2544_v48 = vpack.c.bf16 %v2095_v9, %v2094_v40 }
 0x371   : > { %1213 = vrot.lane.b32.xlu0 %v1712_v45, %s2600_s14 }
 0x372   : > { %2546 = vmatpush3.bf16.xpose.msk.msra.mxu0 %vm3490_vm11, %v2544_v48  ;;  %v1824_v55 = vpop.permute.xlu1 %1823 }
 0x373   : > { %v1013_v52 = vpop.permute.xlu0 %1012  ;;  %1890 = vst.msk [vmem:[#allocation3 + $0xf0] sm:$0xff] %vm1859_vm8, %v1824_v55 }
 0x374   : > { %1098 = vst.msk [vmem:[#allocation3 + $0x58] sm:$0xff] %vm1086_vm4, %v1013_v52 }
 0x375   : > { %1438 = vrot.lane.b32.xlu0 %v1921_v11, %s2601_s15  ;;  %v2114_v11 = vld [vmem:[#allocation3 + $0xe0] sm:$0xff] }
 0x376   : > { %v1792_v47 = vpop.permute.xlu1 %1791 }
 0x377   : > { %v1238_v27 = vpop.permute.xlu0 %1237  ;;  %1874 = vst.msk [vmem:[#allocation3 + $0x70] sm:$0xff] %vm1859_vm8, %v1792_v47 }
 0x378   : > { %1307 = vst.msk [vmem:[#allocation3 + $0xd8] sm:$0xff] %vm1279_vm5, %v1238_v27 }
 0x379   : > { %1406 = vrot.lane.b32.xlu0 %v1905_v51, %s2601_s15 }
 0x37a   : > { %v2017_v24 = vpop.permute.xlu1 %2016 }
 0x37b   : > { %v1206_v21 = vpop.permute.xlu0 %1205  ;;  %2083 = vst.msk [vmem:[#allocation3 + $0xf0] sm:$0xff] %vm2052_vm9, %v2017_v24 }
 0x37c   : > { %1291 = vst.msk [vmem:[#allocation3 + $0x58] sm:$0xff] %vm1279_vm5, %v1206_v21 }
 0x37d   : > { %1632 = vrot.lane.b32.xlu0 %v1537_v22, %s2602_s16 }
 0x37e   : > { %v1985_v61 = vpop.permute.xlu1 %1984 }
 0x37f   : > { %v1431_v18 = vpop.permute.xlu0 %1430  ;;  %2067 = vst.msk [vmem:[#allocation3 + $0x70] sm:$0xff] %vm2052_vm9, %v1985_v61 }
 0x380   : > { %1500 = vst.msk [vmem:[#allocation3 + $0xd8] sm:$0xff] %vm1472_vm6, %v1431_v18 }
 0x381   : > { %1600 = vrot.lane.b32.xlu0 %v1521_v34, %s2602_s16 }
 0x382   : > { %v2116_v17 = vld [vmem:[#allocation3 + $0xf0] sm:$0xff] }
 0x383   : > { %v1399_v58 = vpop.permute.xlu0 %1398 }
 0x384   : > { %1484 = vst.msk [vmem:[#allocation3 + $0x58] sm:$0xff] %vm1472_vm6, %v1399_v58 }
 0x385   : > { %1825 = vrot.lane.b32.xlu0 %v1730_v15, %s2603_s17 }
 0x386   : > { %v2100_v55 = vld [vmem:[#allocation3 + $0x70] sm:$0xff] }
 0x387   : > { %v1625_v39 = vpop.permute.xlu0 %1624 }
 0x388   : > { %1694 = vst.msk [vmem:[#allocation3 + $0xd8] sm:$0xff] %vm1666_vm7, %v1625_v39 }
 0x389   : > { %1793 = vrot.lane.b32.xlu0 %v1714_v30, %s2603_s17 }
 0x38b   : > { %v1593_v44 = vpop.permute.xlu0 %1592 }
 0x38c   : > { %1678 = vst.msk [vmem:[#allocation3 + $0x58] sm:$0xff] %vm1666_vm7, %v1593_v44 }
 0x38d   : > { %2018 = vrot.lane.b32.xlu0 %v1923_v23, %s2604_s18 }
 0x38f   : > { %v1818_v8 = vpop.permute.xlu0 %1817 }
 0x390   : > { %1887 = vst.msk [vmem:[#allocation3 + $0xd8] sm:$0xff] %vm1859_vm8, %v1818_v8 }
 0x391   : > { %1986 = vrot.lane.b32.xlu0 %v1907_v46, %s2604_s18 }
 0x393   : > { %v1786_v35 = vpop.permute.xlu0 %1785 }
 0x394   : > { %1871 = vst.msk [vmem:[#allocation3 + $0x58] sm:$0xff] %vm1859_vm8, %v1786_v35 }
 0x397   : > { %v2011_v19 = vpop.permute.xlu0 %2010 }
 0x398   : > { %2080 = vst.msk [vmem:[#allocation3 + $0xd8] sm:$0xff] %vm2052_vm9, %v2011_v19 }
 0x39b   : > { %v1979_v60 = vpop.permute.xlu0 %1978 }
 0x39c   : > { %2064 = vst.msk [vmem:[#allocation3 + $0x58] sm:$0xff] %vm2052_vm9, %v1979_v60 }
 0x39f   : > { %v856_v53 = vpop.permute.xlu0 %855  ;;  %v2113_v37 = vld [vmem:[#allocation3 + $0xd8] sm:$0xff] }
 0x3a0   : > { %923 = vst.msk [vmem:[#allocation3 + $0xe8] sm:$0xff] %vm893_vm3, %v856_v53  ;;  %v2547_v6 = vpack.c.bf16 %v2113_v37, %v2112_v10 }
 0x3a2   : > { %2549 = vmatprep.subr.msk.bf16.mxu0 %vm3490_vm11, %v2547_v6 }
 0x3a3   : > { %v1049_v41 = vpop.permute.xlu0 %1048  ;;  %v2097_v63 = vld [vmem:[#allocation3 + $0x58] sm:$0xff] }
 0x3a4   : > { %1116 = vst.msk [vmem:[#allocation3 + $0xe8] sm:$0xff] %vm1086_vm4, %v1049_v41  ;;  %v2550_v49 = vpack.c.bf16 %v2097_v63, %v2096_v32 }
 0x3a6   : > { %2552 = vmatpush3.bf16.xpose.msk.msra.mxu0 %vm3490_vm11, %v2550_v49 }
 0x3a7   : > { %v1017_v42 = vpop.permute.xlu0 %1016 }
 0x3a8   : > { %1100 = vst.msk [vmem:[#allocation3 + $0x68] sm:$0xff] %vm1086_vm4, %v1017_v42 }
 0x3ab   : > { %v1242_v59 = vpop.permute.xlu0 %1241 }
 0x3ac   : > { %1309 = vst.msk [vmem:[#allocation3 + $0xe8] sm:$0xff] %vm1279_vm5, %v1242_v59 }
 0x3af   : > { %v1210_v20 = vpop.permute.xlu0 %1209 }
 0x3b0   : > { %1293 = vst.msk [vmem:[#allocation3 + $0x68] sm:$0xff] %vm1279_vm5, %v1210_v20 }
 0x3b3   : > { %v1435_v38 = vpop.permute.xlu0 %1434 }
 0x3b4   : > { %1502 = vst.msk [vmem:[#allocation3 + $0xe8] sm:$0xff] %vm1472_vm6, %v1435_v38 }
 0x3b7   : > { %v1403_v36 = vpop.permute.xlu0 %1402 }
 0x3b8   : > { %1486 = vst.msk [vmem:[#allocation3 + $0x68] sm:$0xff] %vm1472_vm6, %v1403_v36 }
 0x3bb   : > { %v1629_v56 = vpop.permute.xlu0 %1628 }
 0x3bc   : > { %1696 = vst.msk [vmem:[#allocation3 + $0xe8] sm:$0xff] %vm1666_vm7, %v1629_v56  ;;  %v2122_v22 = vpop.permute.xlu1 %2121 }
 0x3bf   : > { %v1597_v62 = vpop.permute.xlu0 %1596 }
 0x3c0   : > { %1680 = vst.msk [vmem:[#allocation3 + $0x68] sm:$0xff] %vm1666_vm7, %v1597_v62 }
 0x3c3   : > { %v1822_v0 = vpop.permute.xlu0 %1821 }
 0x3c4   : > { %1889 = vst.msk [vmem:[#allocation3 + $0xe8] sm:$0xff] %vm1859_vm8, %v1822_v0 }
 0x3c7   : > { %v1790_v16 = vpop.permute.xlu0 %1789 }
 0x3c8   : > { %1873 = vst.msk [vmem:[#allocation3 + $0x68] sm:$0xff] %vm1859_vm8, %v1790_v16 }
 0x3cb   : > { %v2015_v45 = vpop.permute.xlu0 %2014 }
 0x3cc   : > { %2082 = vst.msk [vmem:[#allocation3 + $0xe8] sm:$0xff] %vm2052_vm9, %v2015_v45 }
 0x3cf   : > { %v1983_v13 = vpop.permute.xlu0 %1982 }
 0x3d0   : > { %2066 = vst.msk [vmem:[#allocation3 + $0x68] sm:$0xff] %vm2052_vm9, %v1983_v13 }
 0x3d3   : > { %v860_v54 = vpop.permute.xlu0 %859  ;;  %v2115_v14 = vld [vmem:[#allocation3 + $0xe8] sm:$0xff] }
 0x3d4   : > { %925 = vst.msk [vmem:[#allocation3 + $0xf8] sm:$0xff] %vm893_vm3, %v860_v54  ;;  %v2553_v43 = vpack.c.bf16 %v2115_v14, %v2114_v11 }
 0x3d6   : > { %2555 = vmatprep.subr.msk.bf16.mxu0 %vm3490_vm11, %v2553_v43 }
 0x3d7   : > { %v1053_v51 = vpop.permute.xlu0 %1052  ;;  %v2099_v5 = vld [vmem:[#allocation3 + $0x68] sm:$0xff] }
 0x3d8   : > { %1118 = vst.msk [vmem:[#allocation3 + $0xf8] sm:$0xff] %vm1086_vm4, %v1053_v51  ;;  %v2556_v1 = vpack.c.bf16 %v2099_v5, %v2098_v3 }
 0x3da   : > { %2558 = vmatpush3.bf16.xpose.msk.msra.mxu0 %vm3490_vm11, %v2556_v1 }
 0x3db   : > { %v1021_v12 = vpop.permute.xlu0 %1020 }
 0x3dc   : > { %1102 = vst.msk [vmem:[#allocation3 + $0x78] sm:$0xff] %vm1086_vm4, %v1021_v12 }
 0x3df   : > { %v1246_v26 = vpop.permute.xlu0 %1245 }
 0x3e0   : > { %1311 = vst.msk [vmem:[#allocation3 + $0xf8] sm:$0xff] %vm1279_vm5, %v1246_v26 }
 0x3e3   : > { %v1214_v25 = vpop.permute.xlu0 %1213 }
 0x3e4   : > { %1295 = vst.msk [vmem:[#allocation3 + $0x78] sm:$0xff] %vm1279_vm5, %v1214_v25 }
 0x3e7   : > { %v1439_v33 = vpop.permute.xlu0 %1438 }
 0x3e8   : > { %1504 = vst.msk [vmem:[#allocation3 + $0xf8] sm:$0xff] %vm1472_vm6, %v1439_v33 }
 0x3eb   : > { %v1407_v28 = vpop.permute.xlu0 %1406 }
 0x3ec   : > { %1488 = vst.msk [vmem:[#allocation3 + $0x78] sm:$0xff] %vm1472_vm6, %v1407_v28 }
 0x3ef   : > { %v1633_v50 = vpop.permute.xlu0 %1632 }
 0x3f0   : > { %1698 = vst.msk [vmem:[#allocation3 + $0xf8] sm:$0xff] %vm1666_vm7, %v1633_v50 }
 0x3f3   : > { %v1601_v29 = vpop.permute.xlu0 %1600 }
 0x3f4   : > { %1682 = vst.msk [vmem:[#allocation3 + $0x78] sm:$0xff] %vm1666_vm7, %v1601_v29 }
 0x3f7   : > { %v1826_v31 = vpop.permute.xlu0 %1825 }
 0x3f8   : > { %1891 = vst.msk [vmem:[#allocation3 + $0xf8] sm:$0xff] %vm1859_vm8, %v1826_v31 }
 0x3fb   : > { %v1794_v2 = vpop.permute.xlu0 %1793 }
 0x3fc   : > { %1875 = vst.msk [vmem:[#allocation3 + $0x78] sm:$0xff] %vm1859_vm8, %v1794_v2 }
 0x3ff   : > { %v2019_v40 = vpop.permute.xlu0 %2018 }
 0x400   : > { %2084 = vst.msk [vmem:[#allocation3 + $0xf8] sm:$0xff] %vm2052_vm9, %v2019_v40 }
 0x403   : > { %v1987_v9 = vpop.permute.xlu0 %1986 }
 0x404   : > { %2068 = vst.msk [vmem:[#allocation3 + $0x78] sm:$0xff] %vm2052_vm9, %v1987_v9 }
 0x407   : > { %v2117_v48 = vld [vmem:[#allocation3 + $0xf8] sm:$0xff] }
 0x408   : > { %v2559_v52 = vpack.c.bf16 %v2117_v48, %v2116_v17 }
 0x40a   : > { %2561 = vmatprep.subr.msk.bf16.mxu0 %vm3490_vm11, %v2559_v52 }
 0x40b   : > { %v2101_v27 = vld [vmem:[#allocation3 + $0x78] sm:$0xff] }
 0x40c   : > { %v2562_v47 = vpack.c.bf16 %v2101_v27, %v2100_v55 }
 0x40e   : > { %2564 = vmatpush3.bf16.xpose.msk.msra.mxu0 %vm3490_vm11, %v2562_v47 }
 0x415   : > { %2516 = vmatmul.mubr.msk.f32.vlgmr.msra.gmra.mrb[0].mxu0 %vm2124_vm10, %v3700_v7 }
 0x4e8   : > { %v2290_v21 = vpop.f32.mrb[0].mxu0 }
 0x4e9   : > { %v2291_v24 = vadd.f32 %v2290_v21, %v2122_v22  ;;  %v2292_v18 = vpop.f32.mrb[1].mxu0 }
 0x4ea   : > { %v2293_v61 = vadd.f32 %v2292_v18, %v2122_v22 }
 0x4eb   : > { %v2295_v34 = vmax.f32 %v2291_v24, 0.0 }
 0x4ec   : > { %v2296_v15 = vmax.f32 %v2293_v61, 0.0 }
 0x4ed   : > { %v2310_v58 = vmul.f32 %v2295_v34, %v2295_v34  ;;  %v2303_v4 = vsel %vm2302_vm12, %v2295_v34, 0.0 }
 0x4ee   : > { %v2299_v39 = vcombine.low %v2295_v34, %v2296_v15  ;;  %v2311_v30 = vmul.f32 %v2296_v15, %v2296_v15  ;;  %v2304_v23 = vsel %vm2302_vm12, %v2296_v15, 0.0 }
 0x4ef   : > { %v2305_v44 = vadd.f32 %v2304_v23, %v2303_v4  ;;  %v2312_v7 = vsel %vm2302_vm12, %v2310_v58, 0.0 }
 0x4f0   : > { %2301 = vst [vmem:[%s291_s27] sm:$0xff] %v2299_v39  ;;  %v2313_v8 = vsel %vm2302_vm12, %v2311_v30, 0.0 }
 0x4f1   : > { %2306 = vadd.xlane.f32.xlu0 %v2305_v44  ;;  %v2314_v46 = vadd.f32 %v2313_v8, %v2312_v7 }
 0x4f3   : > { %2315 = vadd.xlane.f32.xlu1 %v2314_v46 }
 0x57e   : > { %v2307_v35 = vpop.xlane.xlu0 %2306 }
 0x57f   : > { %2309 = vst.msk [vmem:[%s295_s9] sm:$0xf] %vm2308_vm13, %v2307_v35 }
 0x580   : > { %v2316_v57 = vpop.xlane.xlu1 %2315 }
 0x581   : > { %2317 = vst.msk [vmem:[%s299_s11] sm:$0xf] %vm2308_vm13, %v2316_v57 }
 0x582 PF: > { %s18_s24 = sadd.s32 1, %s2592_s24  }
 0x583   : > { %p15_p4 = scmp.ge.s32.totalorder %s18_s24, 4  }
 0x585   :  { %17 = sbr.rel (!%p15_p4) target bundleno = 1 (0x1), region = 97 }

</bundles_post_ra>
